<compile_context>
chip_gen: v7x
topology: tpu7x:2x2x1
jax: 0.10.0
libtpu: 0.0.40
codegen_flags: <defaults>
</compile_context>

<pallas_src>
import functools

import jax
import jax.numpy as jnp
from jax.experimental import pallas as pl
from jax.experimental.pallas import tpu as pltpu


GENOTYPE_NORMAL = [
    ("sep_conv_3x3", 0), ("sep_conv_3x3", 1),
    ("sep_conv_3x3", 0), ("sep_conv_3x3", 1),
    ("sep_conv_3x3", 1), ("skip_connect", 0),
    ("skip_connect", 0), ("dil_conv_3x3", 2),
]
NORMAL_CONCAT = [2, 3, 4, 5]

_DILS_USED = tuple(sorted(
    {1 for n, _ in GENOTYPE_NORMAL if n == "sep_conv_3x3"}
    | {2 for n, _ in GENOTYPE_NORMAL if n == "dil_conv_3x3"}))


def _op_unit_indices(genotype=GENOTYPE_NORMAL):
    """One 'unit' = a (ReLU -> dw3x3 -> pw1x1 -> foldedBN) block.

    Returns, per genotype op, the tuple of unit slots it owns inside the
    packed parameter tables (sep_conv uses 2 units, dil_conv 1, skip 0).
    """
    units, n = [], 0
    for name, _ in genotype:
        if name == "sep_conv_3x3":
            units.append((n, n + 1)); n += 2
        elif name == "dil_conv_3x3":
            units.append((n,)); n += 1
        else:  # skip_connect (stride 1) = identity, no params
            units.append(())
    return tuple(units), n


# -----------------------------------------------------------------------------
# Fused whole-cell kernel.  One grid step == one batch image; working layout
# per tensor is (H, W*C) so the last dim maps onto the 128-lane axis.
# -----------------------------------------------------------------------------
def _cell_kernel(s0_ref, s1_ref,
                 p0w_ref, p0s_ref, p0b_ref,
                 p1w_ref, p1s_ref, p1b_ref,
                 dw_ref, pw_ref, sc_ref, sh_ref,
                 o_ref, *, H, W, C, op_units):
    WC = W * C

    # Vertical-halo masks (built once; reused across all depthwise convs).
    row = jax.lax.broadcasted_iota(jnp.int32, (H, WC), 0)
    row_mask = {}
    for dil in _DILS_USED:
        row_mask[(dil, -1)] = (row >= dil).astype(jnp.float32)      # reads h-dil
        row_mask[(dil, +1)] = (row < H - dil).astype(jnp.float32)   # reads h+dil

    def conv1x1_bn(x, w_bd, sc, sh, pre_relu):
        # 1x1 conv in the flattened (H, W*C) layout: matmul against the
        # block-diagonal bf16 weight (lane-dense MXU output), then folded BN.
        if pre_relu:
            x = jnp.maximum(x, 0.0)
        y = jnp.dot(x.astype(jnp.bfloat16), w_bd,
                    preferred_element_type=jnp.float32)
        return y * sc + sh

    def relu_dwconv3x3(x, unit, dil):
        # ReLU -> 3x3 depthwise conv (stride 1, dilation `dil`, "same" pad).
        # Spatial shifts are XLU rotations; horizontal boundary lanes are
        # already zeroed in the prepacked taps, vertical boundary rows are
        # zeroed with the precomputed row masks.
        xr = jnp.maximum(x, 0.0)
        dwf = dw_ref[unit]                              # (9, W*C), lane-masked
        acc = None
        for kw in range(3):
            dx = (kw - 1) * dil
            if dx == 0:
                xs = xr
            else:
                xs = pltpu.roll(xr, shift=(-dx * C) % WC, axis=1)
            for kh in range(3):
                dy = (kh - 1) * dil
                if dy == 0:
                    v = xs
                else:
                    v = pltpu.roll(xs, shift=(-dy) % H, axis=0)
                    v = v * row_mask[(dil, 1 if dy > 0 else -1)]
                t = 3 * kh + kw
                term = v * dwf[t:t + 1, :]
                acc = term if acc is None else acc + term
        return acc

    def unit_block(x, unit, dil):
        y = relu_dwconv3x3(x, unit, dil)
        return conv1x1_bn(y, pw_ref[unit], sc_ref[unit], sh_ref[unit],
                          pre_relu=False)

    def apply_op(name, x, units):
        if name == "sep_conv_3x3":        # (relu,dw,pw,bn) x 2
            return unit_block(unit_block(x, units[0], 1), units[1], 1)
        if name == "dil_conv_3x3":        # relu, dilated dw, pw, bn
            return unit_block(x, units[0], 2)
        return x                          # skip_connect (identity)

    # preprocess0 / preprocess1: ActivationConvBN(ReLU, 1x1 conv, BN)
    s0 = conv1x1_bn(s0_ref[...], p0w_ref[...], p0s_ref[...], p0b_ref[...], True)
    s1 = conv1x1_bn(s1_ref[...], p1w_ref[...], p1s_ref[...], p1b_ref[...], True)

    states = [s0, s1]
    for step in range(len(GENOTYPE_NORMAL) // 2):
        name1, i1 = GENOTYPE_NORMAL[2 * step]
        name2, i2 = GENOTYPE_NORMAL[2 * step + 1]
        h1 = apply_op(name1, states[i1], op_units[2 * step])
        h2 = apply_op(name2, states[i2], op_units[2 * step + 1])
        states.append(h1 + h2)

    for k, si in enumerate(NORMAL_CONCAT):
        o_ref[k] = states[si]             # (8, 128) lane-dense stores


# -----------------------------------------------------------------------------
# One-time parameter repack into the fused-kernel layout.
# -----------------------------------------------------------------------------
def prepare_cell_params(params, spatial_w):
    Wsp = spatial_w
    C = params["pre0"]["w"].shape[1]
    eye = jnp.eye(Wsp, dtype=jnp.float32)
    w_idx = jnp.repeat(jnp.arange(Wsp), C)            # lane -> spatial w index

    def block_diag(w):      # (cin, cout) -> (Wsp*cin, Wsp*cout) block-diag bf16
        return jnp.kron(eye, w).astype(jnp.bfloat16)

    def tile_vec(v):        # per-channel (cout,) -> (1, Wsp*cout)
        return jnp.tile(v, Wsp).reshape(1, Wsp * C)

    def tile_dw(dw, dil):   # (3, 3, C) -> (9, Wsp*C), horizontal halo folded in
        t = jnp.tile(dw, (1, 1, Wsp))                 # (3, 3, Wsp*C)
        kw_mask = jnp.stack([
            (w_idx >= dil),                           # kw=0 reads w-dil
            jnp.ones_like(w_idx, dtype=bool),         # kw=1 center
            (w_idx < Wsp - dil),                      # kw=2 reads w+dil
        ]).astype(jnp.float32)                        # (3, Wsp*C)
        t = t * kw_mask[None, :, :]
        return t.reshape(9, Wsp * C)

    dw_l, pw_l, sc_l, sh_l = [], [], [], []
    for (name, _), p in zip(GENOTYPE_NORMAL, params["ops"]):
        if name == "sep_conv_3x3":
            dw_l += [tile_dw(p["dw1"], 1), tile_dw(p["dw2"], 1)]
            pw_l += [block_diag(p["pw1"]), block_diag(p["pw2"])]
            sc_l += [tile_vec(p["scale1"]), tile_vec(p["scale2"])]
            sh_l += [tile_vec(p["shift1"]), tile_vec(p["shift2"])]
        elif name == "dil_conv_3x3":
            dw_l += [tile_dw(p["dw"], 2)]
            pw_l += [block_diag(p["pw"])]
            sc_l += [tile_vec(p["scale"])]
            sh_l += [tile_vec(p["shift"])]
        # skip_connect: no parameters
    return {
        "p0w": block_diag(params["pre0"]["w"]),
        "p0s": tile_vec(params["pre0"]["scale"]),
        "p0b": tile_vec(params["pre0"]["shift"]),
        "p1w": block_diag(params["pre1"]["w"]),
        "p1s": tile_vec(params["pre1"]["scale"]),
        "p1b": tile_vec(params["pre1"]["shift"]),
        "dw_all": jnp.stack(dw_l),            # (U, 9, W*C)    f32
        "pw_all": jnp.stack(pw_l),            # (U, W*C, W*C)  bf16
        "sc_all": jnp.stack(sc_l),            # (U, 1, W*C)    f32
        "sh_all": jnp.stack(sh_l),            # (U, 1, W*C)    f32
    }


# -----------------------------------------------------------------------------
# Wrapper: NCHW in / NCHW out, single fused pallas_call.
# -----------------------------------------------------------------------------
def cell_forward_pallas(prep, s0_nchw, s1_nchw, drop_path_prob=0.0):
    del drop_path_prob  # eval mode: drop_path / Dropout2d(0) are no-ops
    N, Cpp, H, W = s0_nchw.shape
    Cp = s1_nchw.shape[1]
    C = prep["p0w"].shape[1] // W
    WC = W * C
    U = prep["dw_all"].shape[0]
    num_cat = len(NORMAL_CONCAT)
    op_units, _ = _op_unit_indices()

    # NCHW -> NHWC -> flattened lane-dense (N, H, W*C) layout.
    s0 = jnp.transpose(s0_nchw, (0, 2, 3, 1)).reshape(N, H, W * Cpp)
    s1 = jnp.transpose(s1_nchw, (0, 2, 3, 1)).reshape(N, H, W * Cp)

    kern = functools.partial(_cell_kernel, H=H, W=W, C=C, op_units=op_units)

    out = pl.pallas_call(
        kern,
        out_shape=jax.ShapeDtypeStruct((N, num_cat, H, WC), jnp.float32),
        grid_spec=pltpu.PrefetchScalarGridSpec(
            num_scalar_prefetch=0,
            grid=(N,),
            in_specs=[
                pl.BlockSpec((None, H, W * Cpp), lambda i: (i, 0, 0)),
                pl.BlockSpec((None, H, W * Cp), lambda i: (i, 0, 0)),
                pl.BlockSpec((W * Cpp, WC), lambda i: (0, 0)),
                pl.BlockSpec((1, WC), lambda i: (0, 0)),
                pl.BlockSpec((1, WC), lambda i: (0, 0)),
                pl.BlockSpec((W * Cp, WC), lambda i: (0, 0)),
                pl.BlockSpec((1, WC), lambda i: (0, 0)),
                pl.BlockSpec((1, WC), lambda i: (0, 0)),
                pl.BlockSpec((U, 9, WC), lambda i: (0, 0, 0)),
                pl.BlockSpec((U, WC, WC), lambda i: (0, 0, 0)),
                pl.BlockSpec((U, 1, WC), lambda i: (0, 0, 0)),
                pl.BlockSpec((U, 1, WC), lambda i: (0, 0, 0)),
            ],
            out_specs=pl.BlockSpec((None, num_cat, H, WC),
                                   lambda i: (i, 0, 0, 0)),
        ),
        compiler_params=pltpu.CompilerParams(
            dimension_semantics=("parallel",)),
    )(s0, s1,
      prep["p0w"], prep["p0s"], prep["p0b"],
      prep["p1w"], prep["p1s"], prep["p1b"],
      prep["dw_all"], prep["pw_all"], prep["sc_all"], prep["sh_all"])

    # (N, num_cat, H, W*C) -> (N, num_cat*C, H, W)  == torch.cat(dim=1) in NCHW
    out = out.reshape(N, num_cat, H, W, C).transpose(0, 1, 4, 2, 3)
    return out.reshape(N, num_cat * C, H, W)


cell_forward_pallas = jax.jit(cell_forward_pallas)


# -----------------------------------------------------------------------------
# Pure-jnp reference (same math & same bf16 matmul precision, no Pallas).
# -----------------------------------------------------------------------------
def _ref_conv1x1_bn(x, w, scale, shift, pre_relu):
    if pre_relu:
        x = jnp.maximum(x, 0.0)
    y = jnp.einsum("nhwc,cd->nhwd", x.astype(jnp.bfloat16),
                   w.astype(jnp.bfloat16),
                   preferred_element_type=jnp.float32)
    return y * scale + shift


def _ref_relu_dwconv3x3(x, dw, dil):
    n, h, w, c = x.shape
    xp = jnp.pad(jnp.maximum(x, 0.0), ((0, 0), (dil, dil), (dil, dil), (0, 0)))
    acc = jnp.zeros_like(x)
    for kh in range(3):
        for kw in range(3):
            acc = acc + (xp[:, kh * dil:kh * dil + h, kw * dil:kw * dil + w, :]
                         * dw[kh, kw])
    return acc


def _ref_apply_op(name, x, p):
    if name == "sep_conv_3x3":
        y = _ref_relu_dwconv3x3(x, p["dw1"], 1)
        y = _ref_conv1x1_bn(y, p["pw1"], p["scale1"], p["shift1"], False)
        y = _ref_relu_dwconv3x3(y, p["dw2"], 1)
        return _ref_conv1x1_bn(y, p["pw2"], p["scale2"], p["shift2"], False)
    if name == "dil_conv_3x3":
        y = _ref_relu_dwconv3x3(x, p["dw"], 2)
        return _ref_conv1x1_bn(y, p["pw"], p["scale"], p["shift"], False)
    return x


def cell_forward_ref(params, s0_nchw, s1_nchw, drop_path_prob=0.0):
    del drop_path_prob
    s0 = jnp.transpose(s0_nchw, (0, 2, 3, 1))
    s1 = jnp.transpose(s1_nchw, (0, 2, 3, 1))
    s0 = _ref_conv1x1_bn(s0, params["pre0"]["w"], params["pre0"]["scale"],
                         params["pre0"]["shift"], True)
    s1 = _ref_conv1x1_bn(s1, params["pre1"]["w"], params["pre1"]["scale"],
                         params["pre1"]["shift"], True)
    states = [s0, s1]
    for step in range(len(GENOTYPE_NORMAL) // 2):
        name1, i1 = GENOTYPE_NORMAL[2 * step]
        name2, i2 = GENOTYPE_NORMAL[2 * step + 1]
        h1 = _ref_apply_op(name1, states[i1], params["ops"][2 * step])
        h2 = _ref_apply_op(name2, states[i2], params["ops"][2 * step + 1])
        states.append(h1 + h2)
    out = jnp.concatenate([states[i] for i in NORMAL_CONCAT], axis=-1)
    return jnp.transpose(out, (0, 3, 1, 2))


# -----------------------------------------------------------------------------
# Deterministic parameter init (BN folded to scale/shift, eval semantics).
# -----------------------------------------------------------------------------
def _fold_bn(key, c):
    k1, k2, k3, k4 = jax.random.split(key, 4)
    gamma = 1.0 + 0.1 * jax.random.normal(k1, (c,), jnp.float32)
    beta = 0.1 * jax.random.normal(k2, (c,), jnp.float32)
    mean = 0.1 * jax.random.normal(k3, (c,), jnp.float32)
    var = jax.random.uniform(k4, (c,), jnp.float32, 0.5, 1.5)
    scale = gamma * jax.lax.rsqrt(var + 1e-5)
    shift = beta - mean * scale
    return scale, shift


def _init_preprocess(key, cin, cout):
    k1, k2 = jax.random.split(key)
    scale, shift = _fold_bn(k2, cout)
    return {"w": 0.3 * jax.random.normal(k1, (cin, cout), jnp.float32),
            "scale": scale, "shift": shift}


def _init_sep_conv(key, c):
    ks = jax.random.split(key, 6)
    p = {"dw1": 0.3 * jax.random.normal(ks[0], (3, 3, c), jnp.float32),
         "pw1": 0.3 * jax.random.normal(ks[1], (c, c), jnp.float32),
         "dw2": 0.3 * jax.random.normal(ks[3], (3, 3, c), jnp.float32),
         "pw2": 0.3 * jax.random.normal(ks[4], (c, c), jnp.float32)}
    p["scale1"], p["shift1"] = _fold_bn(ks[2], c)
    p["scale2"], p["shift2"] = _fold_bn(ks[5], c)
    return p


def _init_dil_conv(key, c):
    ks = jax.random.split(key, 3)
    p = {"dw": 0.3 * jax.random.normal(ks[0], (3, 3, c), jnp.float32),
         "pw": 0.3 * jax.random.normal(ks[1], (c, c), jnp.float32)}
    p["scale"], p["shift"] = _fold_bn(ks[2], c)
    return p


def init_cell_params(key, c_prev_prev, c_prev, c):
    keys = jax.random.split(key, 2 + len(GENOTYPE_NORMAL))
    params = {"pre0": _init_preprocess(keys[0], c_prev_prev, c),
              "pre1": _init_preprocess(keys[1], c_prev, c),
              "ops": []}
    for j, (name, _) in enumerate(GENOTYPE_NORMAL):
        k = keys[2 + j]
        if name == "sep_conv_3x3":
            params["ops"].append(_init_sep_conv(k, c))
        elif name == "dil_conv_3x3":
            params["ops"].append(_init_dil_conv(k, c))
        else:
            params["ops"].append({})
    return params


# -----------------------------------------------------------------------------
if __name__ == "__main__":
    N, C_PP, C_P, C, H, W = 2, 16, 16, 16, 8, 8   # W*C = 128 -> lane-dense

    key = jax.random.PRNGKey(0)
    k_s0, k_s1, k_params = jax.random.split(key, 3)
    s0 = jax.random.normal(k_s0, (N, C_PP, H, W), jnp.float32)   # NCHW inputs
    s1 = jax.random.normal(k_s1, (N, C_P, H, W), jnp.float32)
    params = init_cell_params(k_params, C_PP, C_P, C)
    prep = prepare_cell_params(params, W)

    out = cell_forward_pallas(prep, s0, s1, 0.0)
    out = jax.block_until_ready(out)
    assert out.shape == (N, len(NORMAL_CONCAT) * C, H, W), out.shape

    ref = jax.block_until_ready(cell_forward_ref(params, s0, s1, 0.0))
    max_err = float(jnp.max(jnp.abs(out - ref)))
    assert jnp.allclose(out, ref, rtol=2e-2, atol=2e-2), max_err

    print("KERNEL_OK")
</pallas_src>

<mosaic_0001>
module attributes {stable_mosaic.version = 11 : i64} {
  func.func @_cell_kernel(%arg0: i32, %arg1: memref<1x8x128xf32, #tpu.memory_space<vmem>>, %arg2: memref<1x8x128xf32, #tpu.memory_space<vmem>>, %arg3: memref<128x128xbf16, #tpu.memory_space<vmem>>, %arg4: memref<1x128xf32, #tpu.memory_space<vmem>>, %arg5: memref<1x128xf32, #tpu.memory_space<vmem>>, %arg6: memref<128x128xbf16, #tpu.memory_space<vmem>>, %arg7: memref<1x128xf32, #tpu.memory_space<vmem>>, %arg8: memref<1x128xf32, #tpu.memory_space<vmem>>, %arg9: memref<11x9x128xf32, #tpu.memory_space<vmem>>, %arg10: memref<11x128x128xbf16, #tpu.memory_space<vmem>>, %arg11: memref<11x1x128xf32, #tpu.memory_space<vmem>>, %arg12: memref<11x1x128xf32, #tpu.memory_space<vmem>>, %arg13: memref<1x4x8x128xf32, #tpu.memory_space<vmem>>) attributes {dimension_semantics = [#tpu.dimension_semantics<parallel>], iteration_bounds = array<i64: 2>, scalar_prefetch = 0 : i64, scratch_operands = 0 : i64, tpu.core_type = #tpu.core_type<tc>, window_params = [{transform_indices = @transform_0, window_bounds = array<i64: 1, 8, 128>}, {transform_indices = @transform_1, window_bounds = array<i64: 1, 8, 128>}, {pipeline_mode = #tpu.pipeline_mode<synchronous>, transform_indices = @transform_2, window_bounds = array<i64: 128, 128>}, {pipeline_mode = #tpu.pipeline_mode<synchronous>, transform_indices = @transform_3, window_bounds = array<i64: 1, 128>}, {pipeline_mode = #tpu.pipeline_mode<synchronous>, transform_indices = @transform_4, window_bounds = array<i64: 1, 128>}, {pipeline_mode = #tpu.pipeline_mode<synchronous>, transform_indices = @transform_5, window_bounds = array<i64: 128, 128>}, {pipeline_mode = #tpu.pipeline_mode<synchronous>, transform_indices = @transform_6, window_bounds = array<i64: 1, 128>}, {pipeline_mode = #tpu.pipeline_mode<synchronous>, transform_indices = @transform_7, window_bounds = array<i64: 1, 128>}, {pipeline_mode = #tpu.pipeline_mode<synchronous>, transform_indices = @transform_8, window_bounds = array<i64: 11, 9, 128>}, {pipeline_mode = #tpu.pipeline_mode<synchronous>, transform_indices = @transform_9, window_bounds = array<i64: 11, 128, 128>}, {pipeline_mode = #tpu.pipeline_mode<synchronous>, transform_indices = @transform_10, window_bounds = array<i64: 11, 1, 128>}, {pipeline_mode = #tpu.pipeline_mode<synchronous>, transform_indices = @transform_11, window_bounds = array<i64: 11, 1, 128>}, {transform_indices = @transform_12, window_bounds = array<i64: 1, 4, 8, 128>}]} {
    %0 = tpu.iota {dimensions = array<i32: 0>} : vector<8x128xi32>
    %c1_i32 = arith.constant 1 : i32
    %1 = vector.broadcast %c1_i32 : i32 to vector<8x128xi32>
    %2 = arith.cmpi sge, %0, %1 : vector<8x128xi32>
    %3 = arith.extui %2 : vector<8x128xi1> to vector<8x128xi32>
    %4 = arith.sitofp %3 : vector<8x128xi32> to vector<8x128xf32>
    %c7_i32 = arith.constant 7 : i32
    %5 = vector.broadcast %c7_i32 : i32 to vector<8x128xi32>
    %6 = arith.cmpi slt, %0, %5 : vector<8x128xi32>
    %7 = arith.extui %6 : vector<8x128xi1> to vector<8x128xi32>
    %8 = arith.sitofp %7 : vector<8x128xi32> to vector<8x128xf32>
    %c2_i32 = arith.constant 2 : i32
    %9 = vector.broadcast %c2_i32 : i32 to vector<8x128xi32>
    %10 = arith.cmpi sge, %0, %9 : vector<8x128xi32>
    %11 = arith.extui %10 : vector<8x128xi1> to vector<8x128xi32>
    %12 = arith.sitofp %11 : vector<8x128xi32> to vector<8x128xf32>
    %c6_i32 = arith.constant 6 : i32
    %13 = vector.broadcast %c6_i32 : i32 to vector<8x128xi32>
    %14 = arith.cmpi slt, %0, %13 : vector<8x128xi32>
    %15 = arith.extui %14 : vector<8x128xi1> to vector<8x128xi32>
    %16 = arith.sitofp %15 : vector<8x128xi32> to vector<8x128xf32>
    %c0 = arith.constant 0 : index
    %c0_0 = arith.constant 0 : index
    %c0_1 = arith.constant 0 : index
    %17 = vector.load %arg1[%c0, %c0_0, %c0_1] : memref<1x8x128xf32, #tpu.memory_space<vmem>>, vector<1x8x128xf32>
    %18 = vector.shape_cast %17 : vector<1x8x128xf32> to vector<8x128xf32>
    %c0_2 = arith.constant 0 : index
    %c0_3 = arith.constant 0 : index
    %19 = vector.load %arg3[%c0_2, %c0_3] : memref<128x128xbf16, #tpu.memory_space<vmem>>, vector<128x128xbf16>
    %c0_4 = arith.constant 0 : index
    %c0_5 = arith.constant 0 : index
    %20 = vector.load %arg4[%c0_4, %c0_5] : memref<1x128xf32, #tpu.memory_space<vmem>>, vector<1x128xf32>
    %c0_6 = arith.constant 0 : index
    %c0_7 = arith.constant 0 : index
    %21 = vector.load %arg5[%c0_6, %c0_7] : memref<1x128xf32, #tpu.memory_space<vmem>>, vector<1x128xf32>
    %cst = arith.constant 0.000000e+00 : f32
    %22 = vector.broadcast %cst : f32 to vector<8x128xf32>
    %23 = arith.maximumf %18, %22 : vector<8x128xf32>
    %24 = arith.truncf %23 : vector<8x128xf32> to vector<8x128xbf16>
    %cst_8 = arith.constant dense<0.000000e+00> : vector<8x128xf32>
    %25 = tpu.matmul %24, %19, %cst_8 {dimension_numbers = #tpu.dot_dimension_numbers<[1], [0], [0], [1], [0, 0, 1, 1], [], []>} : vector<8x128xbf16>, vector<128x128xbf16>, vector<8x128xf32> -> vector<8x128xf32>
    %26 = vector.broadcast %20 : vector<1x128xf32> to vector<8x128xf32>
    %27 = arith.mulf %25, %26 : vector<8x128xf32>
    %28 = vector.broadcast %21 : vector<1x128xf32> to vector<8x128xf32>
    %29 = arith.addf %27, %28 : vector<8x128xf32>
    %c0_9 = arith.constant 0 : index
    %c0_10 = arith.constant 0 : index
    %c0_11 = arith.constant 0 : index
    %30 = vector.load %arg2[%c0_9, %c0_10, %c0_11] : memref<1x8x128xf32, #tpu.memory_space<vmem>>, vector<1x8x128xf32>
    %31 = vector.shape_cast %30 : vector<1x8x128xf32> to vector<8x128xf32>
    %c0_12 = arith.constant 0 : index
    %c0_13 = arith.constant 0 : index
    %32 = vector.load %arg6[%c0_12, %c0_13] : memref<128x128xbf16, #tpu.memory_space<vmem>>, vector<128x128xbf16>
    %c0_14 = arith.constant 0 : index
    %c0_15 = arith.constant 0 : index
    %33 = vector.load %arg7[%c0_14, %c0_15] : memref<1x128xf32, #tpu.memory_space<vmem>>, vector<1x128xf32>
    %c0_16 = arith.constant 0 : index
    %c0_17 = arith.constant 0 : index
    %34 = vector.load %arg8[%c0_16, %c0_17] : memref<1x128xf32, #tpu.memory_space<vmem>>, vector<1x128xf32>
    %cst_18 = arith.constant 0.000000e+00 : f32
    %35 = vector.broadcast %cst_18 : f32 to vector<8x128xf32>
    %36 = arith.maximumf %31, %35 : vector<8x128xf32>
    %37 = arith.truncf %36 : vector<8x128xf32> to vector<8x128xbf16>
    %cst_19 = arith.constant dense<0.000000e+00> : vector<8x128xf32>
    %38 = tpu.matmul %37, %32, %cst_19 {dimension_numbers = #tpu.dot_dimension_numbers<[1], [0], [0], [1], [0, 0, 1, 1], [], []>} : vector<8x128xbf16>, vector<128x128xbf16>, vector<8x128xf32> -> vector<8x128xf32>
    %39 = vector.broadcast %33 : vector<1x128xf32> to vector<8x128xf32>
    %40 = arith.mulf %38, %39 : vector<8x128xf32>
    %41 = vector.broadcast %34 : vector<1x128xf32> to vector<8x128xf32>
    %42 = arith.addf %40, %41 : vector<8x128xf32>
    %cst_20 = arith.constant 0.000000e+00 : f32
    %43 = vector.broadcast %cst_20 : f32 to vector<8x128xf32>
    %44 = arith.maximumf %29, %43 : vector<8x128xf32>
    %c0_21 = arith.constant 0 : index
    %c0_22 = arith.constant 0 : index
    %c0_23 = arith.constant 0 : index
    %45 = vector.load %arg9[%c0_21, %c0_22, %c0_23] : memref<11x9x128xf32, #tpu.memory_space<vmem>>, vector<1x9x128xf32>
    %46 = vector.shape_cast %45 : vector<1x9x128xf32> to vector<9x128xf32>
    %c16_i32 = arith.constant 16 : i32
    %47 = tpu.dynamic_rotate %44 by %c16_i32 dim 1 : vector<8x128xf32>, i32 -> vector<8x128xf32>
    %c1_i32_24 = arith.constant 1 : i32
    %48 = tpu.dynamic_rotate %47 by %c1_i32_24 dim 0 : vector<8x128xf32>, i32 -> vector<8x128xf32>
    %49 = arith.mulf %48, %4 : vector<8x128xf32>
    %50 = vector.extract_strided_slice %46 {offsets = [0, 0], sizes = [1, 128], strides = [1, 1]} : vector<9x128xf32> to vector<1x128xf32>
    %51 = vector.broadcast %50 : vector<1x128xf32> to vector<8x128xf32>
    %52 = arith.mulf %49, %51 : vector<8x128xf32>
    %53 = vector.extract_strided_slice %46 {offsets = [3, 0], sizes = [1, 128], strides = [1, 1]} : vector<9x128xf32> to vector<1x128xf32>
    %54 = vector.broadcast %53 : vector<1x128xf32> to vector<8x128xf32>
    %55 = arith.mulf %47, %54 : vector<8x128xf32>
    %56 = arith.addf %52, %55 : vector<8x128xf32>
    %c7_i32_25 = arith.constant 7 : i32
    %57 = tpu.dynamic_rotate %47 by %c7_i32_25 dim 0 : vector<8x128xf32>, i32 -> vector<8x128xf32>
    %58 = arith.mulf %57, %8 : vector<8x128xf32>
    %59 = vector.extract_strided_slice %46 {offsets = [6, 0], sizes = [1, 128], strides = [1, 1]} : vector<9x128xf32> to vector<1x128xf32>
    %60 = vector.broadcast %59 : vector<1x128xf32> to vector<8x128xf32>
    %61 = arith.mulf %58, %60 : vector<8x128xf32>
    %62 = arith.addf %56, %61 : vector<8x128xf32>
    %c1_i32_26 = arith.constant 1 : i32
    %63 = tpu.dynamic_rotate %44 by %c1_i32_26 dim 0 : vector<8x128xf32>, i32 -> vector<8x128xf32>
    %64 = arith.mulf %63, %4 : vector<8x128xf32>
    %65 = vector.extract_strided_slice %46 {offsets = [1, 0], sizes = [1, 128], strides = [1, 1]} : vector<9x128xf32> to vector<1x128xf32>
    %66 = vector.broadcast %65 : vector<1x128xf32> to vector<8x128xf32>
    %67 = arith.mulf %64, %66 : vector<8x128xf32>
    %68 = arith.addf %62, %67 : vector<8x128xf32>
    %69 = vector.extract_strided_slice %46 {offsets = [4, 0], sizes = [1, 128], strides = [1, 1]} : vector<9x128xf32> to vector<1x128xf32>
    %70 = vector.broadcast %69 : vector<1x128xf32> to vector<8x128xf32>
    %71 = arith.mulf %44, %70 : vector<8x128xf32>
    %72 = arith.addf %68, %71 : vector<8x128xf32>
    %c7_i32_27 = arith.constant 7 : i32
    %73 = tpu.dynamic_rotate %44 by %c7_i32_27 dim 0 : vector<8x128xf32>, i32 -> vector<8x128xf32>
    %74 = arith.mulf %73, %8 : vector<8x128xf32>
    %75 = vector.extract_strided_slice %46 {offsets = [7, 0], sizes = [1, 128], strides = [1, 1]} : vector<9x128xf32> to vector<1x128xf32>
    %76 = vector.broadcast %75 : vector<1x128xf32> to vector<8x128xf32>
    %77 = arith.mulf %74, %76 : vector<8x128xf32>
    %78 = arith.addf %72, %77 : vector<8x128xf32>
    %c112_i32 = arith.constant 112 : i32
    %79 = tpu.dynamic_rotate %44 by %c112_i32 dim 1 : vector<8x128xf32>, i32 -> vector<8x128xf32>
    %c1_i32_28 = arith.constant 1 : i32
    %80 = tpu.dynamic_rotate %79 by %c1_i32_28 dim 0 : vector<8x128xf32>, i32 -> vector<8x128xf32>
    %81 = arith.mulf %80, %4 : vector<8x128xf32>
    %82 = vector.extract_strided_slice %46 {offsets = [2, 0], sizes = [1, 128], strides = [1, 1]} : vector<9x128xf32> to vector<1x128xf32>
    %83 = vector.broadcast %82 : vector<1x128xf32> to vector<8x128xf32>
    %84 = arith.mulf %81, %83 : vector<8x128xf32>
    %85 = arith.addf %78, %84 : vector<8x128xf32>
    %86 = vector.extract_strided_slice %46 {offsets = [5, 0], sizes = [1, 128], strides = [1, 1]} : vector<9x128xf32> to vector<1x128xf32>
    %87 = vector.broadcast %86 : vector<1x128xf32> to vector<8x128xf32>
    %88 = arith.mulf %79, %87 : vector<8x128xf32>
    %89 = arith.addf %85, %88 : vector<8x128xf32>
    %c7_i32_29 = arith.constant 7 : i32
    %90 = tpu.dynamic_rotate %79 by %c7_i32_29 dim 0 : vector<8x128xf32>, i32 -> vector<8x128xf32>
    %91 = arith.mulf %90, %8 : vector<8x128xf32>
    %92 = vector.extract_strided_slice %46 {offsets = [8, 0], sizes = [1, 128], strides = [1, 1]} : vector<9x128xf32> to vector<1x128xf32>
    %93 = vector.broadcast %92 : vector<1x128xf32> to vector<8x128xf32>
    %94 = arith.mulf %91, %93 : vector<8x128xf32>
    %95 = arith.addf %89, %94 : vector<8x128xf32>
    %c0_30 = arith.constant 0 : index
    %c0_31 = arith.constant 0 : index
    %c0_32 = arith.constant 0 : index
    %96 = vector.load %arg10[%c0_30, %c0_31, %c0_32] : memref<11x128x128xbf16, #tpu.memory_space<vmem>>, vector<1x128x128xbf16>
    %97 = vector.shape_cast %96 : vector<1x128x128xbf16> to vector<128x128xbf16>
    %c0_33 = arith.constant 0 : index
    %c0_34 = arith.constant 0 : index
    %c0_35 = arith.constant 0 : index
    %98 = vector.load %arg11[%c0_33, %c0_34, %c0_35] : memref<11x1x128xf32, #tpu.memory_space<vmem>>, vector<1x1x128xf32>
    %99 = vector.shape_cast %98 : vector<1x1x128xf32> to vector<1x128xf32>
    %c0_36 = arith.constant 0 : index
    %c0_37 = arith.constant 0 : index
    %c0_38 = arith.constant 0 : index
    %100 = vector.load %arg12[%c0_36, %c0_37, %c0_38] : memref<11x1x128xf32, #tpu.memory_space<vmem>>, vector<1x1x128xf32>
    %101 = vector.shape_cast %100 : vector<1x1x128xf32> to vector<1x128xf32>
    %102 = arith.truncf %95 : vector<8x128xf32> to vector<8x128xbf16>
    %cst_39 = arith.constant dense<0.000000e+00> : vector<8x128xf32>
    %103 = tpu.matmul %102, %97, %cst_39 {dimension_numbers = #tpu.dot_dimension_numbers<[1], [0], [0], [1], [0, 0, 1, 1], [], []>} : vector<8x128xbf16>, vector<128x128xbf16>, vector<8x128xf32> -> vector<8x128xf32>
    %104 = vector.broadcast %99 : vector<1x128xf32> to vector<8x128xf32>
    %105 = arith.mulf %103, %104 : vector<8x128xf32>
    %106 = vector.broadcast %101 : vector<1x128xf32> to vector<8x128xf32>
    %107 = arith.addf %105, %106 : vector<8x128xf32>
    %cst_40 = arith.constant 0.000000e+00 : f32
    %108 = vector.broadcast %cst_40 : f32 to vector<8x128xf32>
    %109 = arith.maximumf %107, %108 : vector<8x128xf32>
    %c1 = arith.constant 1 : index
    %c0_41 = arith.constant 0 : index
    %c0_42 = arith.constant 0 : index
    %110 = vector.load %arg9[%c1, %c0_41, %c0_42] : memref<11x9x128xf32, #tpu.memory_space<vmem>>, vector<1x9x128xf32>
    %111 = vector.shape_cast %110 : vector<1x9x128xf32> to vector<9x128xf32>
    %c16_i32_43 = arith.constant 16 : i32
    %112 = tpu.dynamic_rotate %109 by %c16_i32_43 dim 1 : vector<8x128xf32>, i32 -> vector<8x128xf32>
    %c1_i32_44 = arith.constant 1 : i32
    %113 = tpu.dynamic_rotate %112 by %c1_i32_44 dim 0 : vector<8x128xf32>, i32 -> vector<8x128xf32>
    %114 = arith.mulf %113, %4 : vector<8x128xf32>
    %115 = vector.extract_strided_slice %111 {offsets = [0, 0], sizes = [1, 128], strides = [1, 1]} : vector<9x128xf32> to vector<1x128xf32>
    %116 = vector.broadcast %115 : vector<1x128xf32> to vector<8x128xf32>
    %117 = arith.mulf %114, %116 : vector<8x128xf32>
    %118 = vector.extract_strided_slice %111 {offsets = [3, 0], sizes = [1, 128], strides = [1, 1]} : vector<9x128xf32> to vector<1x128xf32>
    %119 = vector.broadcast %118 : vector<1x128xf32> to vector<8x128xf32>
    %120 = arith.mulf %112, %119 : vector<8x128xf32>
    %121 = arith.addf %117, %120 : vector<8x128xf32>
    %c7_i32_45 = arith.constant 7 : i32
    %122 = tpu.dynamic_rotate %112 by %c7_i32_45 dim 0 : vector<8x128xf32>, i32 -> vector<8x128xf32>
    %123 = arith.mulf %122, %8 : vector<8x128xf32>
    %124 = vector.extract_strided_slice %111 {offsets = [6, 0], sizes = [1, 128], strides = [1, 1]} : vector<9x128xf32> to vector<1x128xf32>
    %125 = vector.broadcast %124 : vector<1x128xf32> to vector<8x128xf32>
    %126 = arith.mulf %123, %125 : vector<8x128xf32>
    %127 = arith.addf %121, %126 : vector<8x128xf32>
    %c1_i32_46 = arith.constant 1 : i32
    %128 = tpu.dynamic_rotate %109 by %c1_i32_46 dim 0 : vector<8x128xf32>, i32 -> vector<8x128xf32>
    %129 = arith.mulf %128, %4 : vector<8x128xf32>
    %130 = vector.extract_strided_slice %111 {offsets = [1, 0], sizes = [1, 128], strides = [1, 1]} : vector<9x128xf32> to vector<1x128xf32>
    %131 = vector.broadcast %130 : vector<1x128xf32> to vector<8x128xf32>
    %132 = arith.mulf %129, %131 : vector<8x128xf32>
    %133 = arith.addf %127, %132 : vector<8x128xf32>
    %134 = vector.extract_strided_slice %111 {offsets = [4, 0], sizes = [1, 128], strides = [1, 1]} : vector<9x128xf32> to vector<1x128xf32>
    %135 = vector.broadcast %134 : vector<1x128xf32> to vector<8x128xf32>
    %136 = arith.mulf %109, %135 : vector<8x128xf32>
    %137 = arith.addf %133, %136 : vector<8x128xf32>
    %c7_i32_47 = arith.constant 7 : i32
    %138 = tpu.dynamic_rotate %109 by %c7_i32_47 dim 0 : vector<8x128xf32>, i32 -> vector<8x128xf32>
    %139 = arith.mulf %138, %8 : vector<8x128xf32>
    %140 = vector.extract_strided_slice %111 {offsets = [7, 0], sizes = [1, 128], strides = [1, 1]} : vector<9x128xf32> to vector<1x128xf32>
    %141 = vector.broadcast %140 : vector<1x128xf32> to vector<8x128xf32>
    %142 = arith.mulf %139, %141 : vector<8x128xf32>
    %143 = arith.addf %137, %142 : vector<8x128xf32>
    %c112_i32_48 = arith.constant 112 : i32
    %144 = tpu.dynamic_rotate %109 by %c112_i32_48 dim 1 : vector<8x128xf32>, i32 -> vector<8x128xf32>
    %c1_i32_49 = arith.constant 1 : i32
    %145 = tpu.dynamic_rotate %144 by %c1_i32_49 dim 0 : vector<8x128xf32>, i32 -> vector<8x128xf32>
    %146 = arith.mulf %145, %4 : vector<8x128xf32>
    %147 = vector.extract_strided_slice %111 {offsets = [2, 0], sizes = [1, 128], strides = [1, 1]} : vector<9x128xf32> to vector<1x128xf32>
    %148 = vector.broadcast %147 : vector<1x128xf32> to vector<8x128xf32>
    %149 = arith.mulf %146, %148 : vector<8x128xf32>
    %150 = arith.addf %143, %149 : vector<8x128xf32>
    %151 = vector.extract_strided_slice %111 {offsets = [5, 0], sizes = [1, 128], strides = [1, 1]} : vector<9x128xf32> to vector<1x128xf32>
    %152 = vector.broadcast %151 : vector<1x128xf32> to vector<8x128xf32>
    %153 = arith.mulf %144, %152 : vector<8x128xf32>
    %154 = arith.addf %150, %153 : vector<8x128xf32>
    %c7_i32_50 = arith.constant 7 : i32
    %155 = tpu.dynamic_rotate %144 by %c7_i32_50 dim 0 : vector<8x128xf32>, i32 -> vector<8x128xf32>
    %156 = arith.mulf %155, %8 : vector<8x128xf32>
    %157 = vector.extract_strided_slice %111 {offsets = [8, 0], sizes = [1, 128], strides = [1, 1]} : vector<9x128xf32> to vector<1x128xf32>
    %158 = vector.broadcast %157 : vector<1x128xf32> to vector<8x128xf32>
    %159 = arith.mulf %156, %158 : vector<8x128xf32>
    %160 = arith.addf %154, %159 : vector<8x128xf32>
    %c1_51 = arith.constant 1 : index
    %c0_52 = arith.constant 0 : index
    %c0_53 = arith.constant 0 : index
    %161 = vector.load %arg10[%c1_51, %c0_52, %c0_53] : memref<11x128x128xbf16, #tpu.memory_space<vmem>>, vector<1x128x128xbf16>
    %162 = vector.shape_cast %161 : vector<1x128x128xbf16> to vector<128x128xbf16>
    %c1_54 = arith.constant 1 : index
    %c0_55 = arith.constant 0 : index
    %c0_56 = arith.constant 0 : index
    %163 = vector.load %arg11[%c1_54, %c0_55, %c0_56] : memref<11x1x128xf32, #tpu.memory_space<vmem>>, vector<1x1x128xf32>
    %164 = vector.shape_cast %163 : vector<1x1x128xf32> to vector<1x128xf32>
    %c1_57 = arith.constant 1 : index
    %c0_58 = arith.constant 0 : index
    %c0_59 = arith.constant 0 : index
    %165 = vector.load %arg12[%c1_57, %c0_58, %c0_59] : memref<11x1x128xf32, #tpu.memory_space<vmem>>, vector<1x1x128xf32>
    %166 = vector.shape_cast %165 : vector<1x1x128xf32> to vector<1x128xf32>
    %167 = arith.truncf %160 : vector<8x128xf32> to vector<8x128xbf16>
    %cst_60 = arith.constant dense<0.000000e+00> : vector<8x128xf32>
    %168 = tpu.matmul %167, %162, %cst_60 {dimension_numbers = #tpu.dot_dimension_numbers<[1], [0], [0], [1], [0, 0, 1, 1], [], []>} : vector<8x128xbf16>, vector<128x128xbf16>, vector<8x128xf32> -> vector<8x128xf32>
    %169 = vector.broadcast %164 : vector<1x128xf32> to vector<8x128xf32>
    %170 = arith.mulf %168, %169 : vector<8x128xf32>
    %171 = vector.broadcast %166 : vector<1x128xf32> to vector<8x128xf32>
    %172 = arith.addf %170, %171 : vector<8x128xf32>
    %cst_61 = arith.constant 0.000000e+00 : f32
    %173 = vector.broadcast %cst_61 : f32 to vector<8x128xf32>
    %174 = arith.maximumf %42, %173 : vector<8x128xf32>
    %c2 = arith.constant 2 : index
    %c0_62 = arith.constant 0 : index
    %c0_63 = arith.constant 0 : index
    %175 = vector.load %arg9[%c2, %c0_62, %c0_63] : memref<11x9x128xf32, #tpu.memory_space<vmem>>, vector<1x9x128xf32>
    %176 = vector.shape_cast %175 : vector<1x9x128xf32> to vector<9x128xf32>
    %c16_i32_64 = arith.constant 16 : i32
    %177 = tpu.dynamic_rotate %174 by %c16_i32_64 dim 1 : vector<8x128xf32>, i32 -> vector<8x128xf32>
    %c1_i32_65 = arith.constant 1 : i32
    %178 = tpu.dynamic_rotate %177 by %c1_i32_65 dim 0 : vector<8x128xf32>, i32 -> vector<8x128xf32>
    %179 = arith.mulf %178, %4 : vector<8x128xf32>
    %180 = vector.extract_strided_slice %176 {offsets = [0, 0], sizes = [1, 128], strides = [1, 1]} : vector<9x128xf32> to vector<1x128xf32>
    %181 = vector.broadcast %180 : vector<1x128xf32> to vector<8x128xf32>
    %182 = arith.mulf %179, %181 : vector<8x128xf32>
    %183 = vector.extract_strided_slice %176 {offsets = [3, 0], sizes = [1, 128], strides = [1, 1]} : vector<9x128xf32> to vector<1x128xf32>
    %184 = vector.broadcast %183 : vector<1x128xf32> to vector<8x128xf32>
    %185 = arith.mulf %177, %184 : vector<8x128xf32>
    %186 = arith.addf %182, %185 : vector<8x128xf32>
    %c7_i32_66 = arith.constant 7 : i32
    %187 = tpu.dynamic_rotate %177 by %c7_i32_66 dim 0 : vector<8x128xf32>, i32 -> vector<8x128xf32>
    %188 = arith.mulf %187, %8 : vector<8x128xf32>
    %189 = vector.extract_strided_slice %176 {offsets = [6, 0], sizes = [1, 128], strides = [1, 1]} : vector<9x128xf32> to vector<1x128xf32>
    %190 = vector.broadcast %189 : vector<1x128xf32> to vector<8x128xf32>
    %191 = arith.mulf %188, %190 : vector<8x128xf32>
    %192 = arith.addf %186, %191 : vector<8x128xf32>
    %c1_i32_67 = arith.constant 1 : i32
    %193 = tpu.dynamic_rotate %174 by %c1_i32_67 dim 0 : vector<8x128xf32>, i32 -> vector<8x128xf32>
    %194 = arith.mulf %193, %4 : vector<8x128xf32>
    %195 = vector.extract_strided_slice %176 {offsets = [1, 0], sizes = [1, 128], strides = [1, 1]} : vector<9x128xf32> to vector<1x128xf32>
    %196 = vector.broadcast %195 : vector<1x128xf32> to vector<8x128xf32>
    %197 = arith.mulf %194, %196 : vector<8x128xf32>
    %198 = arith.addf %192, %197 : vector<8x128xf32>
    %199 = vector.extract_strided_slice %176 {offsets = [4, 0], sizes = [1, 128], strides = [1, 1]} : vector<9x128xf32> to vector<1x128xf32>
    %200 = vector.broadcast %199 : vector<1x128xf32> to vector<8x128xf32>
    %201 = arith.mulf %174, %200 : vector<8x128xf32>
    %202 = arith.addf %198, %201 : vector<8x128xf32>
    %c7_i32_68 = arith.constant 7 : i32
    %203 = tpu.dynamic_rotate %174 by %c7_i32_68 dim 0 : vector<8x128xf32>, i32 -> vector<8x128xf32>
    %204 = arith.mulf %203, %8 : vector<8x128xf32>
    %205 = vector.extract_strided_slice %176 {offsets = [7, 0], sizes = [1, 128], strides = [1, 1]} : vector<9x128xf32> to vector<1x128xf32>
    %206 = vector.broadcast %205 : vector<1x128xf32> to vector<8x128xf32>
    %207 = arith.mulf %204, %206 : vector<8x128xf32>
    %208 = arith.addf %202, %207 : vector<8x128xf32>
    %c112_i32_69 = arith.constant 112 : i32
    %209 = tpu.dynamic_rotate %174 by %c112_i32_69 dim 1 : vector<8x128xf32>, i32 -> vector<8x128xf32>
    %c1_i32_70 = arith.constant 1 : i32
    %210 = tpu.dynamic_rotate %209 by %c1_i32_70 dim 0 : vector<8x128xf32>, i32 -> vector<8x128xf32>
    %211 = arith.mulf %210, %4 : vector<8x128xf32>
    %212 = vector.extract_strided_slice %176 {offsets = [2, 0], sizes = [1, 128], strides = [1, 1]} : vector<9x128xf32> to vector<1x128xf32>
    %213 = vector.broadcast %212 : vector<1x128xf32> to vector<8x128xf32>
    %214 = arith.mulf %211, %213 : vector<8x128xf32>
    %215 = arith.addf %208, %214 : vector<8x128xf32>
    %216 = vector.extract_strided_slice %176 {offsets = [5, 0], sizes = [1, 128], strides = [1, 1]} : vector<9x128xf32> to vector<1x128xf32>
    %217 = vector.broadcast %216 : vector<1x128xf32> to vector<8x128xf32>
    %218 = arith.mulf %209, %217 : vector<8x128xf32>
    %219 = arith.addf %215, %218 : vector<8x128xf32>
    %c7_i32_71 = arith.constant 7 : i32
    %220 = tpu.dynamic_rotate %209 by %c7_i32_71 dim 0 : vector<8x128xf32>, i32 -> vector<8x128xf32>
    %221 = arith.mulf %220, %8 : vector<8x128xf32>
    %222 = vector.extract_strided_slice %176 {offsets = [8, 0], sizes = [1, 128], strides = [1, 1]} : vector<9x128xf32> to vector<1x128xf32>
    %223 = vector.broadcast %222 : vector<1x128xf32> to vector<8x128xf32>
    %224 = arith.mulf %221, %223 : vector<8x128xf32>
    %225 = arith.addf %219, %224 : vector<8x128xf32>
    %c2_72 = arith.constant 2 : index
    %c0_73 = arith.constant 0 : index
    %c0_74 = arith.constant 0 : index
    %226 = vector.load %arg10[%c2_72, %c0_73, %c0_74] : memref<11x128x128xbf16, #tpu.memory_space<vmem>>, vector<1x128x128xbf16>
    %227 = vector.shape_cast %226 : vector<1x128x128xbf16> to vector<128x128xbf16>
    %c2_75 = arith.constant 2 : index
    %c0_76 = arith.constant 0 : index
    %c0_77 = arith.constant 0 : index
    %228 = vector.load %arg11[%c2_75, %c0_76, %c0_77] : memref<11x1x128xf32, #tpu.memory_space<vmem>>, vector<1x1x128xf32>
    %229 = vector.shape_cast %228 : vector<1x1x128xf32> to vector<1x128xf32>
    %c2_78 = arith.constant 2 : index
    %c0_79 = arith.constant 0 : index
    %c0_80 = arith.constant 0 : index
    %230 = vector.load %arg12[%c2_78, %c0_79, %c0_80] : memref<11x1x128xf32, #tpu.memory_space<vmem>>, vector<1x1x128xf32>
    %231 = vector.shape_cast %230 : vector<1x1x128xf32> to vector<1x128xf32>
    %232 = arith.truncf %225 : vector<8x128xf32> to vector<8x128xbf16>
    %cst_81 = arith.constant dense<0.000000e+00> : vector<8x128xf32>
    %233 = tpu.matmul %232, %227, %cst_81 {dimension_numbers = #tpu.dot_dimension_numbers<[1], [0], [0], [1], [0, 0, 1, 1], [], []>} : vector<8x128xbf16>, vector<128x128xbf16>, vector<8x128xf32> -> vector<8x128xf32>
    %234 = vector.broadcast %229 : vector<1x128xf32> to vector<8x128xf32>
    %235 = arith.mulf %233, %234 : vector<8x128xf32>
    %236 = vector.broadcast %231 : vector<1x128xf32> to vector<8x128xf32>
    %237 = arith.addf %235, %236 : vector<8x128xf32>
    %cst_82 = arith.constant 0.000000e+00 : f32
    %238 = vector.broadcast %cst_82 : f32 to vector<8x128xf32>
    %239 = arith.maximumf %237, %238 : vector<8x128xf32>
    %c3 = arith.constant 3 : index
    %c0_83 = arith.constant 0 : index
    %c0_84 = arith.constant 0 : index
    %240 = vector.load %arg9[%c3, %c0_83, %c0_84] : memref<11x9x128xf32, #tpu.memory_space<vmem>>, vector<1x9x128xf32>
    %241 = vector.shape_cast %240 : vector<1x9x128xf32> to vector<9x128xf32>
    %c16_i32_85 = arith.constant 16 : i32
    %242 = tpu.dynamic_rotate %239 by %c16_i32_85 dim 1 : vector<8x128xf32>, i32 -> vector<8x128xf32>
    %c1_i32_86 = arith.constant 1 : i32
    %243 = tpu.dynamic_rotate %242 by %c1_i32_86 dim 0 : vector<8x128xf32>, i32 -> vector<8x128xf32>
    %244 = arith.mulf %243, %4 : vector<8x128xf32>
    %245 = vector.extract_strided_slice %241 {offsets = [0, 0], sizes = [1, 128], strides = [1, 1]} : vector<9x128xf32> to vector<1x128xf32>
    %246 = vector.broadcast %245 : vector<1x128xf32> to vector<8x128xf32>
    %247 = arith.mulf %244, %246 : vector<8x128xf32>
    %248 = vector.extract_strided_slice %241 {offsets = [3, 0], sizes = [1, 128], strides = [1, 1]} : vector<9x128xf32> to vector<1x128xf32>
    %249 = vector.broadcast %248 : vector<1x128xf32> to vector<8x128xf32>
    %250 = arith.mulf %242, %249 : vector<8x128xf32>
    %251 = arith.addf %247, %250 : vector<8x128xf32>
    %c7_i32_87 = arith.constant 7 : i32
    %252 = tpu.dynamic_rotate %242 by %c7_i32_87 dim 0 : vector<8x128xf32>, i32 -> vector<8x128xf32>
    %253 = arith.mulf %252, %8 : vector<8x128xf32>
    %254 = vector.extract_strided_slice %241 {offsets = [6, 0], sizes = [1, 128], strides = [1, 1]} : vector<9x128xf32> to vector<1x128xf32>
    %255 = vector.broadcast %254 : vector<1x128xf32> to vector<8x128xf32>
    %256 = arith.mulf %253, %255 : vector<8x128xf32>
    %257 = arith.addf %251, %256 : vector<8x128xf32>
    %c1_i32_88 = arith.constant 1 : i32
    %258 = tpu.dynamic_rotate %239 by %c1_i32_88 dim 0 : vector<8x128xf32>, i32 -> vector<8x128xf32>
    %259 = arith.mulf %258, %4 : vector<8x128xf32>
    %260 = vector.extract_strided_slice %241 {offsets = [1, 0], sizes = [1, 128], strides = [1, 1]} : vector<9x128xf32> to vector<1x128xf32>
    %261 = vector.broadcast %260 : vector<1x128xf32> to vector<8x128xf32>
    %262 = arith.mulf %259, %261 : vector<8x128xf32>
    %263 = arith.addf %257, %262 : vector<8x128xf32>
    %264 = vector.extract_strided_slice %241 {offsets = [4, 0], sizes = [1, 128], strides = [1, 1]} : vector<9x128xf32> to vector<1x128xf32>
    %265 = vector.broadcast %264 : vector<1x128xf32> to vector<8x128xf32>
    %266 = arith.mulf %239, %265 : vector<8x128xf32>
    %267 = arith.addf %263, %266 : vector<8x128xf32>
    %c7_i32_89 = arith.constant 7 : i32
    %268 = tpu.dynamic_rotate %239 by %c7_i32_89 dim 0 : vector<8x128xf32>, i32 -> vector<8x128xf32>
    %269 = arith.mulf %268, %8 : vector<8x128xf32>
    %270 = vector.extract_strided_slice %241 {offsets = [7, 0], sizes = [1, 128], strides = [1, 1]} : vector<9x128xf32> to vector<1x128xf32>
    %271 = vector.broadcast %270 : vector<1x128xf32> to vector<8x128xf32>
    %272 = arith.mulf %269, %271 : vector<8x128xf32>
    %273 = arith.addf %267, %272 : vector<8x128xf32>
    %c112_i32_90 = arith.constant 112 : i32
    %274 = tpu.dynamic_rotate %239 by %c112_i32_90 dim 1 : vector<8x128xf32>, i32 -> vector<8x128xf32>
    %c1_i32_91 = arith.constant 1 : i32
    %275 = tpu.dynamic_rotate %274 by %c1_i32_91 dim 0 : vector<8x128xf32>, i32 -> vector<8x128xf32>
    %276 = arith.mulf %275, %4 : vector<8x128xf32>
    %277 = vector.extract_strided_slice %241 {offsets = [2, 0], sizes = [1, 128], strides = [1, 1]} : vector<9x128xf32> to vector<1x128xf32>
    %278 = vector.broadcast %277 : vector<1x128xf32> to vector<8x128xf32>
    %279 = arith.mulf %276, %278 : vector<8x128xf32>
    %280 = arith.addf %273, %279 : vector<8x128xf32>
    %281 = vector.extract_strided_slice %241 {offsets = [5, 0], sizes = [1, 128], strides = [1, 1]} : vector<9x128xf32> to vector<1x128xf32>
    %282 = vector.broadcast %281 : vector<1x128xf32> to vector<8x128xf32>
    %283 = arith.mulf %274, %282 : vector<8x128xf32>
    %284 = arith.addf %280, %283 : vector<8x128xf32>
    %c7_i32_92 = arith.constant 7 : i32
    %285 = tpu.dynamic_rotate %274 by %c7_i32_92 dim 0 : vector<8x128xf32>, i32 -> vector<8x128xf32>
    %286 = arith.mulf %285, %8 : vector<8x128xf32>
    %287 = vector.extract_strided_slice %241 {offsets = [8, 0], sizes = [1, 128], strides = [1, 1]} : vector<9x128xf32> to vector<1x128xf32>
    %288 = vector.broadcast %287 : vector<1x128xf32> to vector<8x128xf32>
    %289 = arith.mulf %286, %288 : vector<8x128xf32>
    %290 = arith.addf %284, %289 : vector<8x128xf32>
    %c3_93 = arith.constant 3 : index
    %c0_94 = arith.constant 0 : index
    %c0_95 = arith.constant 0 : index
    %291 = vector.load %arg10[%c3_93, %c0_94, %c0_95] : memref<11x128x128xbf16, #tpu.memory_space<vmem>>, vector<1x128x128xbf16>
    %292 = vector.shape_cast %291 : vector<1x128x128xbf16> to vector<128x128xbf16>
    %c3_96 = arith.constant 3 : index
    %c0_97 = arith.constant 0 : index
    %c0_98 = arith.constant 0 : index
    %293 = vector.load %arg11[%c3_96, %c0_97, %c0_98] : memref<11x1x128xf32, #tpu.memory_space<vmem>>, vector<1x1x128xf32>
    %294 = vector.shape_cast %293 : vector<1x1x128xf32> to vector<1x128xf32>
    %c3_99 = arith.constant 3 : index
    %c0_100 = arith.constant 0 : index
    %c0_101 = arith.constant 0 : index
    %295 = vector.load %arg12[%c3_99, %c0_100, %c0_101] : memref<11x1x128xf32, #tpu.memory_space<vmem>>, vector<1x1x128xf32>
    %296 = vector.shape_cast %295 : vector<1x1x128xf32> to vector<1x128xf32>
    %297 = arith.truncf %290 : vector<8x128xf32> to vector<8x128xbf16>
    %cst_102 = arith.constant dense<0.000000e+00> : vector<8x128xf32>
    %298 = tpu.matmul %297, %292, %cst_102 {dimension_numbers = #tpu.dot_dimension_numbers<[1], [0], [0], [1], [0, 0, 1, 1], [], []>} : vector<8x128xbf16>, vector<128x128xbf16>, vector<8x128xf32> -> vector<8x128xf32>
    %299 = vector.broadcast %294 : vector<1x128xf32> to vector<8x128xf32>
    %300 = arith.mulf %298, %299 : vector<8x128xf32>
    %301 = vector.broadcast %296 : vector<1x128xf32> to vector<8x128xf32>
    %302 = arith.addf %300, %301 : vector<8x128xf32>
    %303 = arith.addf %172, %302 : vector<8x128xf32>
    %cst_103 = arith.constant 0.000000e+00 : f32
    %304 = vector.broadcast %cst_103 : f32 to vector<8x128xf32>
    %305 = arith.maximumf %29, %304 : vector<8x128xf32>
    %c4 = arith.constant 4 : index
    %c0_104 = arith.constant 0 : index
    %c0_105 = arith.constant 0 : index
    %306 = vector.load %arg9[%c4, %c0_104, %c0_105] : memref<11x9x128xf32, #tpu.memory_space<vmem>>, vector<1x9x128xf32>
    %307 = vector.shape_cast %306 : vector<1x9x128xf32> to vector<9x128xf32>
    %c16_i32_106 = arith.constant 16 : i32
    %308 = tpu.dynamic_rotate %305 by %c16_i32_106 dim 1 : vector<8x128xf32>, i32 -> vector<8x128xf32>
    %c1_i32_107 = arith.constant 1 : i32
    %309 = tpu.dynamic_rotate %308 by %c1_i32_107 dim 0 : vector<8x128xf32>, i32 -> vector<8x128xf32>
    %310 = arith.mulf %309, %4 : vector<8x128xf32>
    %311 = vector.extract_strided_slice %307 {offsets = [0, 0], sizes = [1, 128], strides = [1, 1]} : vector<9x128xf32> to vector<1x128xf32>
    %312 = vector.broadcast %311 : vector<1x128xf32> to vector<8x128xf32>
    %313 = arith.mulf %310, %312 : vector<8x128xf32>
    %314 = vector.extract_strided_slice %307 {offsets = [3, 0], sizes = [1, 128], strides = [1, 1]} : vector<9x128xf32> to vector<1x128xf32>
    %315 = vector.broadcast %314 : vector<1x128xf32> to vector<8x128xf32>
    %316 = arith.mulf %308, %315 : vector<8x128xf32>
    %317 = arith.addf %313, %316 : vector<8x128xf32>
    %c7_i32_108 = arith.constant 7 : i32
    %318 = tpu.dynamic_rotate %308 by %c7_i32_108 dim 0 : vector<8x128xf32>, i32 -> vector<8x128xf32>
    %319 = arith.mulf %318, %8 : vector<8x128xf32>
    %320 = vector.extract_strided_slice %307 {offsets = [6, 0], sizes = [1, 128], strides = [1, 1]} : vector<9x128xf32> to vector<1x128xf32>
    %321 = vector.broadcast %320 : vector<1x128xf32> to vector<8x128xf32>
    %322 = arith.mulf %319, %321 : vector<8x128xf32>
    %323 = arith.addf %317, %322 : vector<8x128xf32>
    %c1_i32_109 = arith.constant 1 : i32
    %324 = tpu.dynamic_rotate %305 by %c1_i32_109 dim 0 : vector<8x128xf32>, i32 -> vector<8x128xf32>
    %325 = arith.mulf %324, %4 : vector<8x128xf32>
    %326 = vector.extract_strided_slice %307 {offsets = [1, 0], sizes = [1, 128], strides = [1, 1]} : vector<9x128xf32> to vector<1x128xf32>
    %327 = vector.broadcast %326 : vector<1x128xf32> to vector<8x128xf32>
    %328 = arith.mulf %325, %327 : vector<8x128xf32>
    %329 = arith.addf %323, %328 : vector<8x128xf32>
    %330 = vector.extract_strided_slice %307 {offsets = [4, 0], sizes = [1, 128], strides = [1, 1]} : vector<9x128xf32> to vector<1x128xf32>
    %331 = vector.broadcast %330 : vector<1x128xf32> to vector<8x128xf32>
    %332 = arith.mulf %305, %331 : vector<8x128xf32>
    %333 = arith.addf %329, %332 : vector<8x128xf32>
    %c7_i32_110 = arith.constant 7 : i32
    %334 = tpu.dynamic_rotate %305 by %c7_i32_110 dim 0 : vector<8x128xf32>, i32 -> vector<8x128xf32>
    %335 = arith.mulf %334, %8 : vector<8x128xf32>
    %336 = vector.extract_strided_slice %307 {offsets = [7, 0], sizes = [1, 128], strides = [1, 1]} : vector<9x128xf32> to vector<1x128xf32>
    %337 = vector.broadcast %336 : vector<1x128xf32> to vector<8x128xf32>
    %338 = arith.mulf %335, %337 : vector<8x128xf32>
    %339 = arith.addf %333, %338 : vector<8x128xf32>
    %c112_i32_111 = arith.constant 112 : i32
    %340 = tpu.dynamic_rotate %305 by %c112_i32_111 dim 1 : vector<8x128xf32>, i32 -> vector<8x128xf32>
    %c1_i32_112 = arith.constant 1 : i32
    %341 = tpu.dynamic_rotate %340 by %c1_i32_112 dim 0 : vector<8x128xf32>, i32 -> vector<8x128xf32>
    %342 = arith.mulf %341, %4 : vector<8x128xf32>
    %343 = vector.extract_strided_slice %307 {offsets = [2, 0], sizes = [1, 128], strides = [1, 1]} : vector<9x128xf32> to vector<1x128xf32>
    %344 = vector.broadcast %343 : vector<1x128xf32> to vector<8x128xf32>
    %345 = arith.mulf %342, %344 : vector<8x128xf32>
    %346 = arith.addf %339, %345 : vector<8x128xf32>
    %347 = vector.extract_strided_slice %307 {offsets = [5, 0], sizes = [1, 128], strides = [1, 1]} : vector<9x128xf32> to vector<1x128xf32>
    %348 = vector.broadcast %347 : vector<1x128xf32> to vector<8x128xf32>
    %349 = arith.mulf %340, %348 : vector<8x128xf32>
    %350 = arith.addf %346, %349 : vector<8x128xf32>
    %c7_i32_113 = arith.constant 7 : i32
    %351 = tpu.dynamic_rotate %340 by %c7_i32_113 dim 0 : vector<8x128xf32>, i32 -> vector<8x128xf32>
    %352 = arith.mulf %351, %8 : vector<8x128xf32>
    %353 = vector.extract_strided_slice %307 {offsets = [8, 0], sizes = [1, 128], strides = [1, 1]} : vector<9x128xf32> to vector<1x128xf32>
    %354 = vector.broadcast %353 : vector<1x128xf32> to vector<8x128xf32>
    %355 = arith.mulf %352, %354 : vector<8x128xf32>
    %356 = arith.addf %350, %355 : vector<8x128xf32>
    %c4_114 = arith.constant 4 : index
    %c0_115 = arith.constant 0 : index
    %c0_116 = arith.constant 0 : index
    %357 = vector.load %arg10[%c4_114, %c0_115, %c0_116] : memref<11x128x128xbf16, #tpu.memory_space<vmem>>, vector<1x128x128xbf16>
    %358 = vector.shape_cast %357 : vector<1x128x128xbf16> to vector<128x128xbf16>
    %c4_117 = arith.constant 4 : index
    %c0_118 = arith.constant 0 : index
    %c0_119 = arith.constant 0 : index
    %359 = vector.load %arg11[%c4_117, %c0_118, %c0_119] : memref<11x1x128xf32, #tpu.memory_space<vmem>>, vector<1x1x128xf32>
    %360 = vector.shape_cast %359 : vector<1x1x128xf32> to vector<1x128xf32>
    %c4_120 = arith.constant 4 : index
    %c0_121 = arith.constant 0 : index
    %c0_122 = arith.constant 0 : index
    %361 = vector.load %arg12[%c4_120, %c0_121, %c0_122] : memref<11x1x128xf32, #tpu.memory_space<vmem>>, vector<1x1x128xf32>
    %362 = vector.shape_cast %361 : vector<1x1x128xf32> to vector<1x128xf32>
    %363 = arith.truncf %356 : vector<8x128xf32> to vector<8x128xbf16>
    %cst_123 = arith.constant dense<0.000000e+00> : vector<8x128xf32>
    %364 = tpu.matmul %363, %358, %cst_123 {dimension_numbers = #tpu.dot_dimension_numbers<[1], [0], [0], [1], [0, 0, 1, 1], [], []>} : vector<8x128xbf16>, vector<128x128xbf16>, vector<8x128xf32> -> vector<8x128xf32>
    %365 = vector.broadcast %360 : vector<1x128xf32> to vector<8x128xf32>
    %366 = arith.mulf %364, %365 : vector<8x128xf32>
    %367 = vector.broadcast %362 : vector<1x128xf32> to vector<8x128xf32>
    %368 = arith.addf %366, %367 : vector<8x128xf32>
    %cst_124 = arith.constant 0.000000e+00 : f32
    %369 = vector.broadcast %cst_124 : f32 to vector<8x128xf32>
    %370 = arith.maximumf %368, %369 : vector<8x128xf32>
    %c5 = arith.constant 5 : index
    %c0_125 = arith.constant 0 : index
    %c0_126 = arith.constant 0 : index
    %371 = vector.load %arg9[%c5, %c0_125, %c0_126] : memref<11x9x128xf32, #tpu.memory_space<vmem>>, vector<1x9x128xf32>
    %372 = vector.shape_cast %371 : vector<1x9x128xf32> to vector<9x128xf32>
    %c16_i32_127 = arith.constant 16 : i32
    %373 = tpu.dynamic_rotate %370 by %c16_i32_127 dim 1 : vector<8x128xf32>, i32 -> vector<8x128xf32>
    %c1_i32_128 = arith.constant 1 : i32
    %374 = tpu.dynamic_rotate %373 by %c1_i32_128 dim 0 : vector<8x128xf32>, i32 -> vector<8x128xf32>
    %375 = arith.mulf %374, %4 : vector<8x128xf32>
    %376 = vector.extract_strided_slice %372 {offsets = [0, 0], sizes = [1, 128], strides = [1, 1]} : vector<9x128xf32> to vector<1x128xf32>
    %377 = vector.broadcast %376 : vector<1x128xf32> to vector<8x128xf32>
    %378 = arith.mulf %375, %377 : vector<8x128xf32>
    %379 = vector.extract_strided_slice %372 {offsets = [3, 0], sizes = [1, 128], strides = [1, 1]} : vector<9x128xf32> to vector<1x128xf32>
    %380 = vector.broadcast %379 : vector<1x128xf32> to vector<8x128xf32>
    %381 = arith.mulf %373, %380 : vector<8x128xf32>
    %382 = arith.addf %378, %381 : vector<8x128xf32>
    %c7_i32_129 = arith.constant 7 : i32
    %383 = tpu.dynamic_rotate %373 by %c7_i32_129 dim 0 : vector<8x128xf32>, i32 -> vector<8x128xf32>
    %384 = arith.mulf %383, %8 : vector<8x128xf32>
    %385 = vector.extract_strided_slice %372 {offsets = [6, 0], sizes = [1, 128], strides = [1, 1]} : vector<9x128xf32> to vector<1x128xf32>
    %386 = vector.broadcast %385 : vector<1x128xf32> to vector<8x128xf32>
    %387 = arith.mulf %384, %386 : vector<8x128xf32>
    %388 = arith.addf %382, %387 : vector<8x128xf32>
    %c1_i32_130 = arith.constant 1 : i32
    %389 = tpu.dynamic_rotate %370 by %c1_i32_130 dim 0 : vector<8x128xf32>, i32 -> vector<8x128xf32>
    %390 = arith.mulf %389, %4 : vector<8x128xf32>
    %391 = vector.extract_strided_slice %372 {offsets = [1, 0], sizes = [1, 128], strides = [1, 1]} : vector<9x128xf32> to vector<1x128xf32>
    %392 = vector.broadcast %391 : vector<1x128xf32> to vector<8x128xf32>
    %393 = arith.mulf %390, %392 : vector<8x128xf32>
    %394 = arith.addf %388, %393 : vector<8x128xf32>
    %395 = vector.extract_strided_slice %372 {offsets = [4, 0], sizes = [1, 128], strides = [1, 1]} : vector<9x128xf32> to vector<1x128xf32>
    %396 = vector.broadcast %395 : vector<1x128xf32> to vector<8x128xf32>
    %397 = arith.mulf %370, %396 : vector<8x128xf32>
    %398 = arith.addf %394, %397 : vector<8x128xf32>
    %c7_i32_131 = arith.constant 7 : i32
    %399 = tpu.dynamic_rotate %370 by %c7_i32_131 dim 0 : vector<8x128xf32>, i32 -> vector<8x128xf32>
    %400 = arith.mulf %399, %8 : vector<8x128xf32>
    %401 = vector.extract_strided_slice %372 {offsets = [7, 0], sizes = [1, 128], strides = [1, 1]} : vector<9x128xf32> to vector<1x128xf32>
    %402 = vector.broadcast %401 : vector<1x128xf32> to vector<8x128xf32>
    %403 = arith.mulf %400, %402 : vector<8x128xf32>
    %404 = arith.addf %398, %403 : vector<8x128xf32>
    %c112_i32_132 = arith.constant 112 : i32
    %405 = tpu.dynamic_rotate %370 by %c112_i32_132 dim 1 : vector<8x128xf32>, i32 -> vector<8x128xf32>
    %c1_i32_133 = arith.constant 1 : i32
    %406 = tpu.dynamic_rotate %405 by %c1_i32_133 dim 0 : vector<8x128xf32>, i32 -> vector<8x128xf32>
    %407 = arith.mulf %406, %4 : vector<8x128xf32>
    %408 = vector.extract_strided_slice %372 {offsets = [2, 0], sizes = [1, 128], strides = [1, 1]} : vector<9x128xf32> to vector<1x128xf32>
    %409 = vector.broadcast %408 : vector<1x128xf32> to vector<8x128xf32>
    %410 = arith.mulf %407, %409 : vector<8x128xf32>
    %411 = arith.addf %404, %410 : vector<8x128xf32>
    %412 = vector.extract_strided_slice %372 {offsets = [5, 0], sizes = [1, 128], strides = [1, 1]} : vector<9x128xf32> to vector<1x128xf32>
    %413 = vector.broadcast %412 : vector<1x128xf32> to vector<8x128xf32>
    %414 = arith.mulf %405, %413 : vector<8x128xf32>
    %415 = arith.addf %411, %414 : vector<8x128xf32>
    %c7_i32_134 = arith.constant 7 : i32
    %416 = tpu.dynamic_rotate %405 by %c7_i32_134 dim 0 : vector<8x128xf32>, i32 -> vector<8x128xf32>
    %417 = arith.mulf %416, %8 : vector<8x128xf32>
    %418 = vector.extract_strided_slice %372 {offsets = [8, 0], sizes = [1, 128], strides = [1, 1]} : vector<9x128xf32> to vector<1x128xf32>
    %419 = vector.broadcast %418 : vector<1x128xf32> to vector<8x128xf32>
    %420 = arith.mulf %417, %419 : vector<8x128xf32>
    %421 = arith.addf %415, %420 : vector<8x128xf32>
    %c5_135 = arith.constant 5 : index
    %c0_136 = arith.constant 0 : index
    %c0_137 = arith.constant 0 : index
    %422 = vector.load %arg10[%c5_135, %c0_136, %c0_137] : memref<11x128x128xbf16, #tpu.memory_space<vmem>>, vector<1x128x128xbf16>
    %423 = vector.shape_cast %422 : vector<1x128x128xbf16> to vector<128x128xbf16>
    %c5_138 = arith.constant 5 : index
    %c0_139 = arith.constant 0 : index
    %c0_140 = arith.constant 0 : index
    %424 = vector.load %arg11[%c5_138, %c0_139, %c0_140] : memref<11x1x128xf32, #tpu.memory_space<vmem>>, vector<1x1x128xf32>
    %425 = vector.shape_cast %424 : vector<1x1x128xf32> to vector<1x128xf32>
    %c5_141 = arith.constant 5 : index
    %c0_142 = arith.constant 0 : index
    %c0_143 = arith.constant 0 : index
    %426 = vector.load %arg12[%c5_141, %c0_142, %c0_143] : memref<11x1x128xf32, #tpu.memory_space<vmem>>, vector<1x1x128xf32>
    %427 = vector.shape_cast %426 : vector<1x1x128xf32> to vector<1x128xf32>
    %428 = arith.truncf %421 : vector<8x128xf32> to vector<8x128xbf16>
    %cst_144 = arith.constant dense<0.000000e+00> : vector<8x128xf32>
    %429 = tpu.matmul %428, %423, %cst_144 {dimension_numbers = #tpu.dot_dimension_numbers<[1], [0], [0], [1], [0, 0, 1, 1], [], []>} : vector<8x128xbf16>, vector<128x128xbf16>, vector<8x128xf32> -> vector<8x128xf32>
    %430 = vector.broadcast %425 : vector<1x128xf32> to vector<8x128xf32>
    %431 = arith.mulf %429, %430 : vector<8x128xf32>
    %432 = vector.broadcast %427 : vector<1x128xf32> to vector<8x128xf32>
    %433 = arith.addf %431, %432 : vector<8x128xf32>
    %cst_145 = arith.constant 0.000000e+00 : f32
    %434 = vector.broadcast %cst_145 : f32 to vector<8x128xf32>
    %435 = arith.maximumf %42, %434 : vector<8x128xf32>
    %c6 = arith.constant 6 : index
    %c0_146 = arith.constant 0 : index
    %c0_147 = arith.constant 0 : index
    %436 = vector.load %arg9[%c6, %c0_146, %c0_147] : memref<11x9x128xf32, #tpu.memory_space<vmem>>, vector<1x9x128xf32>
    %437 = vector.shape_cast %436 : vector<1x9x128xf32> to vector<9x128xf32>
    %c16_i32_148 = arith.constant 16 : i32
    %438 = tpu.dynamic_rotate %435 by %c16_i32_148 dim 1 : vector<8x128xf32>, i32 -> vector<8x128xf32>
    %c1_i32_149 = arith.constant 1 : i32
    %439 = tpu.dynamic_rotate %438 by %c1_i32_149 dim 0 : vector<8x128xf32>, i32 -> vector<8x128xf32>
    %440 = arith.mulf %439, %4 : vector<8x128xf32>
    %441 = vector.extract_strided_slice %437 {offsets = [0, 0], sizes = [1, 128], strides = [1, 1]} : vector<9x128xf32> to vector<1x128xf32>
    %442 = vector.broadcast %441 : vector<1x128xf32> to vector<8x128xf32>
    %443 = arith.mulf %440, %442 : vector<8x128xf32>
    %444 = vector.extract_strided_slice %437 {offsets = [3, 0], sizes = [1, 128], strides = [1, 1]} : vector<9x128xf32> to vector<1x128xf32>
    %445 = vector.broadcast %444 : vector<1x128xf32> to vector<8x128xf32>
    %446 = arith.mulf %438, %445 : vector<8x128xf32>
    %447 = arith.addf %443, %446 : vector<8x128xf32>
    %c7_i32_150 = arith.constant 7 : i32
    %448 = tpu.dynamic_rotate %438 by %c7_i32_150 dim 0 : vector<8x128xf32>, i32 -> vector<8x128xf32>
    %449 = arith.mulf %448, %8 : vector<8x128xf32>
    %450 = vector.extract_strided_slice %437 {offsets = [6, 0], sizes = [1, 128], strides = [1, 1]} : vector<9x128xf32> to vector<1x128xf32>
    %451 = vector.broadcast %450 : vector<1x128xf32> to vector<8x128xf32>
    %452 = arith.mulf %449, %451 : vector<8x128xf32>
    %453 = arith.addf %447, %452 : vector<8x128xf32>
    %c1_i32_151 = arith.constant 1 : i32
    %454 = tpu.dynamic_rotate %435 by %c1_i32_151 dim 0 : vector<8x128xf32>, i32 -> vector<8x128xf32>
    %455 = arith.mulf %454, %4 : vector<8x128xf32>
    %456 = vector.extract_strided_slice %437 {offsets = [1, 0], sizes = [1, 128], strides = [1, 1]} : vector<9x128xf32> to vector<1x128xf32>
    %457 = vector.broadcast %456 : vector<1x128xf32> to vector<8x128xf32>
    %458 = arith.mulf %455, %457 : vector<8x128xf32>
    %459 = arith.addf %453, %458 : vector<8x128xf32>
    %460 = vector.extract_strided_slice %437 {offsets = [4, 0], sizes = [1, 128], strides = [1, 1]} : vector<9x128xf32> to vector<1x128xf32>
    %461 = vector.broadcast %460 : vector<1x128xf32> to vector<8x128xf32>
    %462 = arith.mulf %435, %461 : vector<8x128xf32>
    %463 = arith.addf %459, %462 : vector<8x128xf32>
    %c7_i32_152 = arith.constant 7 : i32
    %464 = tpu.dynamic_rotate %435 by %c7_i32_152 dim 0 : vector<8x128xf32>, i32 -> vector<8x128xf32>
    %465 = arith.mulf %464, %8 : vector<8x128xf32>
    %466 = vector.extract_strided_slice %437 {offsets = [7, 0], sizes = [1, 128], strides = [1, 1]} : vector<9x128xf32> to vector<1x128xf32>
    %467 = vector.broadcast %466 : vector<1x128xf32> to vector<8x128xf32>
    %468 = arith.mulf %465, %467 : vector<8x128xf32>
    %469 = arith.addf %463, %468 : vector<8x128xf32>
    %c112_i32_153 = arith.constant 112 : i32
    %470 = tpu.dynamic_rotate %435 by %c112_i32_153 dim 1 : vector<8x128xf32>, i32 -> vector<8x128xf32>
    %c1_i32_154 = arith.constant 1 : i32
    %471 = tpu.dynamic_rotate %470 by %c1_i32_154 dim 0 : vector<8x128xf32>, i32 -> vector<8x128xf32>
    %472 = arith.mulf %471, %4 : vector<8x128xf32>
    %473 = vector.extract_strided_slice %437 {offsets = [2, 0], sizes = [1, 128], strides = [1, 1]} : vector<9x128xf32> to vector<1x128xf32>
    %474 = vector.broadcast %473 : vector<1x128xf32> to vector<8x128xf32>
    %475 = arith.mulf %472, %474 : vector<8x128xf32>
    %476 = arith.addf %469, %475 : vector<8x128xf32>
    %477 = vector.extract_strided_slice %437 {offsets = [5, 0], sizes = [1, 128], strides = [1, 1]} : vector<9x128xf32> to vector<1x128xf32>
    %478 = vector.broadcast %477 : vector<1x128xf32> to vector<8x128xf32>
    %479 = arith.mulf %470, %478 : vector<8x128xf32>
    %480 = arith.addf %476, %479 : vector<8x128xf32>
    %c7_i32_155 = arith.constant 7 : i32
    %481 = tpu.dynamic_rotate %470 by %c7_i32_155 dim 0 : vector<8x128xf32>, i32 -> vector<8x128xf32>
    %482 = arith.mulf %481, %8 : vector<8x128xf32>
    %483 = vector.extract_strided_slice %437 {offsets = [8, 0], sizes = [1, 128], strides = [1, 1]} : vector<9x128xf32> to vector<1x128xf32>
    %484 = vector.broadcast %483 : vector<1x128xf32> to vector<8x128xf32>
    %485 = arith.mulf %482, %484 : vector<8x128xf32>
    %486 = arith.addf %480, %485 : vector<8x128xf32>
    %c6_156 = arith.constant 6 : index
    %c0_157 = arith.constant 0 : index
    %c0_158 = arith.constant 0 : index
    %487 = vector.load %arg10[%c6_156, %c0_157, %c0_158] : memref<11x128x128xbf16, #tpu.memory_space<vmem>>, vector<1x128x128xbf16>
    %488 = vector.shape_cast %487 : vector<1x128x128xbf16> to vector<128x128xbf16>
    %c6_159 = arith.constant 6 : index
    %c0_160 = arith.constant 0 : index
    %c0_161 = arith.constant 0 : index
    %489 = vector.load %arg11[%c6_159, %c0_160, %c0_161] : memref<11x1x128xf32, #tpu.memory_space<vmem>>, vector<1x1x128xf32>
    %490 = vector.shape_cast %489 : vector<1x1x128xf32> to vector<1x128xf32>
    %c6_162 = arith.constant 6 : index
    %c0_163 = arith.constant 0 : index
    %c0_164 = arith.constant 0 : index
    %491 = vector.load %arg12[%c6_162, %c0_163, %c0_164] : memref<11x1x128xf32, #tpu.memory_space<vmem>>, vector<1x1x128xf32>
    %492 = vector.shape_cast %491 : vector<1x1x128xf32> to vector<1x128xf32>
    %493 = arith.truncf %486 : vector<8x128xf32> to vector<8x128xbf16>
    %cst_165 = arith.constant dense<0.000000e+00> : vector<8x128xf32>
    %494 = tpu.matmul %493, %488, %cst_165 {dimension_numbers = #tpu.dot_dimension_numbers<[1], [0], [0], [1], [0, 0, 1, 1], [], []>} : vector<8x128xbf16>, vector<128x128xbf16>, vector<8x128xf32> -> vector<8x128xf32>
    %495 = vector.broadcast %490 : vector<1x128xf32> to vector<8x128xf32>
    %496 = arith.mulf %494, %495 : vector<8x128xf32>
    %497 = vector.broadcast %492 : vector<1x128xf32> to vector<8x128xf32>
    %498 = arith.addf %496, %497 : vector<8x128xf32>
    %cst_166 = arith.constant 0.000000e+00 : f32
    %499 = vector.broadcast %cst_166 : f32 to vector<8x128xf32>
    %500 = arith.maximumf %498, %499 : vector<8x128xf32>
    %c7 = arith.constant 7 : index
    %c0_167 = arith.constant 0 : index
    %c0_168 = arith.constant 0 : index
    %501 = vector.load %arg9[%c7, %c0_167, %c0_168] : memref<11x9x128xf32, #tpu.memory_space<vmem>>, vector<1x9x128xf32>
    %502 = vector.shape_cast %501 : vector<1x9x128xf32> to vector<9x128xf32>
    %c16_i32_169 = arith.constant 16 : i32
    %503 = tpu.dynamic_rotate %500 by %c16_i32_169 dim 1 : vector<8x128xf32>, i32 -> vector<8x128xf32>
    %c1_i32_170 = arith.constant 1 : i32
    %504 = tpu.dynamic_rotate %503 by %c1_i32_170 dim 0 : vector<8x128xf32>, i32 -> vector<8x128xf32>
    %505 = arith.mulf %504, %4 : vector<8x128xf32>
    %506 = vector.extract_strided_slice %502 {offsets = [0, 0], sizes = [1, 128], strides = [1, 1]} : vector<9x128xf32> to vector<1x128xf32>
    %507 = vector.broadcast %506 : vector<1x128xf32> to vector<8x128xf32>
    %508 = arith.mulf %505, %507 : vector<8x128xf32>
    %509 = vector.extract_strided_slice %502 {offsets = [3, 0], sizes = [1, 128], strides = [1, 1]} : vector<9x128xf32> to vector<1x128xf32>
    %510 = vector.broadcast %509 : vector<1x128xf32> to vector<8x128xf32>
    %511 = arith.mulf %503, %510 : vector<8x128xf32>
    %512 = arith.addf %508, %511 : vector<8x128xf32>
    %c7_i32_171 = arith.constant 7 : i32
    %513 = tpu.dynamic_rotate %503 by %c7_i32_171 dim 0 : vector<8x128xf32>, i32 -> vector<8x128xf32>
    %514 = arith.mulf %513, %8 : vector<8x128xf32>
    %515 = vector.extract_strided_slice %502 {offsets = [6, 0], sizes = [1, 128], strides = [1, 1]} : vector<9x128xf32> to vector<1x128xf32>
    %516 = vector.broadcast %515 : vector<1x128xf32> to vector<8x128xf32>
    %517 = arith.mulf %514, %516 : vector<8x128xf32>
    %518 = arith.addf %512, %517 : vector<8x128xf32>
    %c1_i32_172 = arith.constant 1 : i32
    %519 = tpu.dynamic_rotate %500 by %c1_i32_172 dim 0 : vector<8x128xf32>, i32 -> vector<8x128xf32>
    %520 = arith.mulf %519, %4 : vector<8x128xf32>
    %521 = vector.extract_strided_slice %502 {offsets = [1, 0], sizes = [1, 128], strides = [1, 1]} : vector<9x128xf32> to vector<1x128xf32>
    %522 = vector.broadcast %521 : vector<1x128xf32> to vector<8x128xf32>
    %523 = arith.mulf %520, %522 : vector<8x128xf32>
    %524 = arith.addf %518, %523 : vector<8x128xf32>
    %525 = vector.extract_strided_slice %502 {offsets = [4, 0], sizes = [1, 128], strides = [1, 1]} : vector<9x128xf32> to vector<1x128xf32>
    %526 = vector.broadcast %525 : vector<1x128xf32> to vector<8x128xf32>
    %527 = arith.mulf %500, %526 : vector<8x128xf32>
    %528 = arith.addf %524, %527 : vector<8x128xf32>
    %c7_i32_173 = arith.constant 7 : i32
    %529 = tpu.dynamic_rotate %500 by %c7_i32_173 dim 0 : vector<8x128xf32>, i32 -> vector<8x128xf32>
    %530 = arith.mulf %529, %8 : vector<8x128xf32>
    %531 = vector.extract_strided_slice %502 {offsets = [7, 0], sizes = [1, 128], strides = [1, 1]} : vector<9x128xf32> to vector<1x128xf32>
    %532 = vector.broadcast %531 : vector<1x128xf32> to vector<8x128xf32>
    %533 = arith.mulf %530, %532 : vector<8x128xf32>
    %534 = arith.addf %528, %533 : vector<8x128xf32>
    %c112_i32_174 = arith.constant 112 : i32
    %535 = tpu.dynamic_rotate %500 by %c112_i32_174 dim 1 : vector<8x128xf32>, i32 -> vector<8x128xf32>
    %c1_i32_175 = arith.constant 1 : i32
    %536 = tpu.dynamic_rotate %535 by %c1_i32_175 dim 0 : vector<8x128xf32>, i32 -> vector<8x128xf32>
    %537 = arith.mulf %536, %4 : vector<8x128xf32>
    %538 = vector.extract_strided_slice %502 {offsets = [2, 0], sizes = [1, 128], strides = [1, 1]} : vector<9x128xf32> to vector<1x128xf32>
    %539 = vector.broadcast %538 : vector<1x128xf32> to vector<8x128xf32>
    %540 = arith.mulf %537, %539 : vector<8x128xf32>
    %541 = arith.addf %534, %540 : vector<8x128xf32>
    %542 = vector.extract_strided_slice %502 {offsets = [5, 0], sizes = [1, 128], strides = [1, 1]} : vector<9x128xf32> to vector<1x128xf32>
    %543 = vector.broadcast %542 : vector<1x128xf32> to vector<8x128xf32>
    %544 = arith.mulf %535, %543 : vector<8x128xf32>
    %545 = arith.addf %541, %544 : vector<8x128xf32>
    %c7_i32_176 = arith.constant 7 : i32
    %546 = tpu.dynamic_rotate %535 by %c7_i32_176 dim 0 : vector<8x128xf32>, i32 -> vector<8x128xf32>
    %547 = arith.mulf %546, %8 : vector<8x128xf32>
    %548 = vector.extract_strided_slice %502 {offsets = [8, 0], sizes = [1, 128], strides = [1, 1]} : vector<9x128xf32> to vector<1x128xf32>
    %549 = vector.broadcast %548 : vector<1x128xf32> to vector<8x128xf32>
    %550 = arith.mulf %547, %549 : vector<8x128xf32>
    %551 = arith.addf %545, %550 : vector<8x128xf32>
    %c7_177 = arith.constant 7 : index
    %c0_178 = arith.constant 0 : index
    %c0_179 = arith.constant 0 : index
    %552 = vector.load %arg10[%c7_177, %c0_178, %c0_179] : memref<11x128x128xbf16, #tpu.memory_space<vmem>>, vector<1x128x128xbf16>
    %553 = vector.shape_cast %552 : vector<1x128x128xbf16> to vector<128x128xbf16>
    %c7_180 = arith.constant 7 : index
    %c0_181 = arith.constant 0 : index
    %c0_182 = arith.constant 0 : index
    %554 = vector.load %arg11[%c7_180, %c0_181, %c0_182] : memref<11x1x128xf32, #tpu.memory_space<vmem>>, vector<1x1x128xf32>
    %555 = vector.shape_cast %554 : vector<1x1x128xf32> to vector<1x128xf32>
    %c7_183 = arith.constant 7 : index
    %c0_184 = arith.constant 0 : index
    %c0_185 = arith.constant 0 : index
    %556 = vector.load %arg12[%c7_183, %c0_184, %c0_185] : memref<11x1x128xf32, #tpu.memory_space<vmem>>, vector<1x1x128xf32>
    %557 = vector.shape_cast %556 : vector<1x1x128xf32> to vector<1x128xf32>
    %558 = arith.truncf %551 : vector<8x128xf32> to vector<8x128xbf16>
    %cst_186 = arith.constant dense<0.000000e+00> : vector<8x128xf32>
    %559 = tpu.matmul %558, %553, %cst_186 {dimension_numbers = #tpu.dot_dimension_numbers<[1], [0], [0], [1], [0, 0, 1, 1], [], []>} : vector<8x128xbf16>, vector<128x128xbf16>, vector<8x128xf32> -> vector<8x128xf32>
    %560 = vector.broadcast %555 : vector<1x128xf32> to vector<8x128xf32>
    %561 = arith.mulf %559, %560 : vector<8x128xf32>
    %562 = vector.broadcast %557 : vector<1x128xf32> to vector<8x128xf32>
    %563 = arith.addf %561, %562 : vector<8x128xf32>
    %564 = arith.addf %433, %563 : vector<8x128xf32>
    %cst_187 = arith.constant 0.000000e+00 : f32
    %565 = vector.broadcast %cst_187 : f32 to vector<8x128xf32>
    %566 = arith.maximumf %42, %565 : vector<8x128xf32>
    %c8 = arith.constant 8 : index
    %c0_188 = arith.constant 0 : index
    %c0_189 = arith.constant 0 : index
    %567 = vector.load %arg9[%c8, %c0_188, %c0_189] : memref<11x9x128xf32, #tpu.memory_space<vmem>>, vector<1x9x128xf32>
    %568 = vector.shape_cast %567 : vector<1x9x128xf32> to vector<9x128xf32>
    %c16_i32_190 = arith.constant 16 : i32
    %569 = tpu.dynamic_rotate %566 by %c16_i32_190 dim 1 : vector<8x128xf32>, i32 -> vector<8x128xf32>
    %c1_i32_191 = arith.constant 1 : i32
    %570 = tpu.dynamic_rotate %569 by %c1_i32_191 dim 0 : vector<8x128xf32>, i32 -> vector<8x128xf32>
    %571 = arith.mulf %570, %4 : vector<8x128xf32>
    %572 = vector.extract_strided_slice %568 {offsets = [0, 0], sizes = [1, 128], strides = [1, 1]} : vector<9x128xf32> to vector<1x128xf32>
    %573 = vector.broadcast %572 : vector<1x128xf32> to vector<8x128xf32>
    %574 = arith.mulf %571, %573 : vector<8x128xf32>
    %575 = vector.extract_strided_slice %568 {offsets = [3, 0], sizes = [1, 128], strides = [1, 1]} : vector<9x128xf32> to vector<1x128xf32>
    %576 = vector.broadcast %575 : vector<1x128xf32> to vector<8x128xf32>
    %577 = arith.mulf %569, %576 : vector<8x128xf32>
    %578 = arith.addf %574, %577 : vector<8x128xf32>
    %c7_i32_192 = arith.constant 7 : i32
    %579 = tpu.dynamic_rotate %569 by %c7_i32_192 dim 0 : vector<8x128xf32>, i32 -> vector<8x128xf32>
    %580 = arith.mulf %579, %8 : vector<8x128xf32>
    %581 = vector.extract_strided_slice %568 {offsets = [6, 0], sizes = [1, 128], strides = [1, 1]} : vector<9x128xf32> to vector<1x128xf32>
    %582 = vector.broadcast %581 : vector<1x128xf32> to vector<8x128xf32>
    %583 = arith.mulf %580, %582 : vector<8x128xf32>
    %584 = arith.addf %578, %583 : vector<8x128xf32>
    %c1_i32_193 = arith.constant 1 : i32
    %585 = tpu.dynamic_rotate %566 by %c1_i32_193 dim 0 : vector<8x128xf32>, i32 -> vector<8x128xf32>
    %586 = arith.mulf %585, %4 : vector<8x128xf32>
    %587 = vector.extract_strided_slice %568 {offsets = [1, 0], sizes = [1, 128], strides = [1, 1]} : vector<9x128xf32> to vector<1x128xf32>
    %588 = vector.broadcast %587 : vector<1x128xf32> to vector<8x128xf32>
    %589 = arith.mulf %586, %588 : vector<8x128xf32>
    %590 = arith.addf %584, %589 : vector<8x128xf32>
    %591 = vector.extract_strided_slice %568 {offsets = [4, 0], sizes = [1, 128], strides = [1, 1]} : vector<9x128xf32> to vector<1x128xf32>
    %592 = vector.broadcast %591 : vector<1x128xf32> to vector<8x128xf32>
    %593 = arith.mulf %566, %592 : vector<8x128xf32>
    %594 = arith.addf %590, %593 : vector<8x128xf32>
    %c7_i32_194 = arith.constant 7 : i32
    %595 = tpu.dynamic_rotate %566 by %c7_i32_194 dim 0 : vector<8x128xf32>, i32 -> vector<8x128xf32>
    %596 = arith.mulf %595, %8 : vector<8x128xf32>
    %597 = vector.extract_strided_slice %568 {offsets = [7, 0], sizes = [1, 128], strides = [1, 1]} : vector<9x128xf32> to vector<1x128xf32>
    %598 = vector.broadcast %597 : vector<1x128xf32> to vector<8x128xf32>
    %599 = arith.mulf %596, %598 : vector<8x128xf32>
    %600 = arith.addf %594, %599 : vector<8x128xf32>
    %c112_i32_195 = arith.constant 112 : i32
    %601 = tpu.dynamic_rotate %566 by %c112_i32_195 dim 1 : vector<8x128xf32>, i32 -> vector<8x128xf32>
    %c1_i32_196 = arith.constant 1 : i32
    %602 = tpu.dynamic_rotate %601 by %c1_i32_196 dim 0 : vector<8x128xf32>, i32 -> vector<8x128xf32>
    %603 = arith.mulf %602, %4 : vector<8x128xf32>
    %604 = vector.extract_strided_slice %568 {offsets = [2, 0], sizes = [1, 128], strides = [1, 1]} : vector<9x128xf32> to vector<1x128xf32>
    %605 = vector.broadcast %604 : vector<1x128xf32> to vector<8x128xf32>
    %606 = arith.mulf %603, %605 : vector<8x128xf32>
    %607 = arith.addf %600, %606 : vector<8x128xf32>
    %608 = vector.extract_strided_slice %568 {offsets = [5, 0], sizes = [1, 128], strides = [1, 1]} : vector<9x128xf32> to vector<1x128xf32>
    %609 = vector.broadcast %608 : vector<1x128xf32> to vector<8x128xf32>
    %610 = arith.mulf %601, %609 : vector<8x128xf32>
    %611 = arith.addf %607, %610 : vector<8x128xf32>
    %c7_i32_197 = arith.constant 7 : i32
    %612 = tpu.dynamic_rotate %601 by %c7_i32_197 dim 0 : vector<8x128xf32>, i32 -> vector<8x128xf32>
    %613 = arith.mulf %612, %8 : vector<8x128xf32>
    %614 = vector.extract_strided_slice %568 {offsets = [8, 0], sizes = [1, 128], strides = [1, 1]} : vector<9x128xf32> to vector<1x128xf32>
    %615 = vector.broadcast %614 : vector<1x128xf32> to vector<8x128xf32>
    %616 = arith.mulf %613, %615 : vector<8x128xf32>
    %617 = arith.addf %611, %616 : vector<8x128xf32>
    %c8_198 = arith.constant 8 : index
    %c0_199 = arith.constant 0 : index
    %c0_200 = arith.constant 0 : index
    %618 = vector.load %arg10[%c8_198, %c0_199, %c0_200] : memref<11x128x128xbf16, #tpu.memory_space<vmem>>, vector<1x128x128xbf16>
    %619 = vector.shape_cast %618 : vector<1x128x128xbf16> to vector<128x128xbf16>
    %c8_201 = arith.constant 8 : index
    %c0_202 = arith.constant 0 : index
    %c0_203 = arith.constant 0 : index
    %620 = vector.load %arg11[%c8_201, %c0_202, %c0_203] : memref<11x1x128xf32, #tpu.memory_space<vmem>>, vector<1x1x128xf32>
    %621 = vector.shape_cast %620 : vector<1x1x128xf32> to vector<1x128xf32>
    %c8_204 = arith.constant 8 : index
    %c0_205 = arith.constant 0 : index
    %c0_206 = arith.constant 0 : index
    %622 = vector.load %arg12[%c8_204, %c0_205, %c0_206] : memref<11x1x128xf32, #tpu.memory_space<vmem>>, vector<1x1x128xf32>
    %623 = vector.shape_cast %622 : vector<1x1x128xf32> to vector<1x128xf32>
    %624 = arith.truncf %617 : vector<8x128xf32> to vector<8x128xbf16>
    %cst_207 = arith.constant dense<0.000000e+00> : vector<8x128xf32>
    %625 = tpu.matmul %624, %619, %cst_207 {dimension_numbers = #tpu.dot_dimension_numbers<[1], [0], [0], [1], [0, 0, 1, 1], [], []>} : vector<8x128xbf16>, vector<128x128xbf16>, vector<8x128xf32> -> vector<8x128xf32>
    %626 = vector.broadcast %621 : vector<1x128xf32> to vector<8x128xf32>
    %627 = arith.mulf %625, %626 : vector<8x128xf32>
    %628 = vector.broadcast %623 : vector<1x128xf32> to vector<8x128xf32>
    %629 = arith.addf %627, %628 : vector<8x128xf32>
    %cst_208 = arith.constant 0.000000e+00 : f32
    %630 = vector.broadcast %cst_208 : f32 to vector<8x128xf32>
    %631 = arith.maximumf %629, %630 : vector<8x128xf32>
    %c9 = arith.constant 9 : index
    %c0_209 = arith.constant 0 : index
    %c0_210 = arith.constant 0 : index
    %632 = vector.load %arg9[%c9, %c0_209, %c0_210] : memref<11x9x128xf32, #tpu.memory_space<vmem>>, vector<1x9x128xf32>
    %633 = vector.shape_cast %632 : vector<1x9x128xf32> to vector<9x128xf32>
    %c16_i32_211 = arith.constant 16 : i32
    %634 = tpu.dynamic_rotate %631 by %c16_i32_211 dim 1 : vector<8x128xf32>, i32 -> vector<8x128xf32>
    %c1_i32_212 = arith.constant 1 : i32
    %635 = tpu.dynamic_rotate %634 by %c1_i32_212 dim 0 : vector<8x128xf32>, i32 -> vector<8x128xf32>
    %636 = arith.mulf %635, %4 : vector<8x128xf32>
    %637 = vector.extract_strided_slice %633 {offsets = [0, 0], sizes = [1, 128], strides = [1, 1]} : vector<9x128xf32> to vector<1x128xf32>
    %638 = vector.broadcast %637 : vector<1x128xf32> to vector<8x128xf32>
    %639 = arith.mulf %636, %638 : vector<8x128xf32>
    %640 = vector.extract_strided_slice %633 {offsets = [3, 0], sizes = [1, 128], strides = [1, 1]} : vector<9x128xf32> to vector<1x128xf32>
    %641 = vector.broadcast %640 : vector<1x128xf32> to vector<8x128xf32>
    %642 = arith.mulf %634, %641 : vector<8x128xf32>
    %643 = arith.addf %639, %642 : vector<8x128xf32>
    %c7_i32_213 = arith.constant 7 : i32
    %644 = tpu.dynamic_rotate %634 by %c7_i32_213 dim 0 : vector<8x128xf32>, i32 -> vector<8x128xf32>
    %645 = arith.mulf %644, %8 : vector<8x128xf32>
    %646 = vector.extract_strided_slice %633 {offsets = [6, 0], sizes = [1, 128], strides = [1, 1]} : vector<9x128xf32> to vector<1x128xf32>
    %647 = vector.broadcast %646 : vector<1x128xf32> to vector<8x128xf32>
    %648 = arith.mulf %645, %647 : vector<8x128xf32>
    %649 = arith.addf %643, %648 : vector<8x128xf32>
    %c1_i32_214 = arith.constant 1 : i32
    %650 = tpu.dynamic_rotate %631 by %c1_i32_214 dim 0 : vector<8x128xf32>, i32 -> vector<8x128xf32>
    %651 = arith.mulf %650, %4 : vector<8x128xf32>
    %652 = vector.extract_strided_slice %633 {offsets = [1, 0], sizes = [1, 128], strides = [1, 1]} : vector<9x128xf32> to vector<1x128xf32>
    %653 = vector.broadcast %652 : vector<1x128xf32> to vector<8x128xf32>
    %654 = arith.mulf %651, %653 : vector<8x128xf32>
    %655 = arith.addf %649, %654 : vector<8x128xf32>
    %656 = vector.extract_strided_slice %633 {offsets = [4, 0], sizes = [1, 128], strides = [1, 1]} : vector<9x128xf32> to vector<1x128xf32>
    %657 = vector.broadcast %656 : vector<1x128xf32> to vector<8x128xf32>
    %658 = arith.mulf %631, %657 : vector<8x128xf32>
    %659 = arith.addf %655, %658 : vector<8x128xf32>
    %c7_i32_215 = arith.constant 7 : i32
    %660 = tpu.dynamic_rotate %631 by %c7_i32_215 dim 0 : vector<8x128xf32>, i32 -> vector<8x128xf32>
    %661 = arith.mulf %660, %8 : vector<8x128xf32>
    %662 = vector.extract_strided_slice %633 {offsets = [7, 0], sizes = [1, 128], strides = [1, 1]} : vector<9x128xf32> to vector<1x128xf32>
    %663 = vector.broadcast %662 : vector<1x128xf32> to vector<8x128xf32>
    %664 = arith.mulf %661, %663 : vector<8x128xf32>
    %665 = arith.addf %659, %664 : vector<8x128xf32>
    %c112_i32_216 = arith.constant 112 : i32
    %666 = tpu.dynamic_rotate %631 by %c112_i32_216 dim 1 : vector<8x128xf32>, i32 -> vector<8x128xf32>
    %c1_i32_217 = arith.constant 1 : i32
    %667 = tpu.dynamic_rotate %666 by %c1_i32_217 dim 0 : vector<8x128xf32>, i32 -> vector<8x128xf32>
    %668 = arith.mulf %667, %4 : vector<8x128xf32>
    %669 = vector.extract_strided_slice %633 {offsets = [2, 0], sizes = [1, 128], strides = [1, 1]} : vector<9x128xf32> to vector<1x128xf32>
    %670 = vector.broadcast %669 : vector<1x128xf32> to vector<8x128xf32>
    %671 = arith.mulf %668, %670 : vector<8x128xf32>
    %672 = arith.addf %665, %671 : vector<8x128xf32>
    %673 = vector.extract_strided_slice %633 {offsets = [5, 0], sizes = [1, 128], strides = [1, 1]} : vector<9x128xf32> to vector<1x128xf32>
    %674 = vector.broadcast %673 : vector<1x128xf32> to vector<8x128xf32>
    %675 = arith.mulf %666, %674 : vector<8x128xf32>
    %676 = arith.addf %672, %675 : vector<8x128xf32>
    %c7_i32_218 = arith.constant 7 : i32
    %677 = tpu.dynamic_rotate %666 by %c7_i32_218 dim 0 : vector<8x128xf32>, i32 -> vector<8x128xf32>
    %678 = arith.mulf %677, %8 : vector<8x128xf32>
    %679 = vector.extract_strided_slice %633 {offsets = [8, 0], sizes = [1, 128], strides = [1, 1]} : vector<9x128xf32> to vector<1x128xf32>
    %680 = vector.broadcast %679 : vector<1x128xf32> to vector<8x128xf32>
    %681 = arith.mulf %678, %680 : vector<8x128xf32>
    %682 = arith.addf %676, %681 : vector<8x128xf32>
    %c9_219 = arith.constant 9 : index
    %c0_220 = arith.constant 0 : index
    %c0_221 = arith.constant 0 : index
    %683 = vector.load %arg10[%c9_219, %c0_220, %c0_221] : memref<11x128x128xbf16, #tpu.memory_space<vmem>>, vector<1x128x128xbf16>
    %684 = vector.shape_cast %683 : vector<1x128x128xbf16> to vector<128x128xbf16>
    %c9_222 = arith.constant 9 : index
    %c0_223 = arith.constant 0 : index
    %c0_224 = arith.constant 0 : index
    %685 = vector.load %arg11[%c9_222, %c0_223, %c0_224] : memref<11x1x128xf32, #tpu.memory_space<vmem>>, vector<1x1x128xf32>
    %686 = vector.shape_cast %685 : vector<1x1x128xf32> to vector<1x128xf32>
    %c9_225 = arith.constant 9 : index
    %c0_226 = arith.constant 0 : index
    %c0_227 = arith.constant 0 : index
    %687 = vector.load %arg12[%c9_225, %c0_226, %c0_227] : memref<11x1x128xf32, #tpu.memory_space<vmem>>, vector<1x1x128xf32>
    %688 = vector.shape_cast %687 : vector<1x1x128xf32> to vector<1x128xf32>
    %689 = arith.truncf %682 : vector<8x128xf32> to vector<8x128xbf16>
    %cst_228 = arith.constant dense<0.000000e+00> : vector<8x128xf32>
    %690 = tpu.matmul %689, %684, %cst_228 {dimension_numbers = #tpu.dot_dimension_numbers<[1], [0], [0], [1], [0, 0, 1, 1], [], []>} : vector<8x128xbf16>, vector<128x128xbf16>, vector<8x128xf32> -> vector<8x128xf32>
    %691 = vector.broadcast %686 : vector<1x128xf32> to vector<8x128xf32>
    %692 = arith.mulf %690, %691 : vector<8x128xf32>
    %693 = vector.broadcast %688 : vector<1x128xf32> to vector<8x128xf32>
    %694 = arith.addf %692, %693 : vector<8x128xf32>
    %695 = arith.addf %694, %29 : vector<8x128xf32>
    %cst_229 = arith.constant 0.000000e+00 : f32
    %696 = vector.broadcast %cst_229 : f32 to vector<8x128xf32>
    %697 = arith.maximumf %303, %696 : vector<8x128xf32>
    %c10 = arith.constant 10 : index
    %c0_230 = arith.constant 0 : index
    %c0_231 = arith.constant 0 : index
    %698 = vector.load %arg9[%c10, %c0_230, %c0_231] : memref<11x9x128xf32, #tpu.memory_space<vmem>>, vector<1x9x128xf32>
    %699 = vector.shape_cast %698 : vector<1x9x128xf32> to vector<9x128xf32>
    %c32_i32 = arith.constant 32 : i32
    %700 = tpu.dynamic_rotate %697 by %c32_i32 dim 1 : vector<8x128xf32>, i32 -> vector<8x128xf32>
    %c2_i32_232 = arith.constant 2 : i32
    %701 = tpu.dynamic_rotate %700 by %c2_i32_232 dim 0 : vector<8x128xf32>, i32 -> vector<8x128xf32>
    %702 = arith.mulf %701, %12 : vector<8x128xf32>
    %703 = vector.extract_strided_slice %699 {offsets = [0, 0], sizes = [1, 128], strides = [1, 1]} : vector<9x128xf32> to vector<1x128xf32>
    %704 = vector.broadcast %703 : vector<1x128xf32> to vector<8x128xf32>
    %705 = arith.mulf %702, %704 : vector<8x128xf32>
    %706 = vector.extract_strided_slice %699 {offsets = [3, 0], sizes = [1, 128], strides = [1, 1]} : vector<9x128xf32> to vector<1x128xf32>
    %707 = vector.broadcast %706 : vector<1x128xf32> to vector<8x128xf32>
    %708 = arith.mulf %700, %707 : vector<8x128xf32>
    %709 = arith.addf %705, %708 : vector<8x128xf32>
    %c6_i32_233 = arith.constant 6 : i32
    %710 = tpu.dynamic_rotate %700 by %c6_i32_233 dim 0 : vector<8x128xf32>, i32 -> vector<8x128xf32>
    %711 = arith.mulf %710, %16 : vector<8x128xf32>
    %712 = vector.extract_strided_slice %699 {offsets = [6, 0], sizes = [1, 128], strides = [1, 1]} : vector<9x128xf32> to vector<1x128xf32>
    %713 = vector.broadcast %712 : vector<1x128xf32> to vector<8x128xf32>
    %714 = arith.mulf %711, %713 : vector<8x128xf32>
    %715 = arith.addf %709, %714 : vector<8x128xf32>
    %c2_i32_234 = arith.constant 2 : i32
    %716 = tpu.dynamic_rotate %697 by %c2_i32_234 dim 0 : vector<8x128xf32>, i32 -> vector<8x128xf32>
    %717 = arith.mulf %716, %12 : vector<8x128xf32>
    %718 = vector.extract_strided_slice %699 {offsets = [1, 0], sizes = [1, 128], strides = [1, 1]} : vector<9x128xf32> to vector<1x128xf32>
    %719 = vector.broadcast %718 : vector<1x128xf32> to vector<8x128xf32>
    %720 = arith.mulf %717, %719 : vector<8x128xf32>
    %721 = arith.addf %715, %720 : vector<8x128xf32>
    %722 = vector.extract_strided_slice %699 {offsets = [4, 0], sizes = [1, 128], strides = [1, 1]} : vector<9x128xf32> to vector<1x128xf32>
    %723 = vector.broadcast %722 : vector<1x128xf32> to vector<8x128xf32>
    %724 = arith.mulf %697, %723 : vector<8x128xf32>
    %725 = arith.addf %721, %724 : vector<8x128xf32>
    %c6_i32_235 = arith.constant 6 : i32
    %726 = tpu.dynamic_rotate %697 by %c6_i32_235 dim 0 : vector<8x128xf32>, i32 -> vector<8x128xf32>
    %727 = arith.mulf %726, %16 : vector<8x128xf32>
    %728 = vector.extract_strided_slice %699 {offsets = [7, 0], sizes = [1, 128], strides = [1, 1]} : vector<9x128xf32> to vector<1x128xf32>
    %729 = vector.broadcast %728 : vector<1x128xf32> to vector<8x128xf32>
    %730 = arith.mulf %727, %729 : vector<8x128xf32>
    %731 = arith.addf %725, %730 : vector<8x128xf32>
    %c96_i32 = arith.constant 96 : i32
    %732 = tpu.dynamic_rotate %697 by %c96_i32 dim 1 : vector<8x128xf32>, i32 -> vector<8x128xf32>
    %c2_i32_236 = arith.constant 2 : i32
    %733 = tpu.dynamic_rotate %732 by %c2_i32_236 dim 0 : vector<8x128xf32>, i32 -> vector<8x128xf32>
    %734 = arith.mulf %733, %12 : vector<8x128xf32>
    %735 = vector.extract_strided_slice %699 {offsets = [2, 0], sizes = [1, 128], strides = [1, 1]} : vector<9x128xf32> to vector<1x128xf32>
    %736 = vector.broadcast %735 : vector<1x128xf32> to vector<8x128xf32>
    %737 = arith.mulf %734, %736 : vector<8x128xf32>
    %738 = arith.addf %731, %737 : vector<8x128xf32>
    %739 = vector.extract_strided_slice %699 {offsets = [5, 0], sizes = [1, 128], strides = [1, 1]} : vector<9x128xf32> to vector<1x128xf32>
    %740 = vector.broadcast %739 : vector<1x128xf32> to vector<8x128xf32>
    %741 = arith.mulf %732, %740 : vector<8x128xf32>
    %742 = arith.addf %738, %741 : vector<8x128xf32>
    %c6_i32_237 = arith.constant 6 : i32
    %743 = tpu.dynamic_rotate %732 by %c6_i32_237 dim 0 : vector<8x128xf32>, i32 -> vector<8x128xf32>
    %744 = arith.mulf %743, %16 : vector<8x128xf32>
    %745 = vector.extract_strided_slice %699 {offsets = [8, 0], sizes = [1, 128], strides = [1, 1]} : vector<9x128xf32> to vector<1x128xf32>
    %746 = vector.broadcast %745 : vector<1x128xf32> to vector<8x128xf32>
    %747 = arith.mulf %744, %746 : vector<8x128xf32>
    %748 = arith.addf %742, %747 : vector<8x128xf32>
    %c10_238 = arith.constant 10 : index
    %c0_239 = arith.constant 0 : index
    %c0_240 = arith.constant 0 : index
    %749 = vector.load %arg10[%c10_238, %c0_239, %c0_240] : memref<11x128x128xbf16, #tpu.memory_space<vmem>>, vector<1x128x128xbf16>
    %750 = vector.shape_cast %749 : vector<1x128x128xbf16> to vector<128x128xbf16>
    %c10_241 = arith.constant 10 : index
    %c0_242 = arith.constant 0 : index
    %c0_243 = arith.constant 0 : index
    %751 = vector.load %arg11[%c10_241, %c0_242, %c0_243] : memref<11x1x128xf32, #tpu.memory_space<vmem>>, vector<1x1x128xf32>
    %752 = vector.shape_cast %751 : vector<1x1x128xf32> to vector<1x128xf32>
    %c10_244 = arith.constant 10 : index
    %c0_245 = arith.constant 0 : index
    %c0_246 = arith.constant 0 : index
    %753 = vector.load %arg12[%c10_244, %c0_245, %c0_246] : memref<11x1x128xf32, #tpu.memory_space<vmem>>, vector<1x1x128xf32>
    %754 = vector.shape_cast %753 : vector<1x1x128xf32> to vector<1x128xf32>
    %755 = arith.truncf %748 : vector<8x128xf32> to vector<8x128xbf16>
    %cst_247 = arith.constant dense<0.000000e+00> : vector<8x128xf32>
    %756 = tpu.matmul %755, %750, %cst_247 {dimension_numbers = #tpu.dot_dimension_numbers<[1], [0], [0], [1], [0, 0, 1, 1], [], []>} : vector<8x128xbf16>, vector<128x128xbf16>, vector<8x128xf32> -> vector<8x128xf32>
    %757 = vector.broadcast %752 : vector<1x128xf32> to vector<8x128xf32>
    %758 = arith.mulf %756, %757 : vector<8x128xf32>
    %759 = vector.broadcast %754 : vector<1x128xf32> to vector<8x128xf32>
    %760 = arith.addf %758, %759 : vector<8x128xf32>
    %761 = arith.addf %29, %760 : vector<8x128xf32>
    %c0_248 = arith.constant 0 : index
    %c0_249 = arith.constant 0 : index
    %c0_250 = arith.constant 0 : index
    %c0_251 = arith.constant 0 : index
    %762 = vector.load %arg13[%c0_248, %c0_249, %c0_250, %c0_251] : memref<1x4x8x128xf32, #tpu.memory_space<vmem>>, vector<1x1x8x128xf32>
    %763 = vector.shape_cast %762 : vector<1x1x8x128xf32> to vector<8x128xf32>
    %764 = vector.shape_cast %303 : vector<8x128xf32> to vector<1x1x8x128xf32>
    tpu.vector_store %arg13[%c0_248, %c0_249, %c0_250, %c0_251], %764 {strides = array<i32>} : memref<1x4x8x128xf32, #tpu.memory_space<vmem>>, vector<1x1x8x128xf32>,
    %c0_252 = arith.constant 0 : index
    %c1_253 = arith.constant 1 : index
    %c0_254 = arith.constant 0 : index
    %c0_255 = arith.constant 0 : index
    %765 = vector.load %arg13[%c0_252, %c1_253, %c0_254, %c0_255] : memref<1x4x8x128xf32, #tpu.memory_space<vmem>>, vector<1x1x8x128xf32>
    %766 = vector.shape_cast %765 : vector<1x1x8x128xf32> to vector<8x128xf32>
    %767 = vector.shape_cast %564 : vector<8x128xf32> to vector<1x1x8x128xf32>
    tpu.vector_store %arg13[%c0_252, %c1_253, %c0_254, %c0_255], %767 {strides = array<i32>} : memref<1x4x8x128xf32, #tpu.memory_space<vmem>>, vector<1x1x8x128xf32>,
    %c0_256 = arith.constant 0 : index
    %c2_257 = arith.constant 2 : index
    %c0_258 = arith.constant 0 : index
    %c0_259 = arith.constant 0 : index
    %768 = vector.load %arg13[%c0_256, %c2_257, %c0_258, %c0_259] : memref<1x4x8x128xf32, #tpu.memory_space<vmem>>, vector<1x1x8x128xf32>
    %769 = vector.shape_cast %768 : vector<1x1x8x128xf32> to vector<8x128xf32>
    %770 = vector.shape_cast %695 : vector<8x128xf32> to vector<1x1x8x128xf32>
    tpu.vector_store %arg13[%c0_256, %c2_257, %c0_258, %c0_259], %770 {strides = array<i32>} : memref<1x4x8x128xf32, #tpu.memory_space<vmem>>, vector<1x1x8x128xf32>,
    %c0_260 = arith.constant 0 : index
    %c3_261 = arith.constant 3 : index
    %c0_262 = arith.constant 0 : index
    %c0_263 = arith.constant 0 : index
    %771 = vector.load %arg13[%c0_260, %c3_261, %c0_262, %c0_263] : memref<1x4x8x128xf32, #tpu.memory_space<vmem>>, vector<1x1x8x128xf32>
    %772 = vector.shape_cast %771 : vector<1x1x8x128xf32> to vector<8x128xf32>
    %773 = vector.shape_cast %761 : vector<8x128xf32> to vector<1x1x8x128xf32>
    tpu.vector_store %arg13[%c0_260, %c3_261, %c0_262, %c0_263], %773 {strides = array<i32>} : memref<1x4x8x128xf32, #tpu.memory_space<vmem>>, vector<1x1x8x128xf32>,
    return
  }
  func.func @transform_0(%arg0: i32) -> (i32, i32, i32) {
    %c0_i32 = arith.constant 0 : i32
    %c0_i32_0 = arith.constant 0 : i32
    %c0_i32_1 = arith.constant 0 : i32
    return %arg0, %c0_i32, %c0_i32_0 : i32, i32, i32
  }
  func.func @transform_1(%arg0: i32) -> (i32, i32, i32) {
    %c0_i32 = arith.constant 0 : i32
    %c0_i32_0 = arith.constant 0 : i32
    %c0_i32_1 = arith.constant 0 : i32
    return %arg0, %c0_i32, %c0_i32_0 : i32, i32, i32
  }
  func.func @transform_2(%arg0: i32) -> (i32, i32) {
    %c0_i32 = arith.constant 0 : i32
    %c0_i32_0 = arith.constant 0 : i32
    %c0_i32_1 = arith.constant 0 : i32
    return %c0_i32, %c0_i32_0 : i32, i32
  }
  func.func @transform_3(%arg0: i32) -> (i32, i32) {
    %c0_i32 = arith.constant 0 : i32
    %c0_i32_0 = arith.constant 0 : i32
    %c0_i32_1 = arith.constant 0 : i32
    return %c0_i32, %c0_i32_0 : i32, i32
  }
  func.func @transform_4(%arg0: i32) -> (i32, i32) {
    %c0_i32 = arith.constant 0 : i32
    %c0_i32_0 = arith.constant 0 : i32
    %c0_i32_1 = arith.constant 0 : i32
    return %c0_i32, %c0_i32_0 : i32, i32
  }
  func.func @transform_5(%arg0: i32) -> (i32, i32) {
    %c0_i32 = arith.constant 0 : i32
    %c0_i32_0 = arith.constant 0 : i32
    %c0_i32_1 = arith.constant 0 : i32
    return %c0_i32, %c0_i32_0 : i32, i32
  }
  func.func @transform_6(%arg0: i32) -> (i32, i32) {
    %c0_i32 = arith.constant 0 : i32
    %c0_i32_0 = arith.constant 0 : i32
    %c0_i32_1 = arith.constant 0 : i32
    return %c0_i32, %c0_i32_0 : i32, i32
  }
  func.func @transform_7(%arg0: i32) -> (i32, i32) {
    %c0_i32 = arith.constant 0 : i32
    %c0_i32_0 = arith.constant 0 : i32
    %c0_i32_1 = arith.constant 0 : i32
    return %c0_i32, %c0_i32_0 : i32, i32
  }
  func.func @transform_8(%arg0: i32) -> (i32, i32, i32) {
    %c0_i32 = arith.constant 0 : i32
    %c0_i32_0 = arith.constant 0 : i32
    %c0_i32_1 = arith.constant 0 : i32
    %c0_i32_2 = arith.constant 0 : i32
    return %c0_i32, %c0_i32_0, %c0_i32_1 : i32, i32, i32
  }
  func.func @transform_9(%arg0: i32) -> (i32, i32, i32) {
    %c0_i32 = arith.constant 0 : i32
    %c0_i32_0 = arith.constant 0 : i32
    %c0_i32_1 = arith.constant 0 : i32
    %c0_i32_2 = arith.constant 0 : i32
    return %c0_i32, %c0_i32_0, %c0_i32_1 : i32, i32, i32
  }
  func.func @transform_10(%arg0: i32) -> (i32, i32, i32) {
    %c0_i32 = arith.constant 0 : i32
    %c0_i32_0 = arith.constant 0 : i32
    %c0_i32_1 = arith.constant 0 : i32
    %c0_i32_2 = arith.constant 0 : i32
    return %c0_i32, %c0_i32_0, %c0_i32_1 : i32, i32, i32
  }
  func.func @transform_11(%arg0: i32) -> (i32, i32, i32) {
    %c0_i32 = arith.constant 0 : i32
    %c0_i32_0 = arith.constant 0 : i32
    %c0_i32_1 = arith.constant 0 : i32
    %c0_i32_2 = arith.constant 0 : i32
    return %c0_i32, %c0_i32_0, %c0_i32_1 : i32, i32, i32
  }
  func.func @transform_12(%arg0: i32) -> (i32, i32, i32, i32) {
    %c0_i32 = arith.constant 0 : i32
    %c0_i32_0 = arith.constant 0 : i32
    %c0_i32_1 = arith.constant 0 : i32
    %c0_i32_2 = arith.constant 0 : i32
    return %arg0, %c0_i32, %c0_i32_0, %c0_i32_1 : i32, i32, i32, i32
  }
}

</mosaic_0001>

<bundles_post_ra>
// kernel: cell_forward_pallas.1
= control target key start
LH: loop header
LB: loop body
LE: loop exit
PB: predicated region body
PF: predicated region fallthrough
CT: control target
= control target key end

     0   :  { %17 = vsyncpa [#allocation3], 0  ;;  %s3730_s21 = smov 0   ;;  %s4492_s0 = inlined_call_operand.vmem [shape: f32[2,8,128], index: 0, kind: input, shape index: {}]   ;;  %s4493_s1 = inlined_call_operand.vmem [shape: f32[2,8,128], index: 1, kind: input, shape index: {}]   ;;  %s4494_s2 = inlined_call_operand.vmem [shape: bf16[128,128], index: 2, kind: input, shape index: {}]   ;;  %s4495_s3 = inlined_call_operand.vmem [shape: f32[1,128], index: 3, kind: input, shape index: {}]   ;;  %s4496_s4 = inlined_call_operand.vmem [shape: f32[1,128], index: 4, kind: input, shape index: {}]   ;;  %s4497_s5 = inlined_call_operand.vmem [shape: bf16[128,128], index: 5, kind: input, shape index: {}]   ;;  %s4498_s6 = inlined_call_operand.vmem [shape: f32[1,128], index: 6, kind: input, shape index: {}]   ;;  %s4499_s7 = inlined_call_operand.vmem [shape: f32[1,128], index: 7, kind: input, shape index: {}]   ;;  %s4500_s8 = inlined_call_operand.vmem [shape: f32[11,9,128], index: 8, kind: input, shape index: {}]   ;;  %s4501_s9 = inlined_call_operand.hbm [shape: bf16[11,128,128], index: 9, kind: input, shape index: {}]   ;;  %s4502_s10 = inlined_call_operand.vmem [shape: f32[11,1,128], index: 10, kind: input, shape index: {}]   ;;  %s4503_s11 = inlined_call_operand.vmem [shape: f32[11,1,128], index: 11, kind: input, shape index: {}]   ;;  %s4504_s12 = inlined_call_operand.vmem [shape: f32[2,4,8,128], index: 12, kind: output, shape index: {}]  }
   0x1 LB: > { %s3736_s22 = sadd.s32 4294967295, %s3654_s21   ;;  %p2908_p0 = scmp.ge.s32.totalorder %s3654_s21, 1  ;;  %s3654_s21 = sphi %s3730_s21, %s23_s21  }
   0x2   : > { %p316_p1 = scmp.lt.s32.totalorder %s3654_s21, 3  ;;  %s3656_s23 = smov [#allocation2]  }
   0x3   : > { %s349_s24 = sshll.u32 %s3656_s23, 4  ;;  %p4505_p3 = scmp.eq.s32.totalorder %s3736_s22, 0  ;;  %s350_s24 = int_to_ptr.vmem [resolvable:$true] %s349_s24 }
   0x4   : > { %p3740_p2 = pnand %p2908_p0, %p316_p1  ;;  %s3616_s29 = scalar_lea.hbm %s4501_s9, 11264 }
   0x5   : > { %p3617_p6 = scmp.ne.s32.totalorder %s4501_s9, %s3616_s29  ;;  %p3623_p10 = scmp.lt.u32.totalorder %s3616_s29, %s4501_s9 }
   0x6   : > { %s4511_s25 = scalar_select %p3740_p2, 1, 0 }
   0x7   : > { %p3489_p4 = pneg %p3740_p2 }
   0x9   : > { %p3749_p5 = pnand %p4505_p3, %p3489_p4 }
   0xb   : > { %p3618_p7 = pneg %p3749_p5 }
   0xd   : > { %p3619_p8 = pnand %p3618_p7, %p3617_p6 }
   0xf   : > { %p3620_p9 = pneg %p3619_p8 }
  0x11   : > { %p3625_p11 = pnand %p3623_p10, %p3620_p9 }
  0x13   : > { %3628 = shalt.err (!%p3625_p11)
}
  0x14   : > { %s3629_s16 = scalar_lea.vmem %s350_s24, 11264  ;;  %p3637_p1 = scmp.lt.s32.totalorder %s350_s24, %s350_s24 }
  0x15   : > { %p3630_p12 = scmp.ne.s32.totalorder %s350_s24, %s3629_s16  ;;  %p3638_p4 = scmp.lt.s32.totalorder %s3629_s16, %s3629_s16 }
  0x17   : > { %p3632_p13 = pnand %p3630_p12, %p3618_p7  ;;  %p3639_p3 = por %p3638_p4, %p3637_p1 }
  0x19   : > { %p3633_p0 = pneg %p3632_p13 }
  0x1b   : > { %p3640_p2 = pnand %p3639_p3, %p3633_p0 }
  0x1d   : > { %3643 = shalt.err (!%p3640_p2)
}
  0x1e   : > { %s3657_s17 = smov 64   ;;  %s3658_s18 = smov 4  }
  0x1f   : > { %3492 = dma.hbm_to_vmem [thread:$0]  (!%p3749_p5), %s4501_s9, 11264, %s350_s24, [#allocation3], %s3657_s17, %s3657_s17, %s3658_s18  }
  0x20   : > { %p4513_p6 = scmp.ne.s32.totalorder %s4511_s25, 0 }
  0x22   : > { %385 = sbr.rel (%p4513_p6) target bundleno = 1403 (0x57b), region = 68 }
  0x29   : > { %p4514_p8 = scmp.eq.s32.totalorder %s3736_s22, 0 }
  0x2b   : > { %3649 = dma.done.wait (%p4514_p8), [#allocation3], 11264   ;;  %p4515_p7 = pmov %p4514_p8 }
  0x2c   : > { %v4507_v0 = vmov 0.0   ;;  %vm3660_vm0 = vmmov 0   ;;  %v3512_v1 = vld [vmem:[%s4494_s2] sm:$0xff]   ;;  %v3514_v3 = vld [vmem:[%s4494_s2 + $0x8] sm:$0xff]   ;;  %p430_p2 = scmp.lt.s32.totalorder %s3736_s22, 1  ;;  %v3516_v5 = vld [vmem:[%s4494_s2 + $0x10] sm:$0xff]   ;;  %v444_v49 = vlaneseq }
  0x2d   : > { %3651 = vsyncadd (%p4515_p7), [#allocation3], 4294956032  ;;  %3225 = vmatprep.subr.bf16.mxu0 %v4507_v0  ;;  %3245 = vmatprep.subr.bf16.mxu1 %v4507_v0  ;;  %v3513_v2 = vld [vmem:[%s4497_s5] sm:$0xff]   ;;  %v3515_v4 = vld [vmem:[%s4497_s5 + $0x8] sm:$0xff]   ;;  %s3661_s20 = smov 16   ;;  %s3662_s23 = smov 112  }
  0x2e   : > { %3241 = vmatprep.mubr.msk.bf16.mxu0 %vm3660_vm0, %v4507_v0  ;;  %3261 = vmatprep.mubr.msk.bf16.mxu1 %vm3660_vm0, %v4507_v0  ;;  %s4530_s22 = smov (!%p430_p2, %s3736_s22), 1  ;;  %v3517_v6 = vld [vmem:[%s4497_s5 + $0x10] sm:$0xff]   ;;  %v3518_v7 = vld [vmem:[%s4494_s2 + $0x18] sm:$0xff]   ;;  %v3520_v9 = vld [vmem:[%s4494_s2 + $0x20] sm:$0xff]   ;;  %v3895_v50 = vshrl.u32 %v444_v49, 7  ;;  %s3664_s18 = smov 96  }
  0x2f   : > { %3226 = vmatpush3.bf16.msra.mxu0 %v3512_v1  ;;  %3246 = vmatpush3.bf16.msra.mxu1 %v3513_v2  ;;  %s2913_s19 = sshll.u32 %s4530_s22, 3  ;;  %v3519_v8 = vld [vmem:[%s4497_s5 + $0x18] sm:$0xff]   ;;  %v3521_v10 = vld [vmem:[%s4497_s5 + $0x20] sm:$0xff]   ;;  %v3522_v13 = vld [vmem:[%s4494_s2 + $0x28] sm:$0xff]   ;;  %s3107_s14 = sshll.u32 %s4530_s22, 5 }
  0x30   : > { %3227 = vmatprep.subr.bf16.mxu0 %v4507_v0  ;;  %3247 = vmatprep.subr.bf16.mxu1 %v4507_v0  ;;  %s433_s26 = scalar_lea.vmem %s4492_s0, %s2913_s19  ;;  %s437_s29 = scalar_lea.vmem %s4493_s1, %s2913_s19  ;;  %v3523_v14 = vld [vmem:[%s4497_s5 + $0x28] sm:$0xff]   ;;  %v3524_v17 = vld [vmem:[%s4494_s2 + $0x30] sm:$0xff]   ;;  %v3526_v19 = vld [vmem:[%s4494_s2 + $0x38] sm:$0xff]   ;;  %4516 = vst [vmem:[#allocation5_spill] sm:$0xff] %v3895_v50  ;;  %v3898_v51 = vsub.s32 4, %v3895_v50  ;;  %vm446_vm1 = vcmp.ge.s32.totalorder %v3895_v50, 1 }
  0x31   : > { %v458_v11 = vld [vmem:[%s433_s26] sm:$0xff]  ;;  %v3525_v18 = vld [vmem:[%s4497_s5 + $0x30] sm:$0xff]   ;;  %v3527_v20 = vld [vmem:[%s4497_s5 + $0x38] sm:$0xff]   ;;  %vm449_vm2 = vcmp.lt.s32.totalorder %v3895_v50, 7  ;;  %v3913_v54 = vsub.s32 1, %v3895_v50  ;;  %v3916_v55 = vsub.s32 7, %v3895_v50  ;;  %s4428_s17 = scalar_lea.vmem %s4504_s12, %s3107_s14 }
  0x32   : > { %v581_v12 = vld [vmem:[%s437_s29] sm:$0xff]  ;;  %v477_v15 = vmax.f32 %v458_v11, 0.0  ;;  %v3529_v24 = vld [vmem:[#allocation2 + $0x8] sm:$0xff]   ;;  %v3530_v25 = vld [vmem:[#allocation2 + $0x10] sm:$0xff]   ;;  %v3919_v56 = vsub.s32 0, %v3895_v50  ;;  %v3926_v59 = vsel %vm446_vm1, 1.0, %v4507_v0 }
  0x33   : > { %3228 = vmatpush3.bf16.msra.mxu0 %v3514_v3  ;;  %3248 = vmatpush3.bf16.msra.mxu1 %v3515_v4  ;;  %v600_v16 = vmax.f32 %v581_v12, 0.0  ;;  %v3528_v23 = vld [vmem:[#allocation2] sm:$0xff]   ;;  %v3531_v34 = vld [vmem:[#allocation2 + $0x18] sm:$0xff]   ;;  %v3533_v46 = vld [vmem:[#allocation2 + $0x28] sm:$0xff]   ;;  %v3929_v60 = vsel %vm449_vm2, 1.0, %v4507_v0  ;;  %v3932_v61 = vsub.s32 3, %v3895_v50 }
  0x34   : > { %3229 = vmatprep.subr.bf16.mxu0 %v4507_v0  ;;  %3249 = vmatprep.subr.bf16.mxu1 %v4507_v0  ;;  %v478_v21 = vpack.c.bf16 %v477_v15, %v477_v15  ;;  %v2929_v26 = vld [vmem:[%s4495_s3] ss:$0 sm:$0xff]  ;;  %v3534_v47 = vld [vmem:[#allocation2 + $0x30] sm:$0xff]   ;;  %v3535_v48 = vld [vmem:[#allocation2 + $0x38] sm:$0xff]   ;;  %v3935_v62 = vsub.s32 6, %v3895_v50  ;;  %s3663_s22 = smov 32  }
  0x35   : > { %v601_v22 = vpack.c.bf16 %v600_v16, %v600_v16  ;;  %v2939_v27 = vld [vmem:[%s4498_s6] ss:$0 sm:$0xff] }
  0x36   : > { %v2930_v28 = vld [vmem:[%s4496_s4] ss:$0 sm:$0xff] }
  0x37   : > { %3230 = vmatpush3.bf16.msra.mxu0 %v3516_v5  ;;  %3250 = vmatpush3.bf16.msra.mxu1 %v3517_v6  ;;  %v2940_v31 = vld [vmem:[%s4499_s7] ss:$0 sm:$0xff] }
  0x38   : > { %3231 = vmatprep.subr.bf16.mxu0 %v4507_v0  ;;  %3251 = vmatprep.subr.bf16.mxu1 %v4507_v0  ;;  %v3532_v44 = vld [vmem:[#allocation2 + $0x20] sm:$0xff]  }
  0x39   : > { %v3903_v52 = vld [vmem:[%s4500_s8] sm:$0xff] }
  0x3a   : > { %v3908_v53 = vld [vmem:[%s4500_s8 + $0x40] sm:$0xff]  ;;  %v741_v57 = vrot.slane %v3903_v52, %v3898_v51  ;;  %v735_v2 = vrot.slane %v3903_v52, %v3913_v54  ;;  %v749_v4 = vrot.slane %v3903_v52, %v3916_v55 }
  0x3b   : > { %3232 = vmatpush3.bf16.msra.mxu0 %v3518_v7  ;;  %3252 = vmatpush3.bf16.msra.mxu1 %v3519_v8  ;;  %v1518_v58 = vrot.slane %v3908_v53, %v3898_v51  ;;  %v3940_v63 = vld [vmem:[%s4500_s8 + $0x20] sm:$0xff]  ;;  %v1512_v3 = vrot.slane %v3908_v53, %v3913_v54 }
  0x3c   : > { %3233 = vmatprep.subr.bf16.mxu0 %v4507_v0  ;;  %3253 = vmatprep.subr.bf16.mxu1 %v4507_v0  ;;  %v3945_v1 = vld [vmem:[%s4500_s8 + $0x60] sm:$0xff] }
  0x3d   : > { %v1877_v11 = vrot.slane %v3945_v1, %v3932_v61  ;;  %v1883_v12 = vrot.slane %v3945_v1, %v3935_v62 }
  0x3f   : > { %3234 = vmatpush3.bf16.msra.mxu0 %v3520_v9  ;;  %3254 = vmatpush3.bf16.msra.mxu1 %v3521_v10  ;;  %v1872_v9 = vrot.slane %v3945_v1, %v3919_v56  ;;  %v3966_v10 = vld [vmem:[%s4500_s8 + $0x80] sm:$0xff] }
  0x40   : > { %3235 = vmatprep.subr.bf16.mxu0 %v4507_v0  ;;  %3255 = vmatprep.subr.bf16.mxu1 %v4507_v0  ;;  %v2255_v15 = vrot.slane %v3966_v10, %v3932_v61  ;;  %v2261_v16 = vrot.slane %v3966_v10, %v3935_v62 }
  0x43   : > { %3236 = vmatpush3.bf16.msra.mxu0 %v3522_v13  ;;  %3256 = vmatpush3.bf16.msra.mxu1 %v3523_v14  ;;  %v1889_v13 = vrot.slane %v3945_v1, %v3913_v54  ;;  %v2250_v14 = vrot.slane %v3966_v10, %v3919_v56 }
  0x44   : > { %3237 = vmatprep.subr.bf16.mxu0 %v4507_v0  ;;  %3257 = vmatprep.subr.bf16.mxu1 %v4507_v0 }
  0x47   : > { %3238 = vmatpush3.bf16.msra.mxu0 %v3524_v17  ;;  %3258 = vmatpush3.bf16.msra.mxu1 %v3525_v18  ;;  %v2267_v17 = vrot.slane %v3966_v10, %v3913_v54 }
  0x48   : > { %3239 = vmatprep.subr.bf16.mxu0 %v4507_v0  ;;  %3259 = vmatprep.subr.bf16.mxu1 %v4507_v0 }
  0x4b   : > { %3240 = vmatpush3.bf16.msra.mxu0 %v3526_v19  ;;  %3260 = vmatpush3.bf16.msra.mxu1 %v3527_v20  ;;  %v3984_v19 = vsub.s32 2, %v3895_v50  ;;  %v3987_v20 = vsub.s32 5, %v3895_v50 }
  0x4c   : > { %3265 = vmatprep.subr.bf16.mxu0 %v4507_v0  ;;  %3285 = vmatprep.subr.bf16.mxu1 %v4507_v0 }
  0x4e   : > { %3242 = vmatmul.mubr.bf16.vlgmr.msra.gmra.mrb[0].mxu0 %v478_v21  ;;  %3262 = vmatmul.mubr.bf16.vlgmr.msra.gmra.mrb[0].mxu1 %v601_v22  ;;  %v1895_v22 = vrot.slane %v3945_v1, %v3898_v51 }
  0x4f   : > { %3281 = vmatprep.mubr.msk.bf16.mxu0 %vm3660_vm0, %v4507_v0  ;;  %3301 = vmatprep.mubr.msk.bf16.mxu1 %vm3660_vm0, %v4507_v0 }
  0x50   : > { %3266 = vmatpush3.bf16.msra.mxu0 %v3528_v23  ;;  %v719_v23 = vrot.slane %v3903_v52, %v3932_v61 }
  0x51   : > { %3267 = vmatprep.subr.bf16.mxu0 %v4507_v0 }
  0x54   : > { %3268 = vmatpush3.bf16.msra.mxu0 %v3529_v24 }
  0x55   : > { %3269 = vmatprep.subr.bf16.mxu0 %v4507_v0 }
  0x58   : > { %3270 = vmatpush3.bf16.msra.mxu0 %v3530_v25  ;;  %v2273_v25 = vrot.slane %v3966_v10, %v3898_v51 }
  0x59   : > { %3271 = vmatprep.subr.bf16.mxu0 %v4507_v0 }
  0x5c   : > { %3272 = vmatpush3.bf16.msra.mxu0 %v3531_v34 }
  0x5d   : > { %3273 = vmatprep.subr.bf16.mxu0 %v4507_v0 }
  0x60   : > { %3274 = vmatpush3.bf16.msra.mxu0 %v3532_v44 }
  0x61   : > { %3275 = vmatprep.subr.bf16.mxu0 %v4507_v0 }
  0x64   : > { %3276 = vmatpush3.bf16.msra.mxu0 %v3533_v46 }
  0x65   : > { %3277 = vmatprep.subr.bf16.mxu0 %v4507_v0 }
  0x68   : > { %3278 = vmatpush3.bf16.msra.mxu0 %v3534_v47 }
  0x69   : > { %3279 = vmatprep.subr.bf16.mxu0 %v4507_v0 }
  0x6c   : > { %3280 = vmatpush3.bf16.msra.mxu0 %v3535_v48 }
  0x6d   : > { %3305 = vmatprep.subr.bf16.mxu0 %v4507_v0 }
 0x121   : > { %v561_v29 = vpop.f32.mrb[0].mxu0  ;;  %v684_v32 = vpop.f32.mrb[0].mxu1 }
 0x122   : > { %v573_v30 = vmul.f32 %v2929_v26, %v561_v29  ;;  %v3243_v33 = vpop.f32.mrb[1].mxu0  ;;  %v696_v35 = vmul.f32 %v2939_v27, %v684_v32  ;;  %v3263_v37 = vpop.f32.mrb[1].mxu1  ;;  %v727_v29 = vrot.slane %v3903_v52, %v3935_v62  ;;  %v1506_v32 = vrot.slane %v3908_v53, %v3935_v62 }
 0x123   : > { %v564_v36 = vpop.f32.mrb[2].mxu0  ;;  %v687_v40 = vpop.f32.mrb[2].mxu1 }
 0x124   : > { %v3875_v38 = vadd.f32 %v2930_v28, %v573_v30  ;;  %v3244_v39 = vpop.f32.mrb[3].mxu0  ;;  %v703_v41 = vadd.f32 %v2940_v31, %v696_v35  ;;  %v3264_v42 = vpop.f32.mrb[3].mxu1  ;;  %v714_v28 = vrot.slane %v3903_v52, %v3919_v56  ;;  %v1500_v30 = vrot.slane %v3908_v53, %v3932_v61 }
 0x125   : > { %v1495_v31 = vrot.slane %v3908_v53, %v3919_v56 }
 0x126   : > { %v3879_v43 = vmax.f32 %v3875_v38, 0.0  ;;  %v3881_v45 = vmax.f32 %v703_v41, 0.0 }
 0x128   : > { %707 = vrot.lane.b32.xlu0 %v3879_v43, %s3661_s20  ;;  %1098 = vrot.lane.b32.xlu1 %v3881_v45, %s3661_s20  ;;  %v730_v18 = vrot.slane %v3879_v43, 7  ;;  %v744_v21 = vrot.slane %v3879_v43, 1  ;;  %v1121_v27 = vrot.slane %v3881_v45, 7  ;;  %v1135_v34 = vrot.slane %v3881_v45, 1 }
 0x129   : > { %v742_v42 = vmul.f32 %v741_v57, %v3879_v43  ;;  %v1519_v44 = vmul.f32 %v1518_v58, %v3879_v43  ;;  %v4025_v46 = vmul.f32 %v1895_v22, %v3881_v45  ;;  %v4031_v0 = vmul.f32 %v2273_v25, %v3881_v45 }
 0x12a   : > { %v731_v33 = vmul.f32 %v3926_v59, %v730_v18  ;;  %v745_v39 = vmul.f32 %v3929_v60, %v744_v21  ;;  %v4028_v48 = vmul.f32 %v3926_v59, %v1121_v27  ;;  %v4034_v37 = vmul.f32 %v3929_v60, %v1135_v34 }
 0x12c   : > { %752 = vrot.lane.b32.xlu0 %v3879_v43, %s3662_s23  ;;  %1143 = vrot.lane.b32.xlu1 %v3881_v45, %s3662_s23  ;;  %v736_v6 = vmul.f32 %v735_v2, %v731_v33  ;;  %v1513_v58 = vmul.f32 %v1512_v3, %v731_v33  ;;  %v750_v22 = vmul.f32 %v749_v4, %v745_v39 }
 0x19a   : > { %v708_v40 = vpop.permute.xlu0 %707  ;;  %v1099_v47 = vpop.permute.xlu1 %1098 }
 0x19b   : > { %v709_v49 = vrot.slane %v708_v40, 7  ;;  %v722_v18 = vrot.slane %v708_v40, 1  ;;  %v1100_v21 = vrot.slane %v1099_v47, 7  ;;  %v1113_v8 = vrot.slane %v1099_v47, 1 }
 0x19c   : > { %v1878_v41 = vmul.f32 %v1877_v11, %v1099_v47  ;;  %v720_v25 = vmul.f32 %v719_v23, %v708_v40  ;;  %v2256_v35 = vmul.f32 %v2255_v15, %v1099_v47  ;;  %v1501_v2 = vmul.f32 %v1500_v30, %v708_v40 }
 0x19d   : > { %v710_v43 = vmul.f32 %v3926_v59, %v709_v49  ;;  %v723_v57 = vmul.f32 %v3929_v60, %v722_v18  ;;  %v1101_v27 = vmul.f32 %v3926_v59, %v1100_v21  ;;  %v4040_v36 = vmul.f32 %v3929_v60, %v1113_v8 }
 0x19e   : > { %v753_v24 = vpop.permute.xlu0 %752  ;;  %v1890_v8 = vmul.f32 %v1889_v13, %v4028_v48  ;;  %v4517_v15 = vrot.slane %v3908_v53, %v3916_v55  ;;  %v4054_v40 = vpop.permute.xlu1 %1143 }
 0x19f   : > { %v715_v7 = vmul.f32 %v714_v28, %v710_v43  ;;  %v1496_v26 = vmul.f32 %v1495_v31, %v710_v43  ;;  %v1873_v34 = vmul.f32 %v1872_v9, %v1101_v27  ;;  %v1884_v5 = vmul.f32 %v1883_v12, %v4040_v36 }
 0x1a0   : > { %v728_v49 = vmul.f32 %v727_v29, %v723_v57  ;;  %v1507_v50 = vmul.f32 %v1506_v32, %v723_v57  ;;  %v2251_v18 = vmul.f32 %v2250_v14, %v1101_v27  ;;  %v2262_v3 = vmul.f32 %v2261_v16, %v4040_v36 }
 0x1a1   : > { %v721_v4 = vadd.f32 %v720_v25, %v715_v7  ;;  %v1502_v33 = vadd.f32 %v1501_v2, %v1496_v26  ;;  %v1879_v21 = vadd.f32 %v1878_v41, %v1873_v34  ;;  %v754_v11 = vrot.slane %v753_v24, 7 }
 0x1a2   : > { %v1525_v23 = vmul.f32 %v4517_v15, %v745_v39  ;;  %v2257_v28 = vadd.f32 %v2256_v35, %v2251_v18  ;;  %v2268_v9 = vmul.f32 %v2267_v17, %v4028_v48  ;;  %v768_v31 = vrot.slane %v753_v24, 1  ;;  %v2941_v18 = vld [vmem:[%s4500_s8 + $0x8] ss:$0 sm:$0xff] }
 0x1a3   : > { %v729_v30 = vadd.f32 %v728_v49, %v721_v4  ;;  %v1508_v12 = vadd.f32 %v1507_v50, %v1502_v33  ;;  %v1885_v29 = vadd.f32 %v1884_v5, %v1879_v21  ;;  %v1913_v14 = vrot.slane %v3945_v1, %v3987_v20 }
 0x1a4   : > { %v2291_v7 = vrot.slane %v3966_v10, %v3987_v20  ;;  %v2263_v16 = vadd.f32 %v2262_v3, %v2257_v28  ;;  %v755_v32 = vmul.f32 %v3926_v59, %v754_v11  ;;  %v4518_v50 = vrot.slane %v3945_v1, %v3916_v55 }
 0x1a5   : > { %v737_v13 = vadd.f32 %v736_v6, %v729_v30  ;;  %v1514_v26 = vadd.f32 %v1513_v58, %v1508_v12  ;;  %v1891_v35 = vadd.f32 %v1890_v8, %v1885_v29  ;;  %v1907_v17 = vrot.slane %v3945_v1, %v3984_v19 }
 0x1a6   : > { %v1902_v5 = vmul.f32 %v4518_v50, %v4034_v37  ;;  %v4519_v39 = vrot.slane %v3966_v10, %v3916_v55  ;;  %v2269_v6 = vadd.f32 %v2268_v9, %v2263_v16  ;;  %v2285_v58 = vrot.slane %v3966_v10, %v3984_v19 }
 0x1a7   : > { %v743_v43 = vadd.f32 %v742_v42, %v737_v13  ;;  %v1520_v57 = vadd.f32 %v1519_v44, %v1514_v26  ;;  %v4520_v25 = vrot.slane %v3940_v63, %v3932_v61  ;;  %v769_v34 = vmul.f32 %v3929_v60, %v768_v31  ;;  %v2999_v42 = vld [vmem:[%s4500_s8 + $0x48] ss:$0 sm:$0xff] }
 0x1a8   : > { %v2280_v41 = vmul.f32 %v4519_v39, %v4034_v37  ;;  %v1145_v49 = vrot.slane %v4054_v40, 7  ;;  %v1159_v1 = vrot.slane %v4054_v40, 1  ;;  %v4521_v10 = vrot.slane %v3903_v52, %v3984_v19 }
 0x1a9   : > { %v1111_v2 = vmul.f32 %v4520_v25, %v1099_v47  ;;  %v751_v44 = vadd.f32 %v750_v22, %v743_v43  ;;  %v1526_v47 = vadd.f32 %v1525_v23, %v1520_v57  ;;  %v4522_v4 = vrot.slane %v3908_v53, %v3984_v19 }
 0x1aa   : > { %v760_v3 = vmul.f32 %v4521_v10, %v755_v32  ;;  %v4523_v21 = vrot.slane %v3903_v52, %v3987_v20  ;;  %v4524_v11 = vrot.slane %v3908_v53, %v3987_v20  ;;  %v1146_v28 = vmul.f32 %v3926_v59, %v1145_v49  ;;  %v3029_v53 = vld [vmem:[%s4500_s8 + $0x68] ss:$0 sm:$0xff] }
 0x1ab   : > { %v1531_v33 = vmul.f32 %v4522_v4, %v755_v32  ;;  %v1897_v22 = vadd.f32 %v4025_v46, %v1891_v35  ;;  %v4095_v23 = vmul.f32 %v3929_v60, %v1159_v1  ;;  %v2275_v12 = vadd.f32 %v4031_v0, %v2269_v6  ;;  %v3059_v0 = vld [vmem:[%s4500_s8 + $0x88] ss:$0 sm:$0xff] }
 0x1ac   : > { %v766_v8 = vmul.f32 %v4523_v21, %v753_v24  ;;  %v1537_v15 = vmul.f32 %v4524_v11, %v753_v24  ;;  %v761_v9 = vadd.f32 %v760_v3, %v751_v44  ;;  %v4525_v29 = vrot.slane %v3940_v63, %v3919_v56 }
 0x1ad   : > { %v1532_v30 = vadd.f32 %v1531_v33, %v1526_v47  ;;  %v774_v31 = vmul.f32 %v2941_v18, %v769_v34  ;;  %v1543_v16 = vmul.f32 %v2999_v42, %v769_v34  ;;  %v1903_v24 = vadd.f32 %v1902_v5, %v1897_v22  ;;  %v3536_v5 = vld [vmem:[#allocation2 + $0x80] sm:$0xff]   ;;  %v3537_v42 = vld [vmem:[#allocation2 + $0x88] sm:$0xff]   ;;  %v3538_v47 = vld [vmem:[#allocation2 + $0x90] sm:$0xff]  }
 0x1ae   : > { %v1106_v52 = vmul.f32 %v4525_v29, %v1101_v27  ;;  %v767_v13 = vadd.f32 %v766_v8, %v761_v9  ;;  %v1914_v26 = vmul.f32 %v1913_v14, %v4054_v40  ;;  %v1908_v32 = vmul.f32 %v1907_v17, %v1146_v28  ;;  %v3539_v8 = vld [vmem:[#allocation2 + $0x98] sm:$0xff]   ;;  %v3540_v22 = vld [vmem:[#allocation2 + $0xa0] sm:$0xff]  }
 0x1af   : > { %v1538_v46 = vadd.f32 %v1537_v15, %v1532_v30  ;;  %v2292_v35 = vmul.f32 %v2291_v7, %v4054_v40  ;;  %v2281_v50 = vadd.f32 %v2280_v41, %v2275_v12  ;;  %v2286_v27 = vmul.f32 %v2285_v58, %v1146_v28  ;;  %v3541_v12 = vld [vmem:[#allocation2 + $0xa8] sm:$0xff]  }
 0x1b0   : > { %v775_v39 = vadd.f32 %v774_v31, %v767_v13  ;;  %v1909_v43 = vadd.f32 %v1908_v32, %v1903_v24  ;;  %v1920_v57 = vmul.f32 %v3029_v53, %v4095_v23  ;;  %v2298_v34 = vmul.f32 %v3059_v0, %v4095_v23  ;;  %v3542_v31 = vld [vmem:[#allocation2 + $0xb0] sm:$0xff]   ;;  %v3545_v13 = vld [vmem:[#allocation2 + $0x108] sm:$0xff]  }
 0x1b1   : > { %v4109_v6 = vadd.f32 %v1543_v16, %v1538_v46  ;;  %v2287_v25 = vadd.f32 %v2286_v27, %v2281_v50  ;;  %v1112_v14 = vadd.f32 %v1111_v2, %v1106_v52  ;;  %v4526_v17 = vrot.slane %v3940_v63, %v3935_v62  ;;  %v3547_v46 = vld [vmem:[#allocation2 + $0x118] sm:$0xff]   ;;  %v3549_v32 = vld [vmem:[#allocation2 + $0x128] sm:$0xff]   ;;  %v3550_v0 = vld [vmem:[#allocation2 + $0x130] sm:$0xff]  }
 0x1b2   : > { %v794_v1 = vpack.c.bf16 %v775_v39, %v775_v39  ;;  %v1915_v7 = vadd.f32 %v1914_v26, %v1909_v43  ;;  %v1126_v58 = vrot.slane %v3940_v63, %v3913_v54  ;;  %v4527_v44 = vmov 0.0   ;;  %v3548_v26 = vld [vmem:[#allocation2 + $0x120] sm:$0xff]   ;;  %v3553_v39 = vld [vmem:[#allocation2 + $0x188] sm:$0xff]   ;;  %v3554_v43 = vld [vmem:[#allocation2 + $0x190] sm:$0xff]  }
 0x1b3   : > { %v1119_v49 = vmul.f32 %v4526_v17, %v4040_v36  ;;  %v2293_v41 = vadd.f32 %v2292_v35, %v2287_v25  ;;  %v1132_v3 = vrot.slane %v3940_v63, %v3898_v51  ;;  %v1140_v21 = vrot.slane %v3940_v63, %v3916_v55  ;;  %v3551_v35 = vld [vmem:[#allocation2 + $0x138] sm:$0xff]   ;;  %v3552_v50 = vld [vmem:[#allocation2 + $0x180] sm:$0xff]   ;;  %v3558_v25 = vld [vmem:[#allocation2 + $0x1b0] sm:$0xff]  }
 0x1b4   : > { %3282 = vmatmul.mubr.bf16.vlgmr.msra.gmra.mrb[4].mxu0 %v794_v1  ;;  %v4119_v18 = vadd.f32 %v1920_v57, %v1915_v7  ;;  %v1127_v36 = vmul.f32 %v1126_v58, %v4028_v48  ;;  %v1150_v48 = vrot.slane %v3940_v63, %v3984_v19  ;;  %v1156_v9 = vrot.slane %v3940_v63, %v3987_v20  ;;  %v3555_v57 = vld [vmem:[#allocation2 + $0x198] sm:$0xff]   ;;  %v3562_v1 = vld [vmem:[#allocation2 + $0x210] sm:$0xff]   ;;  %v3565_v58 = vld [vmem:[#allocation2 + $0x228] sm:$0xff]  }
 0x1b5   : > { %3306 = vmatpush3.bf16.msra.mxu0 %v3536_v5  ;;  %3321 = vmatprep.mubr.msk.bf16.mxu0 %vm3660_vm0, %v4527_v44  ;;  %v4123_v2 = vadd.f32 %v2298_v34, %v2293_v41  ;;  %v1120_v10 = vadd.f32 %v1119_v49, %v1112_v14  ;;  %v1133_v33 = vmul.f32 %v1132_v3, %v3881_v45  ;;  %v3557_v5 = vld [vmem:[#allocation2 + $0x1a8] sm:$0xff]   ;;  %v3559_v34 = vld [vmem:[#allocation2 + $0x1b8] sm:$0xff]   ;;  %v3560_v14 = vld [vmem:[#allocation2 + $0x200] sm:$0xff]  }
 0x1b6   : > { %3307 = vmatprep.subr.bf16.mxu0 %v4527_v44  ;;  %v1141_v15 = vmul.f32 %v1140_v21, %v4034_v37  ;;  %v1151_v30 = vmul.f32 %v1150_v48, %v1146_v28  ;;  %v1157_v29 = vmul.f32 %v1156_v9, %v4054_v40  ;;  %v2969_v37 = vld [vmem:[%s4500_s8 + $0x28] ss:$0 sm:$0xff]  ;;  %v3543_v28 = vld [vmem:[#allocation2 + $0xb8] sm:$0xff]   ;;  %v3544_v40 = vld [vmem:[#allocation2 + $0x100] sm:$0xff]   ;;  %v1566_v27 = vpack.c.bf16 %v4109_v6, %v4109_v6 }
 0x1b7   : > { %v1128_v4 = vadd.f32 %v1127_v36, %v1120_v10  ;;  %v1165_v16 = vmul.f32 %v2969_v37, %v4095_v23  ;;  %v3546_v23 = vld [vmem:[#allocation2 + $0x110] sm:$0xff]   ;;  %v3556_v6 = vld [vmem:[#allocation2 + $0x1a0] sm:$0xff]   ;;  %v1943_v17 = vpack.c.bf16 %v4119_v18, %v4119_v18  ;;  %v3561_v49 = vld [vmem:[#allocation2 + $0x208] sm:$0xff]   ;;  %v2321_v10 = vpack.c.bf16 %v4123_v2, %v4123_v2 }
 0x1b8   : > { %v3563_v7 = vld [vmem:[#allocation2 + $0x218] sm:$0xff]   ;;  %v3564_v41 = vld [vmem:[#allocation2 + $0x220] sm:$0xff]   ;;  %v3566_v18 = vld [vmem:[#allocation2 + $0x230] sm:$0xff]  }
 0x1b9   : > { %3308 = vmatpush3.bf16.msra.mxu0 %v3537_v42  ;;  %v1134_v11 = vadd.f32 %v1133_v33, %v1128_v4  ;;  %v3567_v42 = vld [vmem:[#allocation2 + $0x238] sm:$0xff]   ;;  %v3568_v36 = vld [vmem:[#allocation2 + $0x40] sm:$0xff]   ;;  %v3569_v3 = vld [vmem:[#allocation2 + $0x48] sm:$0xff]  }
 0x1ba   : > { %3309 = vmatprep.subr.bf16.mxu0 %v4527_v44  ;;  %3286 = vmatpush3.bf16.msra.mxu1 %v3568_v36  ;;  %v2950_v4 = vld [vmem:[%s4502_s10] ss:$0 sm:$0xff]  ;;  %v2981_v37 = vld [vmem:[%s4503_s11 + $0x2] ss:$0 sm:$0xff] }
 0x1bb   : > { %v1142_v45 = vadd.f32 %v1141_v15, %v1134_v11  ;;  %3287 = vmatprep.subr.bf16.mxu1 %v4527_v44  ;;  %v2951_v2 = vld [vmem:[%s4503_s11] ss:$0 sm:$0xff]  ;;  %v3571_v11 = vld [vmem:[#allocation2 + $0x58] sm:$0xff]  }
 0x1bd   : > { %3310 = vmatpush3.bf16.msra.mxu0 %v3538_v47  ;;  %v1152_v52 = vadd.f32 %v1151_v30, %v1142_v45  ;;  %v3570_v47 = vld [vmem:[#allocation2 + $0x50] sm:$0xff]   ;;  %v3572_v45 = vld [vmem:[#allocation2 + $0x60] sm:$0xff]   ;;  %v3573_v30 = vld [vmem:[#allocation2 + $0x68] sm:$0xff]  }
 0x1be   : > { %3311 = vmatprep.subr.bf16.mxu0 %v4527_v44  ;;  %3288 = vmatpush3.bf16.msra.mxu1 %v3569_v3 }
 0x1bf   : > { %v1158_v63 = vadd.f32 %v1157_v29, %v1152_v52  ;;  %3289 = vmatprep.subr.bf16.mxu1 %v4527_v44  ;;  %v3575_v29 = vld [vmem:[#allocation2 + $0x78] sm:$0xff]   ;;  %v2980_v52 = vld [vmem:[%s4502_s10 + $0x2] ss:$0 sm:$0xff] }
 0x1c1   : > { %3312 = vmatpush3.bf16.msra.mxu0 %v3539_v8  ;;  %v1166_v53 = vadd.f32 %v1165_v16, %v1158_v63 }
 0x1c2   : > { %3313 = vmatprep.subr.bf16.mxu0 %v4527_v44  ;;  %3290 = vmatpush3.bf16.msra.mxu1 %v3570_v47 }
 0x1c3   : > { %v1188_v24 = vpack.c.bf16 %v1166_v53, %v1166_v53  ;;  %3291 = vmatprep.subr.bf16.mxu1 %v4527_v44 }
 0x1c5   : > { %3314 = vmatpush3.bf16.msra.mxu0 %v3540_v22 }
 0x1c6   : > { %3315 = vmatprep.subr.bf16.mxu0 %v4527_v44  ;;  %3292 = vmatpush3.bf16.msra.mxu1 %v3571_v11  ;;  %v3070_v11 = vld [vmem:[%s4502_s10 + $0x8] ss:$0 sm:$0xff] }
 0x1c7   : > { %3293 = vmatprep.subr.bf16.mxu1 %v4527_v44 }
 0x1c9   : > { %3316 = vmatpush3.bf16.msra.mxu0 %v3541_v12  ;;  %v3574_v12 = vld [vmem:[#allocation2 + $0x70] sm:$0xff]  }
 0x1ca   : > { %3317 = vmatprep.subr.bf16.mxu0 %v4527_v44  ;;  %3294 = vmatpush3.bf16.msra.mxu1 %v3572_v45 }
 0x1cb   : > { %3295 = vmatprep.subr.bf16.mxu1 %v4527_v44 }
 0x1cd   : > { %3318 = vmatpush3.bf16.msra.mxu0 %v3542_v31 }
 0x1ce   : > { %3319 = vmatprep.subr.bf16.mxu0 %v4527_v44  ;;  %3296 = vmatpush3.bf16.msra.mxu1 %v3573_v30  ;;  %v3071_v30 = vld [vmem:[%s4503_s11 + $0x8] ss:$0 sm:$0xff] }
 0x1cf   : > { %3297 = vmatprep.subr.bf16.mxu1 %v4527_v44 }
 0x1d1   : > { %3320 = vmatpush3.bf16.msra.mxu0 %v3543_v28 }
 0x1d2   : > { %3345 = vmatprep.subr.bf16.mxu0 %v4527_v44  ;;  %3298 = vmatpush3.bf16.msra.mxu1 %v3574_v12 }
 0x1d3   : > { %3299 = vmatprep.subr.bf16.mxu1 %v4527_v44 }
 0x1d4   : > { %3322 = vmatmul.mubr.bf16.vlgmr.msra.gmra.mrb[8].mxu0 %v1188_v24 }
 0x1d5   : > { %3346 = vmatpush3.bf16.msra.mxu0 %v3544_v40  ;;  %3361 = vmatprep.mubr.msk.bf16.mxu0 %vm3660_vm0, %v4527_v44 }
 0x1d6   : > { %3347 = vmatprep.subr.bf16.mxu0 %v4527_v44  ;;  %3300 = vmatpush3.bf16.msra.mxu1 %v3575_v29 }
 0x1d7   : > { %3325 = vmatprep.subr.bf16.mxu1 %v4527_v44 }
 0x1d9   : > { %3348 = vmatpush3.bf16.msra.mxu0 %v3545_v13  ;;  %v3010_v13 = vld [vmem:[%s4502_s10 + $0x4] ss:$0 sm:$0xff] }
 0x1da   : > { %3349 = vmatprep.subr.bf16.mxu0 %v4527_v44 }
 0x1dd   : > { %3350 = vmatpush3.bf16.msra.mxu0 %v3546_v23  ;;  %v3011_v23 = vld [vmem:[%s4503_s11 + $0x4] ss:$0 sm:$0xff] }
 0x1de   : > { %3351 = vmatprep.subr.bf16.mxu0 %v4527_v44 }
 0x1e1   : > { %3352 = vmatpush3.bf16.msra.mxu0 %v3547_v46 }
 0x1e2   : > { %3353 = vmatprep.subr.bf16.mxu0 %v4527_v44 }
 0x1e5   : > { %3354 = vmatpush3.bf16.msra.mxu0 %v3548_v26 }
 0x1e6   : > { %3355 = vmatprep.subr.bf16.mxu0 %v4527_v44 }
 0x1e9   : > { %3356 = vmatpush3.bf16.msra.mxu0 %v3549_v32 }
 0x1ea   : > { %3357 = vmatprep.subr.bf16.mxu0 %v4527_v44 }
 0x1ed   : > { %3358 = vmatpush3.bf16.msra.mxu0 %v3550_v0 }
 0x1ee   : > { %3359 = vmatprep.subr.bf16.mxu0 %v4527_v44 }
 0x1f1   : > { %3360 = vmatpush3.bf16.msra.mxu0 %v3551_v35 }
 0x1f2   : > { %3385 = vmatprep.subr.bf16.mxu0 %v4527_v44 }
 0x1f4   : > { %3362 = vmatmul.mubr.bf16.vlgmr.msra.gmra.mrb[12].mxu0 %v1566_v27 }
 0x1f5   : > { %3386 = vmatpush3.bf16.msra.mxu0 %v3552_v50  ;;  %3401 = vmatprep.mubr.msk.bf16.mxu0 %vm3660_vm0, %v4527_v44 }
 0x1f6   : > { %3387 = vmatprep.subr.bf16.mxu0 %v4527_v44 }
 0x1f9   : > { %3388 = vmatpush3.bf16.msra.mxu0 %v3553_v39  ;;  %v3040_v39 = vld [vmem:[%s4502_s10 + $0x6] ss:$0 sm:$0xff] }
 0x1fa   : > { %3389 = vmatprep.subr.bf16.mxu0 %v4527_v44 }
 0x1fd   : > { %3390 = vmatpush3.bf16.msra.mxu0 %v3554_v43  ;;  %v3041_v43 = vld [vmem:[%s4503_s11 + $0x6] ss:$0 sm:$0xff] }
 0x1fe   : > { %3391 = vmatprep.subr.bf16.mxu0 %v4527_v44 }
 0x201   : > { %3392 = vmatpush3.bf16.msra.mxu0 %v3555_v57 }
 0x202   : > { %3393 = vmatprep.subr.bf16.mxu0 %v4527_v44 }
 0x205   : > { %3394 = vmatpush3.bf16.msra.mxu0 %v3556_v6 }
 0x206   : > { %3395 = vmatprep.subr.bf16.mxu0 %v4527_v44 }
 0x209   : > { %3396 = vmatpush3.bf16.msra.mxu0 %v3557_v5 }
 0x20a   : > { %3397 = vmatprep.subr.bf16.mxu0 %v4527_v44 }
 0x20d   : > { %3398 = vmatpush3.bf16.msra.mxu0 %v3558_v25 }
 0x20e   : > { %3399 = vmatprep.subr.bf16.mxu0 %v4527_v44 }
 0x211   : > { %3400 = vmatpush3.bf16.msra.mxu0 %v3559_v34 }
 0x212   : > { %3425 = vmatprep.subr.bf16.mxu0 %v4527_v44 }
 0x214   : > { %3402 = vmatmul.mubr.bf16.vlgmr.msra.gmra.mrb[16].mxu0 %v1943_v17 }
 0x215   : > { %3426 = vmatpush3.bf16.msra.mxu0 %v3560_v14  ;;  %3441 = vmatprep.mubr.msk.bf16.mxu0 %vm3660_vm0, %v4527_v44 }
 0x216   : > { %3427 = vmatprep.subr.bf16.mxu0 %v4527_v44 }
 0x219   : > { %3428 = vmatpush3.bf16.msra.mxu0 %v3561_v49  ;;  %v2952_v49 = vld [vmem:[%s4500_s8 + $0x10] sm:$0xff] }
 0x21a   : > { %3429 = vmatprep.subr.bf16.mxu0 %v4527_v44  ;;  %v929_v47 = vrot.slane %v2952_v49, %v3913_v54 }
 0x21d   : > { %3430 = vmatpush3.bf16.msra.mxu0 %v3562_v1 }
 0x21e   : > { %3431 = vmatprep.subr.bf16.mxu0 %v4527_v44 }
 0x221   : > { %3432 = vmatpush3.bf16.msra.mxu0 %v3563_v7  ;;  %v908_v7 = vrot.slane %v2952_v49, %v3919_v56 }
 0x222   : > { %3433 = vmatprep.subr.bf16.mxu0 %v4527_v44 }
 0x225   : > { %3434 = vmatpush3.bf16.msra.mxu0 %v3564_v41  ;;  %v913_v41 = vrot.slane %v2952_v49, %v3932_v61 }
 0x226   : > { %3435 = vmatprep.subr.bf16.mxu0 %v4527_v44 }
 0x229   : > { %3436 = vmatpush3.bf16.msra.mxu0 %v3565_v58 }
 0x22a   : > { %3437 = vmatprep.subr.bf16.mxu0 %v4527_v44 }
 0x22d   : > { %3438 = vmatpush3.bf16.msra.mxu0 %v3566_v18 }
 0x22e   : > { %3439 = vmatprep.subr.bf16.mxu0 %v4527_v44 }
 0x231   : > { %3440 = vmatpush3.bf16.msra.mxu0 %v3567_v42 }
 0x232   : > { %3465 = vmatprep.subr.bf16.mxu0 %v4527_v44 }
 0x234   : > { %3442 = vmatmul.mubr.bf16.vlgmr.msra.gmra.mrb[20].mxu0 %v2321_v10  ;;  %v921_v10 = vrot.slane %v2952_v49, %v3935_v62 }
 0x235   : > { %3481 = vmatprep.mubr.msk.bf16.mxu0 %vm3660_vm0, %v4527_v44 }
 0x287   : > { %v877_v33 = vpop.f32.mrb[4].mxu0 }
 0x288   : > { %v889_v21 = vmul.f32 %v2950_v4, %v877_v33  ;;  %v3283_v8 = vpop.f32.mrb[5].mxu0 }
 0x289   : > { %v880_v48 = vpop.f32.mrb[6].mxu0 }
 0x28a   : > { %v896_v15 = vadd.f32 %v2951_v2, %v889_v21  ;;  %v3284_v22 = vpop.f32.mrb[7].mxu0 }
 0x28c   : > { %v4197_v9 = vmax.f32 %v896_v15, 0.0  ;;  %v935_v15 = vrot.slane %v2952_v49, %v3898_v51 }
 0x28e   : > { %946 = vrot.lane.b32.xlu1 %v4197_v9, %s3662_s23  ;;  %901 = vrot.lane.b32.xlu0 %v4197_v9, %s3661_s20  ;;  %v924_v18 = vrot.slane %v4197_v9, 7  ;;  %v938_v2 = vrot.slane %v4197_v9, 1 }
 0x290   : > { %v925_v8 = vmul.f32 %v3926_v59, %v924_v18  ;;  %v2982_v18 = vld [vmem:[%s4500_s8 + $0x30] sm:$0xff] }
 0x2a7   : > { %v1271_v31 = vpop.f32.mrb[8].mxu0 }
 0x2a8   : > { %v1283_v63 = vmul.f32 %v2980_v52, %v1271_v31  ;;  %v3323_v16 = vpop.f32.mrb[9].mxu0 }
 0x2a9   : > { %v1274_v28 = vpop.f32.mrb[10].mxu0  ;;  %v939_v16 = vmul.f32 %v3929_v60, %v938_v2  ;;  %v3579_v2 = vld [vmem:[#allocation2 + $0xd8] sm:$0xff]  }
 0x2aa   : > { %v1290_v53 = vadd.f32 %v2981_v37, %v1283_v63  ;;  %v3324_v40 = vpop.f32.mrb[11].mxu0  ;;  %v943_v37 = vrot.slane %v2952_v49, %v3916_v55  ;;  %v930_v63 = vmul.f32 %v929_v47, %v925_v8 }
 0x2ac   : > { %v4213_v24 = vmax.f32 %v1290_v53, 0.0  ;;  %v953_v53 = vrot.slane %v2952_v49, %v3984_v19 }
 0x2ae   : > { %1340 = vrot.lane.b32.xlu1 %v4213_v24, %s3662_s23  ;;  %1295 = vrot.lane.b32.xlu0 %v4213_v24, %s3661_s20  ;;  %v1318_v47 = vrot.slane %v4213_v24, 7 }
 0x2c7   : > { %v1649_v46 = vpop.f32.mrb[12].mxu0 }
 0x2c8   : > { %v1661_v26 = vmul.f32 %v3010_v13, %v1649_v46  ;;  %v3363_v32 = vpop.f32.mrb[13].mxu0 }
 0x2c9   : > { %v1652_v0 = vpop.f32.mrb[14].mxu0  ;;  %v936_v32 = vmul.f32 %v935_v15, %v4197_v9  ;;  %v1332_v15 = vrot.slane %v4213_v24, 1 }
 0x2ca   : > { %v1668_v35 = vadd.f32 %v3011_v23, %v1661_v26  ;;  %v3364_v50 = vpop.f32.mrb[15].mxu0 }
 0x2cc   : > { %v4225_v27 = vmax.f32 %v1668_v35, 0.0  ;;  %v959_v35 = vrot.slane %v2952_v49, %v3987_v20 }
 0x2ce   : > { %1718 = vrot.lane.b32.xlu1 %v4225_v27, %s3662_s23  ;;  %1673 = vrot.lane.b32.xlu0 %v4225_v27, %s3661_s20 }
 0x2e7   : > { %v2026_v57 = vpop.f32.mrb[16].mxu0 }
 0x2e8   : > { %v2038_v6 = vmul.f32 %v3040_v39, %v2026_v57  ;;  %v3403_v5 = vpop.f32.mrb[17].mxu0  ;;  %v944_v39 = vmul.f32 %v943_v37, %v939_v16 }
 0x2e9   : > { %v2029_v25 = vpop.f32.mrb[18].mxu0  ;;  %v2954_v5 = vld [vmem:[%s4500_s8 + $0x18] ss:$0 sm:$0xff] }
 0x2ea   : > { %v2045_v34 = vadd.f32 %v3041_v43, %v2038_v6  ;;  %v3404_v14 = vpop.f32.mrb[19].mxu0 }
 0x2ec   : > { %v4237_v17 = vmax.f32 %v2045_v34, 0.0 }
 0x2ee   : > { %2095 = vrot.lane.b32.xlu1 %v4237_v17, %s3662_s23  ;;  %2050 = vrot.lane.b32.xlu0 %v4237_v17, %s3661_s20 }
 0x300   : > { %v902_v1 = vpop.permute.xlu0 %901  ;;  %v947_v3 = vpop.permute.xlu1 %946 }
 0x301   : > { %v903_v58 = vrot.slane %v902_v1, 7  ;;  %v916_v42 = vrot.slane %v902_v1, 1  ;;  %v914_v21 = vmul.f32 %v913_v41, %v902_v1  ;;  %v948_v48 = vrot.slane %v947_v3, 7  ;;  %v3576_v1 = vld [vmem:[#allocation2 + $0xc0] sm:$0xff]   ;;  %v3577_v41 = vld [vmem:[#allocation2 + $0xc8] sm:$0xff]  }
 0x302   : > { %v962_v46 = vrot.slane %v947_v3, 1  ;;  %v960_v25 = vmul.f32 %v959_v35, %v947_v3  ;;  %v1353_v35 = vrot.slane %v2982_v18, %v3987_v20 }
 0x303   : > { %v904_v36 = vmul.f32 %v3926_v59, %v903_v58  ;;  %v917_v4 = vmul.f32 %v3929_v60, %v916_v42  ;;  %v949_v23 = vmul.f32 %v3926_v59, %v948_v48  ;;  %v3578_v58 = vld [vmem:[#allocation2 + $0xd0] sm:$0xff]  }
 0x304   : > { %v963_v57 = vmul.f32 %v3929_v60, %v962_v46 }
 0x305   : > { %v909_v33 = vmul.f32 %v908_v7, %v904_v36  ;;  %v922_v45 = vmul.f32 %v921_v10, %v917_v4  ;;  %v954_v43 = vmul.f32 %v953_v53, %v949_v23  ;;  %v1302_v10 = vrot.slane %v2982_v18, %v3919_v56 }
 0x306   : > { %v968_v9 = vmul.f32 %v2954_v5, %v963_v57  ;;  %v1307_v36 = vrot.slane %v2982_v18, %v3932_v61  ;;  %v1333_v53 = vmul.f32 %v3929_v60, %v1332_v15 }
 0x307   : > { %v915_v22 = vadd.f32 %v914_v21, %v909_v33  ;;  %v2404_v12 = vpop.f32.mrb[20].mxu0  ;;  %v1315_v33 = vrot.slane %v2982_v18, %v3935_v62 }
 0x308   : > { %v2416_v29 = vmul.f32 %v3070_v11, %v2404_v12  ;;  %v3443_v52 = vpop.f32.mrb[21].mxu0  ;;  %v1323_v11 = vrot.slane %v2982_v18, %v3913_v54  ;;  %v3580_v12 = vld [vmem:[#allocation2 + $0xe0] sm:$0xff]  }
 0x309   : > { %v923_v31 = vadd.f32 %v922_v45, %v915_v22  ;;  %v2407_v28 = vpop.f32.mrb[22].mxu0  ;;  %v1329_v52 = vrot.slane %v2982_v18, %v3898_v51 }
 0x30a   : > { %v2423_v40 = vadd.f32 %v3071_v30, %v2416_v29  ;;  %v3444_v13 = vpop.f32.mrb[23].mxu0  ;;  %v1319_v30 = vmul.f32 %v3926_v59, %v1318_v47 }
 0x30b   : > { %v931_v26 = vadd.f32 %v930_v63, %v923_v31  ;;  %v1337_v63 = vrot.slane %v2982_v18, %v3916_v55  ;;  %v3581_v13 = vld [vmem:[#allocation2 + $0xe8] sm:$0xff]  }
 0x30c   : > { %v4267_v0 = vmax.f32 %v2423_v40, 0.0  ;;  %v1324_v28 = vmul.f32 %v1323_v11, %v1319_v30  ;;  %v1347_v40 = vrot.slane %v2982_v18, %v3984_v19  ;;  %v3586_v18 = vld [vmem:[#allocation2 + $0x150] sm:$0xff]  }
 0x30d   : > { %v937_v50 = vadd.f32 %v936_v32, %v931_v26  ;;  %v1330_v32 = vmul.f32 %v1329_v52, %v4213_v24 }
 0x30e   : > { %2428 = vrot.lane.b32.xlu0 %v4267_v0, %s3661_s20 }
 0x30f   : > { %v945_v6 = vadd.f32 %v944_v39, %v937_v50  ;;  %v1338_v39 = vmul.f32 %v1337_v63, %v1333_v53 }
 0x311   : > { %v955_v34 = vadd.f32 %v954_v43, %v945_v6  ;;  %v3582_v43 = vld [vmem:[#allocation2 + $0xf0] sm:$0xff]  }
 0x312   : > { %2473 = vrot.lane.b32.xlu0 %v4267_v0, %s3662_s23 }
 0x313   : > { %v961_v14 = vadd.f32 %v960_v25, %v955_v34  ;;  %v2984_v25 = vld [vmem:[%s4500_s8 + $0x38] ss:$0 sm:$0xff] }
 0x315   : > { %v969_v49 = vadd.f32 %v968_v9, %v961_v14  ;;  %v3583_v9 = vld [vmem:[#allocation2 + $0xf8] sm:$0xff]  }
 0x317   : > { %v991_v7 = vpack.c.bf16 %v969_v49, %v969_v49 }
 0x319   : > { %3302 = vmatmul.mubr.bf16.vlgmr.msra.gmra.mrb[4].mxu1 %v991_v7  ;;  %v3584_v7 = vld [vmem:[#allocation2 + $0x140] sm:$0xff]  }
 0x31a   : > { %3326 = vmatpush3.bf16.msra.mxu1 %v3576_v1  ;;  %3341 = vmatprep.mubr.msk.bf16.mxu1 %vm3660_vm0, %v4527_v44 }
 0x31b   : > { %3327 = vmatprep.subr.bf16.mxu1 %v4527_v44 }
 0x31e   : > { %3328 = vmatpush3.bf16.msra.mxu1 %v3577_v41 }
 0x31f   : > { %3329 = vmatprep.subr.bf16.mxu1 %v4527_v44 }
 0x320   : > { %v1296_v42 = vpop.permute.xlu0 %1295  ;;  %v1341_v8 = vpop.permute.xlu1 %1340 }
 0x321   : > { %v1297_v3 = vrot.slane %v1296_v42, 7  ;;  %v1310_v4 = vrot.slane %v1296_v42, 1  ;;  %v1308_v45 = vmul.f32 %v1307_v36, %v1296_v42  ;;  %v1342_v29 = vrot.slane %v1341_v8, 7  ;;  %v3012_v42 = vld [vmem:[%s4500_s8 + $0x50] sm:$0xff] }
 0x322   : > { %3330 = vmatpush3.bf16.msra.mxu1 %v3578_v58  ;;  %v1356_v46 = vrot.slane %v1341_v8, 1  ;;  %v1354_v34 = vmul.f32 %v1353_v35, %v1341_v8  ;;  %v3585_v58 = vld [vmem:[#allocation2 + $0x148] sm:$0xff]   ;;  %v1680_v36 = vrot.slane %v3012_v42, %v3919_v56 }
 0x323   : > { %v1298_v21 = vmul.f32 %v3926_v59, %v1297_v3  ;;  %3331 = vmatprep.subr.bf16.mxu1 %v4527_v44  ;;  %v1311_v48 = vmul.f32 %v3929_v60, %v1310_v4  ;;  %v1343_v23 = vmul.f32 %v3926_v59, %v1342_v29  ;;  %v1685_v3 = vrot.slane %v3012_v42, %v3932_v61  ;;  %v3588_v29 = vld [vmem:[#allocation2 + $0x160] sm:$0xff]  }
 0x324   : > { %v1357_v6 = vmul.f32 %v3929_v60, %v1356_v46  ;;  %v1696_v4 = vrot.slane %v4225_v27, 7 }
 0x325   : > { %v1303_v22 = vmul.f32 %v1302_v10, %v1298_v21  ;;  %v1316_v31 = vmul.f32 %v1315_v33, %v1311_v48  ;;  %v1348_v57 = vmul.f32 %v1347_v40, %v1343_v23  ;;  %v3587_v33 = vld [vmem:[#allocation2 + $0x158] sm:$0xff]   ;;  %v1693_v21 = vrot.slane %v3012_v42, %v3935_v62  ;;  %v3589_v23 = vld [vmem:[#allocation2 + $0x168] sm:$0xff]  }
 0x326   : > { %3332 = vmatpush3.bf16.msra.mxu1 %v3579_v2  ;;  %v1362_v14 = vmul.f32 %v2984_v25, %v1357_v6  ;;  %v1701_v48 = vrot.slane %v3012_v42, %v3913_v54 }
 0x327   : > { %v1309_v37 = vadd.f32 %v1308_v45, %v1303_v22  ;;  %3333 = vmatprep.subr.bf16.mxu1 %v4527_v44  ;;  %v1710_v22 = vrot.slane %v4225_v27, 1 }
 0x329   : > { %v1317_v16 = vadd.f32 %v1316_v31, %v1309_v37  ;;  %v1707_v37 = vrot.slane %v3012_v42, %v3898_v51  ;;  %v1711_v40 = vmul.f32 %v3929_v60, %v1710_v22  ;;  %v2087_v22 = vrot.slane %v4237_v17, 1 }
 0x32a   : > { %3334 = vmatpush3.bf16.msra.mxu1 %v3580_v12  ;;  %v1697_v12 = vmul.f32 %v3926_v59, %v1696_v4  ;;  %v2073_v4 = vrot.slane %v4237_v17, 7 }
 0x32b   : > { %v1325_v26 = vadd.f32 %v1324_v28, %v1317_v16  ;;  %3335 = vmatprep.subr.bf16.mxu1 %v4527_v44  ;;  %v1715_v16 = vrot.slane %v3012_v42, %v3916_v55  ;;  %v1708_v35 = vmul.f32 %v1707_v37, %v4225_v27 }
 0x32c   : > { %v1702_v53 = vmul.f32 %v1701_v48, %v1697_v12  ;;  %v2074_v12 = vmul.f32 %v3926_v59, %v2073_v4  ;;  %v2451_v4 = vrot.slane %v4267_v0, 7 }
 0x32d   : > { %v1331_v50 = vadd.f32 %v1330_v32, %v1325_v26 }
 0x32e   : > { %3336 = vmatpush3.bf16.msra.mxu1 %v3581_v13  ;;  %v1725_v13 = vrot.slane %v3012_v42, %v3984_v19 }
 0x32f   : > { %v1339_v5 = vadd.f32 %v1338_v39, %v1331_v50  ;;  %3337 = vmatprep.subr.bf16.mxu1 %v4527_v44  ;;  %v1731_v50 = vrot.slane %v3012_v42, %v3987_v20  ;;  %v3042_v42 = vld [vmem:[%s4500_s8 + $0x70] sm:$0xff] }
 0x330   : > { %v2078_v48 = vrot.slane %v3042_v42, %v3913_v54  ;;  %v2084_v37 = vrot.slane %v3042_v42, %v3898_v51 }
 0x331   : > { %v1349_v24 = vadd.f32 %v1348_v57, %v1339_v5  ;;  %v3590_v57 = vld [vmem:[#allocation2 + $0x170] sm:$0xff]  }
 0x332   : > { %3338 = vmatpush3.bf16.msra.mxu1 %v3582_v43  ;;  %v1716_v43 = vmul.f32 %v1715_v16, %v1711_v40  ;;  %v2092_v16 = vrot.slane %v3042_v42, %v3916_v55  ;;  %v2088_v40 = vmul.f32 %v3929_v60, %v2087_v22 }
 0x333   : > { %3339 = vmatprep.subr.bf16.mxu1 %v4527_v44  ;;  %v1355_v49 = vadd.f32 %v1354_v34, %v1349_v24  ;;  %v3014_v34 = vld [vmem:[%s4500_s8 + $0x58] ss:$0 sm:$0xff] }
 0x335   : > { %v1363_v1 = vadd.f32 %v1362_v14, %v1355_v49 }
 0x336   : > { %3340 = vmatpush3.bf16.msra.mxu1 %v3583_v9  ;;  %v3591_v9 = vld [vmem:[#allocation2 + $0x178] sm:$0xff]  }
 0x337   : > { %v1385_v41 = vpack.c.bf16 %v1363_v1, %v1363_v1  ;;  %3365 = vmatprep.subr.bf16.mxu1 %v4527_v44 }
 0x339   : > { %3342 = vmatmul.mubr.bf16.vlgmr.msra.gmra.mrb[8].mxu1 %v1385_v41 }
 0x33a   : > { %3366 = vmatpush3.bf16.msra.mxu1 %v3584_v7  ;;  %3381 = vmatprep.mubr.msk.bf16.mxu1 %vm3660_vm0, %v4527_v44  ;;  %v3592_v7 = vld [vmem:[#allocation2 + $0x1c0] sm:$0xff]  }
 0x33b   : > { %3367 = vmatprep.subr.bf16.mxu1 %v4527_v44 }
 0x33e   : > { %3368 = vmatpush3.bf16.msra.mxu1 %v3585_v58  ;;  %v3593_v58 = vld [vmem:[#allocation2 + $0x1c8] sm:$0xff]  }
 0x33f   : > { %3369 = vmatprep.subr.bf16.mxu1 %v4527_v44 }
 0x340   : > { %v1674_v10 = vpop.permute.xlu0 %1673  ;;  %v1719_v11 = vpop.permute.xlu1 %1718 }
 0x341   : > { %v1675_v47 = vrot.slane %v1674_v10, 7  ;;  %v1688_v2 = vrot.slane %v1674_v10, 1  ;;  %v1686_v30 = vmul.f32 %v1685_v3, %v1674_v10  ;;  %v1720_v52 = vrot.slane %v1719_v11, 7 }
 0x342   : > { %3370 = vmatpush3.bf16.msra.mxu1 %v3586_v18  ;;  %v1734_v26 = vrot.slane %v1719_v11, 1  ;;  %v1732_v24 = vmul.f32 %v1731_v50, %v1719_v11  ;;  %v3594_v18 = vld [vmem:[#allocation2 + $0x1d0] sm:$0xff]   ;;  %v2062_v3 = vrot.slane %v3042_v42, %v3932_v61  ;;  %v2108_v50 = vrot.slane %v3042_v42, %v3987_v20 }
 0x343   : > { %v1676_v8 = vmul.f32 %v3926_v59, %v1675_v47  ;;  %3371 = vmatprep.subr.bf16.mxu1 %v4527_v44  ;;  %v1689_v15 = vmul.f32 %v3929_v60, %v1688_v2  ;;  %v1721_v46 = vmul.f32 %v3926_v59, %v1720_v52 }
 0x344   : > { %v1735_v5 = vmul.f32 %v3929_v60, %v1734_v26 }
 0x345   : > { %v1681_v45 = vmul.f32 %v1680_v36, %v1676_v8  ;;  %v1694_v63 = vmul.f32 %v1693_v21, %v1689_v15  ;;  %v1726_v6 = vmul.f32 %v1725_v13, %v1721_v46  ;;  %v2057_v36 = vrot.slane %v3042_v42, %v3919_v56 }
 0x346   : > { %3372 = vmatpush3.bf16.msra.mxu1 %v3587_v33  ;;  %v1740_v14 = vmul.f32 %v3014_v34, %v1735_v5  ;;  %v3595_v33 = vld [vmem:[#allocation2 + $0x1d8] sm:$0xff]   ;;  %v2070_v21 = vrot.slane %v3042_v42, %v3935_v62  ;;  %v2102_v13 = vrot.slane %v3042_v42, %v3984_v19 }
 0x347   : > { %v1687_v31 = vadd.f32 %v1686_v30, %v1681_v45  ;;  %3373 = vmatprep.subr.bf16.mxu1 %v4527_v44  ;;  %v3044_v34 = vld [vmem:[%s4500_s8 + $0x78] ss:$0 sm:$0xff] }
 0x349   : > { %v1695_v28 = vadd.f32 %v1694_v63, %v1687_v31 }
 0x34a   : > { %3374 = vmatpush3.bf16.msra.mxu1 %v3588_v29  ;;  %v3596_v29 = vld [vmem:[#allocation2 + $0x1e0] sm:$0xff]  }
 0x34b   : > { %v1703_v32 = vadd.f32 %v1702_v53, %v1695_v28  ;;  %3375 = vmatprep.subr.bf16.mxu1 %v4527_v44  ;;  %v2079_v53 = vmul.f32 %v2078_v48, %v2074_v12  ;;  %v3604_v12 = vld [vmem:[#allocation2 + $0x260] sm:$0xff]  }
 0x34d   : > { %v1709_v39 = vadd.f32 %v1708_v35, %v1703_v32  ;;  %v2085_v35 = vmul.f32 %v2084_v37, %v4237_v17 }
 0x34e   : > { %3376 = vmatpush3.bf16.msra.mxu1 %v3589_v23  ;;  %v3597_v23 = vld [vmem:[#allocation2 + $0x1e8] sm:$0xff]  }
 0x34f   : > { %v1717_v25 = vadd.f32 %v1716_v43, %v1709_v39  ;;  %3377 = vmatprep.subr.bf16.mxu1 %v4527_v44  ;;  %v2093_v43 = vmul.f32 %v2092_v16, %v2088_v40 }
 0x351   : > { %v1727_v27 = vadd.f32 %v1726_v6, %v1717_v25 }
 0x352   : > { %3378 = vmatpush3.bf16.msra.mxu1 %v3590_v57  ;;  %v3598_v57 = vld [vmem:[#allocation2 + $0x1f0] sm:$0xff]  }
 0x353   : > { %3379 = vmatprep.subr.bf16.mxu1 %v4527_v44  ;;  %v1733_v49 = vadd.f32 %v1732_v24, %v1727_v27  ;;  %v3599_v27 = vld [vmem:[#allocation2 + $0x1f8] sm:$0xff]  }
 0x355   : > { %v1741_v1 = vadd.f32 %v1740_v14, %v1733_v49 }
 0x356   : > { %3380 = vmatpush3.bf16.msra.mxu1 %v3591_v9 }
 0x357   : > { %v1763_v41 = vpack.c.bf16 %v1741_v1, %v1741_v1  ;;  %3405 = vmatprep.subr.bf16.mxu1 %v4527_v44  ;;  %v3600_v1 = vld [vmem:[#allocation2 + $0x240] sm:$0xff]  }
 0x359   : > { %3382 = vmatmul.mubr.bf16.vlgmr.msra.gmra.mrb[12].mxu1 %v1763_v41  ;;  %v3601_v41 = vld [vmem:[#allocation2 + $0x248] sm:$0xff]  }
 0x35a   : > { %3406 = vmatpush3.bf16.msra.mxu1 %v3592_v7  ;;  %3421 = vmatprep.mubr.msk.bf16.mxu1 %vm3660_vm0, %v4527_v44 }
 0x35b   : > { %3407 = vmatprep.subr.bf16.mxu1 %v4527_v44 }
 0x35e   : > { %3408 = vmatpush3.bf16.msra.mxu1 %v3593_v58  ;;  %v3602_v58 = vld [vmem:[#allocation2 + $0x250] sm:$0xff]  }
 0x35f   : > { %3409 = vmatprep.subr.bf16.mxu1 %v4527_v44 }
 0x360   : > { %v2051_v10 = vpop.permute.xlu0 %2050  ;;  %v2096_v11 = vpop.permute.xlu1 %2095 }
 0x361   : > { %v2052_v47 = vrot.slane %v2051_v10, 7  ;;  %v2065_v2 = vrot.slane %v2051_v10, 1  ;;  %v2063_v30 = vmul.f32 %v2062_v3, %v2051_v10  ;;  %v2097_v52 = vrot.slane %v2096_v11, 7 }
 0x362   : > { %3410 = vmatpush3.bf16.msra.mxu1 %v3594_v18  ;;  %v2111_v26 = vrot.slane %v2096_v11, 1  ;;  %v2109_v24 = vmul.f32 %v2108_v50, %v2096_v11  ;;  %v3072_v18 = vld [vmem:[%s4500_s8 + $0x90] sm:$0xff] }
 0x363   : > { %v2053_v8 = vmul.f32 %v3926_v59, %v2052_v47  ;;  %3411 = vmatprep.subr.bf16.mxu1 %v4527_v44  ;;  %v2066_v15 = vmul.f32 %v3929_v60, %v2065_v2  ;;  %v2098_v46 = vmul.f32 %v3926_v59, %v2097_v52  ;;  %v2435_v42 = vrot.slane %v3072_v18, %v3919_v56  ;;  %v3603_v2 = vld [vmem:[#allocation2 + $0x258] sm:$0xff]  }
 0x364   : > { %v2112_v5 = vmul.f32 %v3929_v60, %v2111_v26  ;;  %v2456_v11 = vrot.slane %v3072_v18, %v3913_v54  ;;  %v2462_v37 = vrot.slane %v3072_v18, %v3898_v51  ;;  %v2480_v40 = vrot.slane %v3072_v18, %v3984_v19 }
 0x365   : > { %v2058_v45 = vmul.f32 %v2057_v36, %v2053_v8  ;;  %v2071_v63 = vmul.f32 %v2070_v21, %v2066_v15  ;;  %v2103_v6 = vmul.f32 %v2102_v13, %v2098_v46  ;;  %v2440_v36 = vrot.slane %v3072_v18, %v3932_v61  ;;  %v3605_v13 = vld [vmem:[#allocation2 + $0x268] sm:$0xff]  }
 0x366   : > { %3412 = vmatpush3.bf16.msra.mxu1 %v3595_v33  ;;  %v2117_v9 = vmul.f32 %v3044_v34, %v2112_v5  ;;  %v2448_v33 = vrot.slane %v3072_v18, %v3935_v62  ;;  %v2463_v46 = vmul.f32 %v2462_v37, %v4267_v0  ;;  %v3607_v34 = vld [vmem:[#allocation2 + $0x278] sm:$0xff]  }
 0x367   : > { %v2064_v31 = vadd.f32 %v2063_v30, %v2058_v45  ;;  %3413 = vmatprep.subr.bf16.mxu1 %v4527_v44  ;;  %v2452_v45 = vmul.f32 %v3926_v59, %v2451_v4  ;;  %v2465_v30 = vrot.slane %v4267_v0, 1  ;;  %v3074_v0 = vld [vmem:[%s4500_s8 + $0x98] ss:$0 sm:$0xff] }
 0x369   : > { %v2072_v28 = vadd.f32 %v2071_v63, %v2064_v31  ;;  %v2457_v16 = vmul.f32 %v2456_v11, %v2452_v45  ;;  %v3612_v45 = vld [vmem:[#allocation2 + $0x2a0] sm:$0xff]  }
 0x36a   : > { %3414 = vmatpush3.bf16.msra.mxu1 %v3596_v29 }
 0x36b   : > { %v2080_v32 = vadd.f32 %v2079_v53, %v2072_v28  ;;  %3415 = vmatprep.subr.bf16.mxu1 %v4527_v44  ;;  %v2470_v28 = vrot.slane %v3072_v18, %v3916_v55  ;;  %v2466_v53 = vmul.f32 %v3929_v60, %v2465_v30  ;;  %v3613_v30 = vld [vmem:[#allocation2 + $0x2a8] sm:$0xff]  }
 0x36d   : > { %v2086_v39 = vadd.f32 %v2085_v35, %v2080_v32  ;;  %v2486_v35 = vrot.slane %v3072_v18, %v3987_v20  ;;  %v2995_v18 = vld [vmem:[%s4502_s10 + $0x3] ss:$0 sm:$0xff] }
 0x36e   : > { %3416 = vmatpush3.bf16.msra.mxu1 %v3597_v23 }
 0x36f   : > { %v2094_v25 = vadd.f32 %v2093_v43, %v2086_v39  ;;  %3417 = vmatprep.subr.bf16.mxu1 %v4527_v44  ;;  %v2471_v39 = vmul.f32 %v2470_v28, %v2466_v53  ;;  %v3606_v43 = vld [vmem:[#allocation2 + $0x270] sm:$0xff]   ;;  %v3055_v28 = vld [vmem:[%s4502_s10 + $0x7] ss:$0 sm:$0xff] }
 0x371   : > { %v2104_v17 = vadd.f32 %v2103_v6, %v2094_v25 }
 0x372   : > { %3418 = vmatpush3.bf16.msra.mxu1 %v3598_v57 }
 0x373   : > { %3419 = vmatprep.subr.bf16.mxu1 %v4527_v44  ;;  %v2110_v14 = vadd.f32 %v2109_v24, %v2104_v17 }
 0x375   : > { %v2118_v49 = vadd.f32 %v2117_v9, %v2110_v14 }
 0x376   : > { %3420 = vmatpush3.bf16.msra.mxu1 %v3599_v27 }
 0x377   : > { %v2140_v7 = vpack.c.bf16 %v2118_v49, %v2118_v49  ;;  %3445 = vmatprep.subr.bf16.mxu1 %v4527_v44 }
 0x379   : > { %3422 = vmatmul.mubr.bf16.vlgmr.msra.gmra.mrb[16].mxu1 %v2140_v7  ;;  %v3608_v7 = vld [vmem:[#allocation2 + $0x280] sm:$0xff]  }
 0x37a   : > { %3446 = vmatpush3.bf16.msra.mxu1 %v3600_v1  ;;  %3461 = vmatprep.mubr.msk.bf16.mxu1 %vm3660_vm0, %v4527_v44 }
 0x37b   : > { %3447 = vmatprep.subr.bf16.mxu1 %v4527_v44  ;;  %3466 = vmatpush3.bf16.msra.mxu0 %v3608_v7 }
 0x37c   : > { %3467 = vmatprep.subr.bf16.mxu0 %v4527_v44 }
 0x37e   : > { %3448 = vmatpush3.bf16.msra.mxu1 %v3601_v41  ;;  %v3609_v41 = vld [vmem:[#allocation2 + $0x288] sm:$0xff]  }
 0x37f   : > { %3449 = vmatprep.subr.bf16.mxu1 %v4527_v44  ;;  %3468 = vmatpush3.bf16.msra.mxu0 %v3609_v41 }
 0x380   : > { %v2429_v10 = vpop.permute.xlu0 %2428  ;;  %3469 = vmatprep.subr.bf16.mxu0 %v4527_v44 }
 0x381   : > { %v2430_v3 = vrot.slane %v2429_v10, 7  ;;  %v2443_v47 = vrot.slane %v2429_v10, 1  ;;  %v2441_v22 = vmul.f32 %v2440_v36, %v2429_v10  ;;  %v3610_v10 = vld [vmem:[#allocation2 + $0x290] sm:$0xff]   ;;  %v2966_v36 = vld [vmem:[%s4503_s11 + $0x1] ss:$0 sm:$0xff] }
 0x382   : > { %3450 = vmatpush3.bf16.msra.mxu1 %v3602_v58  ;;  %v2965_v58 = vld [vmem:[%s4502_s10 + $0x1] ss:$0 sm:$0xff] }
 0x383   : > { %v2431_v21 = vmul.f32 %v3926_v59, %v2430_v3  ;;  %v2444_v8 = vmul.f32 %v3929_v60, %v2443_v47  ;;  %3451 = vmatprep.subr.bf16.mxu1 %v4527_v44  ;;  %v2996_v3 = vld [vmem:[%s4503_s11 + $0x3] ss:$0 sm:$0xff]  ;;  %3470 = vmatpush3.bf16.msra.mxu0 %v3610_v10 }
 0x384   : > { %v2474_v48 = vpop.permute.xlu0 %2473  ;;  %3471 = vmatprep.subr.bf16.mxu0 %v4527_v44 }
 0x385   : > { %v2436_v15 = vmul.f32 %v2435_v42, %v2431_v21  ;;  %v2449_v52 = vmul.f32 %v2448_v33, %v2444_v8  ;;  %v2475_v31 = vrot.slane %v2474_v48, 7  ;;  %v2489_v32 = vrot.slane %v2474_v48, 1 }
 0x386   : > { %3452 = vmatpush3.bf16.msra.mxu1 %v3603_v2  ;;  %v2487_v25 = vmul.f32 %v2486_v35, %v2474_v48  ;;  %v3611_v48 = vld [vmem:[#allocation2 + $0x298] sm:$0xff]  }
 0x387   : > { %v2442_v29 = vadd.f32 %v2441_v22, %v2436_v15  ;;  %3453 = vmatprep.subr.bf16.mxu1 %v4527_v44  ;;  %v2476_v26 = vmul.f32 %v3926_v59, %v2475_v31  ;;  %v2490_v5 = vmul.f32 %v3929_v60, %v2489_v32  ;;  %3472 = vmatpush3.bf16.msra.mxu0 %v3611_v48 }
 0x388   : > { %3473 = vmatprep.subr.bf16.mxu0 %v4527_v44 }
 0x389   : > { %v2450_v63 = vadd.f32 %v2449_v52, %v2442_v29  ;;  %v2481_v6 = vmul.f32 %v2480_v40, %v2476_v26  ;;  %v2495_v17 = vmul.f32 %v3074_v0, %v2490_v5  ;;  %v3615_v29 = vld [vmem:[#allocation2 + $0x2b8] sm:$0xff]   ;;  %v3026_v40 = vld [vmem:[%s4503_s11 + $0x5] ss:$0 sm:$0xff] }
 0x38a   : > { %3454 = vmatpush3.bf16.msra.mxu1 %v3604_v12  ;;  %v3614_v12 = vld [vmem:[#allocation2 + $0x2b0] sm:$0xff]  }
 0x38b   : > { %v2458_v23 = vadd.f32 %v2457_v16, %v2450_v63  ;;  %3455 = vmatprep.subr.bf16.mxu1 %v4527_v44  ;;  %3474 = vmatpush3.bf16.msra.mxu0 %v3612_v45  ;;  %v3025_v16 = vld [vmem:[%s4502_s10 + $0x5] ss:$0 sm:$0xff] }
 0x38c   : > { %3475 = vmatprep.subr.bf16.mxu0 %v4527_v44 }
 0x38d   : > { %v2464_v50 = vadd.f32 %v2463_v46, %v2458_v23 }
 0x38e   : > { %3456 = vmatpush3.bf16.msra.mxu1 %v3605_v13  ;;  %v3056_v13 = vld [vmem:[%s4503_s11 + $0x7] ss:$0 sm:$0xff] }
 0x38f   : > { %v2472_v57 = vadd.f32 %v2471_v39, %v2464_v50  ;;  %3457 = vmatprep.subr.bf16.mxu1 %v4527_v44  ;;  %3476 = vmatpush3.bf16.msra.mxu0 %v3613_v30 }
 0x390   : > { %3477 = vmatprep.subr.bf16.mxu0 %v4527_v44 }
 0x391   : > { %v2482_v59 = vadd.f32 %v2481_v6, %v2472_v57  ;;  %v3085_v57 = vld [vmem:[%s4502_s10 + $0x9] ss:$0 sm:$0xff] }
 0x392   : > { %3458 = vmatpush3.bf16.msra.mxu1 %v3606_v43  ;;  %v3086_v6 = vld [vmem:[%s4503_s11 + $0x9] ss:$0 sm:$0xff] }
 0x393   : > { %v2488_v24 = vadd.f32 %v2487_v25, %v2482_v59  ;;  %3459 = vmatprep.subr.bf16.mxu1 %v4527_v44  ;;  %3478 = vmatpush3.bf16.msra.mxu0 %v3614_v12 }
 0x394   : > { %3479 = vmatprep.subr.bf16.mxu0 %v4527_v44 }
 0x395   : > { %v2496_v27 = vadd.f32 %v2495_v17, %v2488_v24 }
 0x396   : > { %3460 = vmatpush3.bf16.msra.mxu1 %v3607_v34 }
 0x397   : > { %v2518_v9 = vpack.c.bf16 %v2496_v27, %v2496_v27  ;;  %3480 = vmatpush3.bf16.msra.mxu0 %v3615_v29  ;;  %v4528_v27 = vld [vmem:[#allocation5_spill] sm:$0xff] }
 0x398   : > { %vm452_vm3 = vcmp.ge.s32.totalorder %v4528_v27, 2  ;;  %vm455_vm4 = vcmp.lt.s32.totalorder %v4528_v27, 6 }
 0x399   : > { %3462 = vmatmul.mubr.bf16.vlgmr.msra.gmra.mrb[20].mxu1 %v2518_v9  ;;  %v3087_v9 = vld [vmem:[%s4500_s8 + $0xa0] sm:$0xff] }
 0x39a   : > { %v2678_v45 = vrot.slane %v3087_v9, %v3984_v19 }
 0x3ec   : > { %v1074_v14 = vpop.f32.mrb[4].mxu1 }
 0x3ed   : > { %v3303_v60 = vpop.f32.mrb[5].mxu1  ;;  %v1086_v42 = vmul.f32 %v2965_v58, %v1074_v14  ;;  %v2633_v14 = vrot.slane %v3087_v9, %v3919_v56  ;;  %v2919_v58 = vsel %vm452_vm3, 1.0, %v4527_v44 }
 0x3ee   : > { %v1077_v49 = vpop.f32.mrb[6].mxu1 }
 0x3ef   : > { %v3304_v1 = vpop.f32.mrb[7].mxu1  ;;  %v1093_v21 = vadd.f32 %v2966_v36, %v1086_v42  ;;  %v2638_v49 = vrot.slane %v3087_v9, %v3932_v61  ;;  %v2646_v42 = vrot.slane %v3087_v9, %v3935_v62  ;;  %v2668_v62 = vrot.slane %v3087_v9, %v3916_v55 }
 0x40c   : > { %v1468_v47 = vpop.f32.mrb[8].mxu1 }
 0x40d   : > { %v1480_v4 = vmul.f32 %v2995_v18, %v1468_v47  ;;  %v3343_v2 = vpop.f32.mrb[9].mxu1  ;;  %v2920_v18 = vsel %vm455_vm4, 1.0, %v4527_v44 }
 0x40e   : > { %v1471_v33 = vpop.f32.mrb[10].mxu1 }
 0x40f   : > { %v1487_v8 = vadd.f32 %v2996_v3, %v1480_v4  ;;  %v3344_v11 = vpop.f32.mrb[11].mxu1  ;;  %v2654_v3 = vrot.slane %v3087_v9, %v3913_v54 }
 0x411   : > { %v1488_v15 = vadd.f32 %v1487_v8, %v1093_v21  ;;  %v2660_v8 = vrot.slane %v3087_v9, %v3898_v51 }
 0x413   : > { %v4431_v22 = vmax.f32 %v1488_v15, 0.0  ;;  %2820 = vst [vmem:[%s4428_s17] sm:$0xff] %v1488_v15 }
 0x415   : > { %2626 = vrot.lane.b32.xlu1 %v4431_v22, %s3663_s22  ;;  %v2649_v1 = vrot.slane %v4431_v22, 6  ;;  %v2663_v56 = vrot.slane %v4431_v22, 2  ;;  %v2661_v54 = vmul.f32 %v2660_v8, %v4431_v22 }
 0x417   : > { %v2650_v4 = vmul.f32 %v2919_v58, %v2649_v1  ;;  %v2664_v15 = vmul.f32 %v2920_v18, %v2663_v56 }
 0x419   : > { %2671 = vrot.lane.b32.xlu1 %v4431_v22, %s3664_s18  ;;  %v2655_v48 = vmul.f32 %v2654_v3, %v2650_v4 }
 0x42c   : > { %v1846_v52 = vpop.f32.mrb[12].mxu1 }
 0x42d   : > { %v3383_v37 = vpop.f32.mrb[13].mxu1  ;;  %v1858_v53 = vmul.f32 %v3025_v16, %v1846_v52 }
 0x42e   : > { %v1849_v31 = vpop.f32.mrb[14].mxu1  ;;  %v2669_v37 = vmul.f32 %v2668_v62, %v2664_v15 }
 0x42f   : > { %v3384_v63 = vpop.f32.mrb[15].mxu1  ;;  %v1865_v35 = vadd.f32 %v3026_v40, %v1858_v53  ;;  %v2684_v31 = vrot.slane %v3087_v9, %v3987_v20  ;;  %v3101_v20 = vld [vmem:[%s4503_s11 + $0xa] ss:$0 sm:$0xff] }
 0x44c   : > { %v2223_v23 = vpop.f32.mrb[16].mxu1 }
 0x44d   : > { %v2235_v46 = vmul.f32 %v3055_v28, %v2223_v23  ;;  %v3423_v26 = vpop.f32.mrb[17].mxu1  ;;  %v3089_v28 = vld [vmem:[%s4500_s8 + $0xa8] ss:$0 sm:$0xff]  ;;  %v3100_v23 = vld [vmem:[%s4502_s10 + $0xa] ss:$0 sm:$0xff] }
 0x44e   : > { %v2226_v32 = vpop.f32.mrb[18].mxu1 }
 0x44f   : > { %v2242_v50 = vadd.f32 %v3056_v13, %v2235_v46  ;;  %v3424_v39 = vpop.f32.mrb[19].mxu1 }
 0x451   : > { %v2243_v43 = vadd.f32 %v2242_v50, %v1865_v35 }
 0x453   : > { %3102 = vst [vmem:[%s4428_s17 + $0x8] sm:$0xff] %v2243_v43 }
 0x46c   : > { %v2601_v5 = vpop.f32.mrb[20].mxu1 }
 0x46d   : > { %v2613_v0 = vmul.f32 %v3085_v57, %v2601_v5  ;;  %v3463_v59 = vpop.f32.mrb[21].mxu1 }
 0x46e   : > { %v2604_v25 = vpop.f32.mrb[22].mxu1 }
 0x46f   : > { %v2620_v34 = vadd.f32 %v3086_v6, %v2613_v0  ;;  %v3464_v24 = vpop.f32.mrb[23].mxu1 }
 0x471   : > { %v2621_v17 = vadd.f32 %v2620_v34, %v3875_v38 }
 0x473   : > { %3103 = vst [vmem:[%s4428_s17 + $0x10] sm:$0xff] %v2621_v17 }
 0x487   : > { %v2627_v60 = vpop.permute.xlu1 %2626 }
 0x488   : > { %v2628_v7 = vrot.slane %v2627_v60, 6  ;;  %v2641_v41 = vrot.slane %v2627_v60, 2  ;;  %v2639_v61 = vmul.f32 %v2638_v49, %v2627_v60 }
 0x48a   : > { %v2629_v10 = vmul.f32 %v2919_v58, %v2628_v7  ;;  %v2642_v36 = vmul.f32 %v2920_v18, %v2641_v41 }
 0x48b   : > { %v2672_v47 = vpop.permute.xlu1 %2671 }
 0x48c   : > { %v2634_v2 = vmul.f32 %v2633_v14, %v2629_v10  ;;  %v2647_v21 = vmul.f32 %v2646_v42, %v2642_v36  ;;  %v2673_v11 = vrot.slane %v2672_v47, 6  ;;  %v2687_v29 = vrot.slane %v2672_v47, 2 }
 0x48d   : > { %v2685_v55 = vmul.f32 %v2684_v31, %v2672_v47 }
 0x48e   : > { %v2640_v33 = vadd.f32 %v2639_v61, %v2634_v2  ;;  %v2674_v12 = vmul.f32 %v2919_v58, %v2673_v11  ;;  %v2688_v51 = vmul.f32 %v2920_v18, %v2687_v29 }
 0x490   : > { %v2648_v44 = vadd.f32 %v2647_v21, %v2640_v33  ;;  %v2679_v16 = vmul.f32 %v2678_v45, %v2674_v12  ;;  %v2693_v40 = vmul.f32 %v3089_v28, %v2688_v51 }
 0x492   : > { %v2656_v30 = vadd.f32 %v2655_v48, %v2648_v44 }
 0x494   : > { %v2662_v52 = vadd.f32 %v2661_v54, %v2656_v30 }
 0x496   : > { %v2670_v63 = vadd.f32 %v2669_v37, %v2662_v52 }
 0x498   : > { %v2680_v53 = vadd.f32 %v2679_v16, %v2670_v63 }
 0x49a   : > { %v2686_v19 = vadd.f32 %v2685_v55, %v2680_v53 }
 0x49c   : > { %v2694_v13 = vadd.f32 %v2693_v40, %v2686_v19 }
 0x49e   : > { %v2716_v22 = vpack.c.bf16 %v2694_v13, %v2694_v13 }
 0x4a0   : > { %3482 = vmatmul.mubr.bf16.vlgmr.msra.gmra.mrb[24].mxu0 %v2716_v22 }
 0x573   : > { %v2799_v46 = vpop.f32.mrb[24].mxu0 }
 0x574   : > { %v2811_v26 = vmul.f32 %v3100_v23, %v2799_v46  ;;  %v3483_v32 = vpop.f32.mrb[25].mxu0 }
 0x575   : > { %v2802_v35 = vpop.f32.mrb[26].mxu0 }
 0x576   : > { %v2818_v50 = vadd.f32 %v3101_v20, %v2811_v26  ;;  %v3484_v39 = vpop.f32.mrb[27].mxu0 }
 0x578   : > { %v2819_v43 = vadd.f32 %v2818_v50, %v3875_v38 }
 0x57a   : > { %3104 = vst [vmem:[%s4428_s17 + $0x18] sm:$0xff] %v2819_v43 }
 0x57b PF: > { %s23_s21 = sadd.s32 1, %s3654_s21  }
 0x57c   : > { %p20_p3 = scmp.ge.s32.totalorder %s23_s21, 4  }
 0x57e   :  { %22 = sbr.rel (!%p20_p3) target bundleno = 1 (0x1), region = 149 }
 0x585   :  { %2848 = vsyncpa [#allocation3], 1 }
 0x586   :  { %2850 = vsyncpa [#allocation3 + $0x1], 1 }

</bundles_post_ra>
